<compile_context>
chip_gen: v7x
topology: tpu7x:2x2x1
jax: 0.10.0
libtpu: 0.0.40
codegen_flags: <defaults>
</compile_context>

<pallas_src>
import functools
import math

import jax
import jax.numpy as jnp
from jax.experimental import pallas as pl
from jax.experimental.pallas import tpu as pltpu


def _round_up(x, m):
    return ((x + m - 1) // m) * m


def _cdiv(a, b):
    return -(-a // b)


def _pick_row_tile(OH, OW, N, max_rows=256):
    """Output-row tile TOH with TOH*OW <= ~max_rows output pixels (keeps the
    f32 dot result + epilogue in-vreg), TOH*OW a multiple of 8 when possible
    (dense sublane layout), and >= 2 grid steps overall (v7x: 2 TensorCores)."""
    toh = max(1, min(OH, max_rows // max(OW, 1)))
    m = 8 // math.gcd(OW, 8)             # TOH multiple making TOH*OW % 8 == 0
    if toh >= m:
        toh = (toh // m) * m
    n_tiles = _cdiv(OH, toh)
    if N * n_tiles < 2 and OH > 1:       # keep both v7x TensorCores busy
        toh = _cdiv(OH, 2)
        n_tiles = _cdiv(OH, toh)
    return toh, n_tiles


def _conv_kernel(x_ref, w_ref, shift_ref, o_ref, slab_ref, *,
                 KH, KW, SH, SW, DH, DW, TOH, OW, C, relu):
    """One (batch, output-row-tile, OC-tile) block.

    x_ref     : (1, Hp, Wp, C)      bf16  spatially padded NHWC input image
    w_ref     : (KH*KW*C, TOC)      bf16  scale-folded, OC-tiled weight
    shift_ref : (1, TOC)            f32   folded bias/BN shift
    o_ref     : (1, TOH, OW, TOC)   bf16  output tile
    slab_ref  : (TOH*OW, KH*KW*C)   bf16  VMEM im2col scratch
    """
    t = pl.program_id(1)
    row_base = pl.multiple_of(t * (TOH * SH), TOH * SH)

    # Build the im2col slab: KH*KW shifted (TOH, OW, C) views packed along the
    # contraction axis.  Statically unrolled (KH*KW is small).
    for kh in range(KH):
        r0 = row_base + kh * DH
        rs = pl.ds(r0, TOH) if SH == 1 else pl.ds(r0, TOH, stride=SH)
        for kw in range(KW):
            c0 = kw * DW
            # TODO(synk): for SW > 1, load the dense W window once per kh and
            # apply the W-stride once instead of KW strided sublane reads.
            cs = pl.ds(c0, OW) if SW == 1 else pl.ds(c0, OW, stride=SW)
            tap = kh * KW + kw
            slab_ref[:, tap * C:(tap + 1) * C] = (
                x_ref[0, rs, cs, :].reshape(TOH * OW, C))

    # Single MXU contraction over K = KH*KW*C, f32 accumulation.
    acc = jnp.dot(slab_ref[...], w_ref[...], preferred_element_type=jnp.float32)
    acc = acc + shift_ref[...]
    if relu:
        acc = jnp.maximum(acc, 0.0)
    o_ref[...] = acc.reshape(1, TOH, OW, acc.shape[-1]).astype(o_ref.dtype)


class BasicConv:
    """JAX/Pallas port of the PyTorch BasicConv module (groups=1)."""

    def __init__(self, in_planes, out_planes, kernel_size, stride=1, padding=0,
                 dilation=1, groups=1, relu=True, bn=False, bias=False, *, key=None):
        assert groups == 1, "groups != 1 not supported in this port"
        to2 = lambda v: (v, v) if isinstance(v, int) else tuple(v)
        kernel_size = to2(kernel_size)
        stride = to2(stride)
        padding = to2(padding)
        dilation = to2(dilation)

        self.in_planes = in_planes
        self.out_channels = out_planes
        self.kernel_size = kernel_size
        self.stride = stride
        self.padding = padding
        self.dilation = dilation
        self.relu = relu
        self.bn = bn
        self.use_bias = bias

        if key is None:
            key = jax.random.PRNGKey(0)
        kw_, kb_ = jax.random.split(key)
        KH, KW = kernel_size
        fan_in = in_planes * KH * KW
        bound = 1.0 / jnp.sqrt(jnp.float32(fan_in))
        # PyTorch Conv2d weight layout: (OC, C, KH, KW) -- f32 master copy.
        self.weight = jax.random.uniform(
            kw_, (out_planes, in_planes, KH, KW), jnp.float32, -bound, bound)
        self.bias = (jax.random.uniform(kb_, (out_planes,), jnp.float32, -bound, bound)
                     if bias else None)

        if bn:
            # TODO(synk): BatchNorm2d training-mode batch statistics / momentum
            # update are not implemented; eval-mode running-stats affine is
            # folded into the conv instead.
            self.bn_gamma = jnp.ones((out_planes,), jnp.float32)
            self.bn_beta = jnp.zeros((out_planes,), jnp.float32)
            self.bn_mean = jnp.zeros((out_planes,), jnp.float32)
            self.bn_var = jnp.ones((out_planes,), jnp.float32)
            self.bn_eps = 1e-5

        # ---- fold bias / BN into per-OC affine; fold scale into the weight ----
        OC = out_planes
        scale = jnp.ones((OC,), jnp.float32)
        shift = jnp.zeros((OC,), jnp.float32)
        if self.use_bias:
            shift = shift + self.bias
        if bn:
            inv_std = 1.0 / jnp.sqrt(self.bn_var + self.bn_eps)
            scale = scale * self.bn_gamma * inv_std
            shift = shift * self.bn_gamma * inv_std + (
                self.bn_beta - self.bn_mean * self.bn_gamma * inv_std)

        OCp = _round_up(OC, 128)
        w = self.weight * scale[:, None, None, None]            # (OC, C, KH, KW)
        w = w.transpose(2, 3, 1, 0).reshape(KH * KW * in_planes, OC)  # (K, OC)
        self._w_kernel = jnp.zeros((KH * KW * in_planes, OCp), jnp.bfloat16
                                   ).at[:, :OC].set(w.astype(jnp.bfloat16))
        self._shift = jnp.zeros((1, OCp), jnp.float32).at[0, :OC].set(shift)
        self._ocp = OCp
        # OC tile width: bound resident weight / output tile for wide layers.
        if OCp <= 512:
            self._toc = OCp
        elif OCp % 256 == 0:
            self._toc = 256
        else:
            self._toc = 128

    def __call__(self, x):
        N, C, H, W = x.shape
        assert C == self.in_planes
        KH, KW = self.kernel_size
        SH, SW = self.stride
        PH, PW = self.padding
        DH, DW = self.dilation
        OC = self.out_channels
        OCp = self._ocp
        TOC = self._toc
        n_oc = OCp // TOC

        OH = (H + 2 * PH - DH * (KH - 1) - 1) // SH + 1
        OW = (W + 2 * PW - DW * (KW - 1) - 1) // SW + 1

        TOH, n_tiles = _pick_row_tile(OH, OW, N)
        OHp = TOH * n_tiles

        # Pad the bottom so the (possibly ragged) last row tile only reads
        # in-bounds rows; the extra output rows are sliced off at the end.
        Hp_need = (OHp - 1) * SH + DH * (KH - 1) + 1
        Hp = max(H + 2 * PH, Hp_need)
        Wp = W + 2 * PW

        # One NHWC + spatial-pad + bf16 pass over the activation.
        # TODO(synk): in a full model keep activations NHWC bf16 end-to-end so
        # this per-layer transpose/pad/cast pass disappears.
        xp = jnp.pad(x.transpose(0, 2, 3, 1),
                     ((0, 0), (PH, Hp - H - PH), (PW, PW), (0, 0))
                     ).astype(jnp.bfloat16)

        K = KH * KW * C
        kernel = functools.partial(_conv_kernel, KH=KH, KW=KW, SH=SH, SW=SW,
                                   DH=DH, DW=DW, TOH=TOH, OW=OW, C=C,
                                   relu=self.relu)

        # Explicit VMEM budget: 2x (input + weight + shift + output) blocks
        # (double-buffered pipeline) + im2col scratch + f32 dot result.
        need = (2 * (Hp * Wp * C * 2 + K * TOC * 2 + TOC * 4
                     + TOH * OW * TOC * 2)
                + TOH * OW * K * 2 + TOH * OW * TOC * 4)
        vmem_limit = int(min(max(need * 1.4, 32 * 2 ** 20), 96 * 2 ** 20))

        out_p = pl.pallas_call(
            kernel,
            out_shape=jax.ShapeDtypeStruct((N, OHp, OW, OCp), jnp.bfloat16),
            grid_spec=pltpu.PrefetchScalarGridSpec(
                num_scalar_prefetch=0,
                grid=(N, n_tiles, n_oc),
                in_specs=[
                    # Full padded image of batch n; the block index only
                    # changes with n so it stays resident across row/OC tiles.
                    pl.BlockSpec((1, Hp, Wp, C), lambda n, t, oc: (n, 0, 0, 0)),
                    # OC-tiled, otherwise grid-invariant weight / shift.
                    pl.BlockSpec((K, TOC), lambda n, t, oc: (0, oc)),
                    pl.BlockSpec((1, TOC), lambda n, t, oc: (0, oc)),
                ],
                out_specs=pl.BlockSpec((1, TOH, OW, TOC),
                                       lambda n, t, oc: (n, t, 0, oc)),
                scratch_shapes=[pltpu.VMEM((TOH * OW, K), jnp.bfloat16)],
            ),
            compiler_params=pltpu.CompilerParams(
                dimension_semantics=("parallel", "parallel", "parallel"),
                vmem_limit_bytes=vmem_limit),
        )(xp, self._w_kernel, self._shift)

        # Module boundary: drop OC / row padding, back to NCHW f32 (PyTorch parity).
        return out_p[:, :OH, :, :OC].transpose(0, 3, 1, 2).astype(jnp.float32)


def _reference(x, module):
    """Pure-JAX f32 reference (lax conv) for correctness check."""
    dn = jax.lax.conv_dimension_numbers(x.shape, module.weight.shape,
                                        ("NCHW", "OIHW", "NCHW"))
    y = jax.lax.conv_general_dilated(
        x, module.weight,
        window_strides=module.stride,
        padding=[(module.padding[0], module.padding[0]),
                 (module.padding[1], module.padding[1])],
        rhs_dilation=module.dilation,
        dimension_numbers=dn)
    if module.use_bias:
        y = y + module.bias[None, :, None, None]
    if module.bn:
        inv_std = 1.0 / jnp.sqrt(module.bn_var + module.bn_eps)
        y = (y - module.bn_mean[None, :, None, None]) * (
            module.bn_gamma * inv_std)[None, :, None, None] \
            + module.bn_beta[None, :, None, None]
    if module.relu:
        y = jnp.maximum(y, 0.0)
    return y


if __name__ == "__main__":
    key = jax.random.PRNGKey(0)
    kx, kp = jax.random.split(key)

    # Small shapes: batch=2, in_ch=4, out_ch=8, 16x16 spatial, 3x3 conv, pad=1.
    x = jax.random.normal(kx, (2, 4, 16, 16), jnp.float32)
    module = BasicConv(in_planes=4, out_planes=8, kernel_size=3, stride=1,
                       padding=1, relu=True, bn=False, bias=False, key=kp)

    out = jax.block_until_ready(module(x))
    ref = _reference(x, module)

    assert out.shape == (2, 8, 16, 16), out.shape
    # bf16 activations/weights on the MXU + bf16 output storage vs f32 reference.
    err = float(jnp.max(jnp.abs(out - ref)))
    assert err < 5e-2, err

    print("KERNEL_OK")
</pallas_src>

<mosaic_0001>
module attributes {stable_mosaic.version = 11 : i64} {
  func.func @_conv_kernel(%arg0: i32, %arg1: i32, %arg2: i32, %arg3: memref<1x18x18x4xbf16, #tpu.memory_space<vmem>>, %arg4: memref<36x128xbf16, #tpu.memory_space<vmem>>, %arg5: memref<1x128xf32, #tpu.memory_space<vmem>>, %arg6: memref<1x16x16x128xbf16, #tpu.memory_space<vmem>>, %arg7: memref<256x36xbf16, #tpu.memory_space<vmem>>) attributes {dimension_semantics = [#tpu.dimension_semantics<parallel>, #tpu.dimension_semantics<parallel>, #tpu.dimension_semantics<parallel>], iteration_bounds = array<i64: 2, 1, 1>, scalar_prefetch = 0 : i64, scratch_operands = 1 : i64, tpu.core_type = #tpu.core_type<tc>, window_params = [{transform_indices = @transform_0, window_bounds = array<i64: 1, 18, 18, 4>}, {transform_indices = @transform_1, window_bounds = array<i64: 36, 128>}, {transform_indices = @transform_2, window_bounds = array<i64: 1, 128>}, {transform_indices = @transform_3, window_bounds = array<i64: 1, 16, 16, 128>}]} {
    %c16_i32 = arith.constant 16 : i32
    %0 = arith.muli %arg1, %c16_i32 : i32
    %1 = tpu.assume_multiple %0, 16 : i32
    %c0_i32 = arith.constant 0 : i32
    %2 = arith.addi %1, %c0_i32 : i32
    %c0 = arith.constant 0 : index
    %3 = arith.index_cast %2 : i32 to index
    %c0_0 = arith.constant 0 : index
    %c0_1 = arith.constant 0 : index
    %4 = vector.load %arg3[%c0, %3, %c0_0, %c0_1] : memref<1x18x18x4xbf16, #tpu.memory_space<vmem>>, vector<1x16x16x4xbf16>
    %5 = vector.shape_cast %4 : vector<1x16x16x4xbf16> to vector<16x16x4xbf16>
    %6 = vector.shape_cast %5 : vector<16x16x4xbf16> to vector<256x4xbf16>
    %c0_2 = arith.constant 0 : index
    %c0_3 = arith.constant 0 : index
    %7 = vector.load %arg7[%c0_2, %c0_3] : memref<256x36xbf16, #tpu.memory_space<vmem>>, vector<256x4xbf16>
    tpu.vector_store %arg7[%c0_2, %c0_3], %6 {strides = array<i32>} : memref<256x36xbf16, #tpu.memory_space<vmem>>, vector<256x4xbf16>,
    %c0_4 = arith.constant 0 : index
    %8 = arith.index_cast %2 : i32 to index
    %c1 = arith.constant 1 : index
    %c0_5 = arith.constant 0 : index
    %9 = vector.load %arg3[%c0_4, %8, %c1, %c0_5] : memref<1x18x18x4xbf16, #tpu.memory_space<vmem>>, vector<1x16x16x4xbf16>
    %10 = vector.shape_cast %9 : vector<1x16x16x4xbf16> to vector<16x16x4xbf16>
    %11 = vector.shape_cast %10 : vector<16x16x4xbf16> to vector<256x4xbf16>
    %c0_6 = arith.constant 0 : index
    %c4 = arith.constant 4 : index
    %12 = vector.load %arg7[%c0_6, %c4] : memref<256x36xbf16, #tpu.memory_space<vmem>>, vector<256x4xbf16>
    tpu.vector_store %arg7[%c0_6, %c4], %11 {strides = array<i32>} : memref<256x36xbf16, #tpu.memory_space<vmem>>, vector<256x4xbf16>,
    %c0_7 = arith.constant 0 : index
    %13 = arith.index_cast %2 : i32 to index
    %c2 = arith.constant 2 : index
    %c0_8 = arith.constant 0 : index
    %14 = vector.load %arg3[%c0_7, %13, %c2, %c0_8] : memref<1x18x18x4xbf16, #tpu.memory_space<vmem>>, vector<1x16x16x4xbf16>
    %15 = vector.shape_cast %14 : vector<1x16x16x4xbf16> to vector<16x16x4xbf16>
    %16 = vector.shape_cast %15 : vector<16x16x4xbf16> to vector<256x4xbf16>
    %c0_9 = arith.constant 0 : index
    %c8 = arith.constant 8 : index
    %17 = vector.load %arg7[%c0_9, %c8] : memref<256x36xbf16, #tpu.memory_space<vmem>>, vector<256x4xbf16>
    tpu.vector_store %arg7[%c0_9, %c8], %16 {strides = array<i32>} : memref<256x36xbf16, #tpu.memory_space<vmem>>, vector<256x4xbf16>,
    %c1_i32 = arith.constant 1 : i32
    %18 = arith.addi %1, %c1_i32 : i32
    %c0_10 = arith.constant 0 : index
    %19 = arith.index_cast %18 : i32 to index
    %c0_11 = arith.constant 0 : index
    %c0_12 = arith.constant 0 : index
    %20 = vector.load %arg3[%c0_10, %19, %c0_11, %c0_12] : memref<1x18x18x4xbf16, #tpu.memory_space<vmem>>, vector<1x16x16x4xbf16>
    %21 = vector.shape_cast %20 : vector<1x16x16x4xbf16> to vector<16x16x4xbf16>
    %22 = vector.shape_cast %21 : vector<16x16x4xbf16> to vector<256x4xbf16>
    %c0_13 = arith.constant 0 : index
    %c12 = arith.constant 12 : index
    %23 = vector.load %arg7[%c0_13, %c12] : memref<256x36xbf16, #tpu.memory_space<vmem>>, vector<256x4xbf16>
    tpu.vector_store %arg7[%c0_13, %c12], %22 {strides = array<i32>} : memref<256x36xbf16, #tpu.memory_space<vmem>>, vector<256x4xbf16>,
    %c0_14 = arith.constant 0 : index
    %24 = arith.index_cast %18 : i32 to index
    %c1_15 = arith.constant 1 : index
    %c0_16 = arith.constant 0 : index
    %25 = vector.load %arg3[%c0_14, %24, %c1_15, %c0_16] : memref<1x18x18x4xbf16, #tpu.memory_space<vmem>>, vector<1x16x16x4xbf16>
    %26 = vector.shape_cast %25 : vector<1x16x16x4xbf16> to vector<16x16x4xbf16>
    %27 = vector.shape_cast %26 : vector<16x16x4xbf16> to vector<256x4xbf16>
    %c0_17 = arith.constant 0 : index
    %c16 = arith.constant 16 : index
    %28 = vector.load %arg7[%c0_17, %c16] : memref<256x36xbf16, #tpu.memory_space<vmem>>, vector<256x4xbf16>
    tpu.vector_store %arg7[%c0_17, %c16], %27 {strides = array<i32>} : memref<256x36xbf16, #tpu.memory_space<vmem>>, vector<256x4xbf16>,
    %c0_18 = arith.constant 0 : index
    %29 = arith.index_cast %18 : i32 to index
    %c2_19 = arith.constant 2 : index
    %c0_20 = arith.constant 0 : index
    %30 = vector.load %arg3[%c0_18, %29, %c2_19, %c0_20] : memref<1x18x18x4xbf16, #tpu.memory_space<vmem>>, vector<1x16x16x4xbf16>
    %31 = vector.shape_cast %30 : vector<1x16x16x4xbf16> to vector<16x16x4xbf16>
    %32 = vector.shape_cast %31 : vector<16x16x4xbf16> to vector<256x4xbf16>
    %c0_21 = arith.constant 0 : index
    %c20 = arith.constant 20 : index
    %33 = vector.load %arg7[%c0_21, %c20] : memref<256x36xbf16, #tpu.memory_space<vmem>>, vector<256x4xbf16>
    tpu.vector_store %arg7[%c0_21, %c20], %32 {strides = array<i32>} : memref<256x36xbf16, #tpu.memory_space<vmem>>, vector<256x4xbf16>,
    %c2_i32 = arith.constant 2 : i32
    %34 = arith.addi %1, %c2_i32 : i32
    %c0_22 = arith.constant 0 : index
    %35 = arith.index_cast %34 : i32 to index
    %c0_23 = arith.constant 0 : index
    %c0_24 = arith.constant 0 : index
    %36 = vector.load %arg3[%c0_22, %35, %c0_23, %c0_24] : memref<1x18x18x4xbf16, #tpu.memory_space<vmem>>, vector<1x16x16x4xbf16>
    %37 = vector.shape_cast %36 : vector<1x16x16x4xbf16> to vector<16x16x4xbf16>
    %38 = vector.shape_cast %37 : vector<16x16x4xbf16> to vector<256x4xbf16>
    %c0_25 = arith.constant 0 : index
    %c24 = arith.constant 24 : index
    %39 = vector.load %arg7[%c0_25, %c24] : memref<256x36xbf16, #tpu.memory_space<vmem>>, vector<256x4xbf16>
    tpu.vector_store %arg7[%c0_25, %c24], %38 {strides = array<i32>} : memref<256x36xbf16, #tpu.memory_space<vmem>>, vector<256x4xbf16>,
    %c0_26 = arith.constant 0 : index
    %40 = arith.index_cast %34 : i32 to index
    %c1_27 = arith.constant 1 : index
    %c0_28 = arith.constant 0 : index
    %41 = vector.load %arg3[%c0_26, %40, %c1_27, %c0_28] : memref<1x18x18x4xbf16, #tpu.memory_space<vmem>>, vector<1x16x16x4xbf16>
    %42 = vector.shape_cast %41 : vector<1x16x16x4xbf16> to vector<16x16x4xbf16>
    %43 = vector.shape_cast %42 : vector<16x16x4xbf16> to vector<256x4xbf16>
    %c0_29 = arith.constant 0 : index
    %c28 = arith.constant 28 : index
    %44 = vector.load %arg7[%c0_29, %c28] : memref<256x36xbf16, #tpu.memory_space<vmem>>, vector<256x4xbf16>
    tpu.vector_store %arg7[%c0_29, %c28], %43 {strides = array<i32>} : memref<256x36xbf16, #tpu.memory_space<vmem>>, vector<256x4xbf16>,
    %c0_30 = arith.constant 0 : index
    %45 = arith.index_cast %34 : i32 to index
    %c2_31 = arith.constant 2 : index
    %c0_32 = arith.constant 0 : index
    %46 = vector.load %arg3[%c0_30, %45, %c2_31, %c0_32] : memref<1x18x18x4xbf16, #tpu.memory_space<vmem>>, vector<1x16x16x4xbf16>
    %47 = vector.shape_cast %46 : vector<1x16x16x4xbf16> to vector<16x16x4xbf16>
    %48 = vector.shape_cast %47 : vector<16x16x4xbf16> to vector<256x4xbf16>
    %c0_33 = arith.constant 0 : index
    %c32 = arith.constant 32 : index
    %49 = vector.load %arg7[%c0_33, %c32] : memref<256x36xbf16, #tpu.memory_space<vmem>>, vector<256x4xbf16>
    tpu.vector_store %arg7[%c0_33, %c32], %48 {strides = array<i32>} : memref<256x36xbf16, #tpu.memory_space<vmem>>, vector<256x4xbf16>,
    %c0_34 = arith.constant 0 : index
    %c0_35 = arith.constant 0 : index
    %50 = vector.load %arg7[%c0_34, %c0_35] : memref<256x36xbf16, #tpu.memory_space<vmem>>, vector<256x36xbf16>
    %c0_36 = arith.constant 0 : index
    %c0_37 = arith.constant 0 : index
    %51 = vector.load %arg4[%c0_36, %c0_37] : memref<36x128xbf16, #tpu.memory_space<vmem>>, vector<36x128xbf16>
    %cst = arith.constant dense<0.000000e+00> : vector<256x128xf32>
    %52 = tpu.matmul %50, %51, %cst {dimension_numbers = #tpu.dot_dimension_numbers<[1], [0], [0], [1], [0, 0, 1, 1], [], []>} : vector<256x36xbf16>, vector<36x128xbf16>, vector<256x128xf32> -> vector<256x128xf32>
    %c0_38 = arith.constant 0 : index
    %c0_39 = arith.constant 0 : index
    %53 = vector.load %arg5[%c0_38, %c0_39] : memref<1x128xf32, #tpu.memory_space<vmem>>, vector<1x128xf32>
    %54 = vector.broadcast %53 : vector<1x128xf32> to vector<256x128xf32>
    %55 = arith.addf %52, %54 : vector<256x128xf32>
    %cst_40 = arith.constant 0.000000e+00 : f32
    %56 = vector.broadcast %cst_40 : f32 to vector<256x128xf32>
    %57 = arith.maximumf %55, %56 : vector<256x128xf32>
    %58 = vector.shape_cast %57 : vector<256x128xf32> to vector<1x16x16x128xf32>
    %59 = arith.truncf %58 : vector<1x16x16x128xf32> to vector<1x16x16x128xbf16>
    %c0_41 = arith.constant 0 : index
    %c0_42 = arith.constant 0 : index
    %c0_43 = arith.constant 0 : index
    %c0_44 = arith.constant 0 : index
    %60 = vector.load %arg6[%c0_41, %c0_42, %c0_43, %c0_44] : memref<1x16x16x128xbf16, #tpu.memory_space<vmem>>, vector<1x16x16x128xbf16>
    tpu.vector_store %arg6[%c0_41, %c0_42, %c0_43, %c0_44], %59 {strides = array<i32>} : memref<1x16x16x128xbf16, #tpu.memory_space<vmem>>, vector<1x16x16x128xbf16>,
    return
  }
  func.func @transform_0(%arg0: i32, %arg1: i32, %arg2: i32) -> (i32, i32, i32, i32) {
    %c0_i32 = arith.constant 0 : i32
    %c0_i32_0 = arith.constant 0 : i32
    %c0_i32_1 = arith.constant 0 : i32
    %c0_i32_2 = arith.constant 0 : i32
    return %arg0, %c0_i32, %c0_i32_0, %c0_i32_1 : i32, i32, i32, i32
  }
  func.func @transform_1(%arg0: i32, %arg1: i32, %arg2: i32) -> (i32, i32) {
    %c0_i32 = arith.constant 0 : i32
    %c0_i32_0 = arith.constant 0 : i32
    return %c0_i32, %arg2 : i32, i32
  }
  func.func @transform_2(%arg0: i32, %arg1: i32, %arg2: i32) -> (i32, i32) {
    %c0_i32 = arith.constant 0 : i32
    %c0_i32_0 = arith.constant 0 : i32
    return %c0_i32, %arg2 : i32, i32
  }
  func.func @transform_3(%arg0: i32, %arg1: i32, %arg2: i32) -> (i32, i32, i32, i32) {
    %c0_i32 = arith.constant 0 : i32
    %c0_i32_0 = arith.constant 0 : i32
    return %arg0, %arg1, %c0_i32, %arg2 : i32, i32, i32, i32
  }
}

</mosaic_0001>

<bundles_post_ra>
// kernel: tpu_custom_call.1
= control target key start
LH: loop header
LB: loop body
LE: loop exit
PB: predicated region body
PF: predicated region fallthrough
CT: control target
= control target key end

     0   :  { %8 = vsyncpa [#allocation4], 0  ;;  %s6129_s0 = inlined_call_operand.vmem [shape: bf16[2,18,18,4], index: 0, kind: input, shape index: {}]   ;;  %s6130_s1 = inlined_call_operand.vmem [shape: bf16[36,128], index: 1, kind: input, shape index: {}]   ;;  %s6131_s2 = inlined_call_operand.vmem [shape: f32[1,128], index: 2, kind: input, shape index: {}]   ;;  %s6132_s3 = inlined_call_operand.hbm [shape: bf16[2,16,16,128], index: 3, kind: output, shape index: {}]  }
   0x1   :  { %10 = vsyncpa [#allocation4 + $0x1], 0  ;;  %s4854_s12 = smov 0   ;;  %s4856_s13 = smov 0  }
   0x2   :  { %s4858_s14 = smov 0   ;;  %s4860_s15 = smov 0  }
   0x3   :  { %s4862_s16 = smov 0   ;;  %s4864_s17 = smov 0  }
   0x4 LB: > { %s3921_s18 = sadd.s32 4294967295, %s4822_s17   ;;  %s3922_s19 = sadd.s32 4294967294, %s4822_s17   ;;  %s4822_s17 = sphi %s4864_s17, %s16_s17   ;;  %s4818_s16 = sphi %s4862_s16, %s6143_s16   ;;  %s4814_s15 = sphi %s4860_s15, %s6142_s15   ;;  %s4810_s14 = sphi %s4858_s14, %s6141_s14   ;;  %s4806_s13 = sphi %s4856_s13, %s6140_s13   ;;  %s4802_s12 = sphi %s4854_s12, %s6139_s12  }
   0x5   : > { %s35_s20 = sadd.s32 1, %s4818_s16  ;;  %s124_s21 = sadd.s32 1, %s4810_s14 }
   0x6   : > { %p37_p0 = scmp.ge.s32.totalorder %s35_s20, 2  ;;  %p134_p1 = scmp.ne.s32.totalorder %s4810_s14, %s4806_s13 }
   0x7   : > { %p135_p2 = scmp.eq.s32.totalorder %s3921_s18, 1  ;;  %p140_p3 = scmp.ne.s32.totalorder %s4806_s13, %s4802_s12 }
   0x8   : > { %s6145_s20 = smov (%p37_p0, %s35_s20), 0  ;;  %p141_p5 = scmp.eq.s32.totalorder %s3922_s19, 1 }
   0x9   : > { %p4894_p4 = por %p135_p2, %p134_p1  ;;  %s117_s23 = ssub.s32 %s4818_s16, %s6145_s20 }
   0xa   : > { %p3927_p6 = scmp.ge.s32.totalorder %s4822_s17, 1  ;;  %p122_p7 = scmp.eq.s32.totalorder %s117_s23, 0 }
   0xb   : > { %p4901_p8 = por %p141_p5, %p140_p3  ;;  %p180_p9 = scmp.lt.s32.totalorder %s4822_s17, 3 }
   0xc   : > { %s4907_s25 = scalar_select %p122_p7, %s4810_s14, %s124_s21  }
   0xd   : > { %p181_p10 = pnand %p3927_p6, %p180_p9 }
   0xe   : > { %p211_p11 = scmp.lt.s32.totalorder (!%p181_p10), %s4814_s15, 1  ;;  %vm1018_vm0 = vcmask (!%p181_p10), 1042432   ;;  %vm1019_vm1 = vcmask (!%p181_p10), 1046532   ;;  %s4824_s4 = smov (!%p181_p10), 12   ;;  %vm422_vm3 = vsmask.f32 (!%p181_p10), 3328 }
   0xf   : > { %184 = sbr.rel (%p181_p10) target bundleno = 686 (0x2ae), region = 32  ;;  %vm4916_vm2 = vmor (!%p181_p10), %vm1018_vm0, %vm1019_vm1  ;;  %vm423_vm4 = vsmask.f32 (!%p181_p10), 7440  ;;  %s4825_s5 = smov (!%p181_p10), 8   ;;  %vm357_vm6 = vcmask (!%p181_p10), 31744   ;;  %vm905_vm7 = vcmask (!%p181_p10), 64544  }
  0x10   : > { %vm4966_vm5 = vmor (!%p181_p10), %vm422_vm3, %vm423_vm4  ;;  %s4826_s6 = smov (!%p181_p10), 4   ;;  %s4827_s7 = smov (!%p181_p10), 16   ;;  %vm1229_vm8 = vcmask (!%p181_p10), 97344   ;;  %vm1410_vm9 = vcmask (!%p181_p10), 130144   ;;  %vm1955_vm10 = vcmask (!%p181_p10), 162944   ;;  %vm2276_vm11 = vcmask (!%p181_p10), 195744  }
  0x11   : > { %s4828_s8 = smov (!%p181_p10), 20   ;;  %s4829_s9 = smov (!%p181_p10), 24   ;;  %vm2457_vm12 = vcmask (!%p181_p10), 228544   ;;  %vm3002_vm13 = vcmask (!%p181_p10), 261344   ;;  %vm3323_vm14 = vcmask (!%p181_p10), 294144   ;;  %vm3383_vm15 = vcmask (!%p181_p10), 293888  }
  0x12   : > { %s4830_s10 = smov (!%p181_p10), 28   ;;  %s4831_s11 = smov (!%p181_p10), 32   ;;  %vm3432_vm0 = vcmask (!%p181_p10), 1041408  }
  0x13   : > { %s4832_s19 = smov (!%p181_p10), [#allocation3]  }
  0x14   : > { %s4748_s21 = sshll.u32 (!%p181_p10), %s4832_s19, 4  ;;  %s4749_s21 = int_to_ptr.vmem [resolvable:$false] %s4748_s21 }
  0x15   : > { %s4750_s23 = scalar_lea.vmem (!%p181_p10), %s4749_s21, 4096 }
  0x16   : > { %s212_s26 = scalar_select %p211_p11, %s4814_s15, 1 }
  0x18   : > { %s4628_s27 = smul.u32 216, %s212_s26 }
  0x1a   : > { %s4914_s30 = scalar_lea.vmem %s6129_s0, %s4628_s27 }
  0x1b   : > { %v4693_v1 = vld [vmem:[%s4914_s30 + $0x6c] sm:$0xff]   ;;  %v946_v3 = vld [vmem:[%s4914_s30 + $0x60] sm:$0xe]  ;;  %v947_v4 = vld [vmem:[%s4914_s30 + $0x64] sm:$0xf] }
  0x1c   : > { %v4694_v2 = vld [vmem:[%s4914_s30 + $0xc] sm:$0xff]   ;;  %1378 = vrot.lane.b32.xlu1 %v4693_v1, %s4824_s4  ;;  %v948_v5 = vld [vmem:[%s4914_s30 + $0x68] sm:$0x1]  ;;  %v3970_v6 = vrot.slane %v946_v3, 9  ;;  %v1079_v7 = vrot.slane %v947_v4, 5 }
  0x1d   : > { %1362 = vrot.lane.b32.xlu0 %v4694_v2, %s4824_s4  ;;  %v1082_v8 = vrot.slane %v948_v5, 5  ;;  %v922_v9 = vld [vmem:[%s4914_s30] sm:$0xe]  ;;  %v923_v10 = vld [vmem:[%s4914_s30 + $0x4] sm:$0xf] }
  0x1e   : > { %v924_v11 = vld [vmem:[%s4914_s30 + $0x8] sm:$0x1]  ;;  %v3962_v12 = vrot.slane %v922_v9, 9  ;;  %v1080_v13 = vsel %vm4916_vm2, %v3970_v6, %v1079_v7  ;;  %v1081_v14 = vrot.slane %v1079_v7, 4  ;;  %v1023_v15 = vrot.slane %v923_v10, 5 }
  0x1f   : > { %v1026_v16 = vrot.slane %v924_v11, 5  ;;  %v949_v17 = vld [vmem:[%s4914_s30 + $0x6c] sm:$0xe]  ;;  %v950_v18 = vld [vmem:[%s4914_s30 + $0x70] sm:$0xf] }
  0x20   : > { %v951_v19 = vld [vmem:[%s4914_s30 + $0x74] sm:$0x1]  ;;  %v3971_v20 = vrot.slane %v949_v17, 9  ;;  %v1083_v21 = vsel %vm4916_vm2, %v1081_v14, %v1082_v8  ;;  %v1024_v22 = vsel %vm4916_vm2, %v3962_v12, %v1023_v15  ;;  %v1025_v23 = vrot.slane %v1023_v15, 4  ;;  %v925_v25 = vld [vmem:[%s4914_s30 + $0xc] sm:$0xe] }
  0x21   : > { %v1086_v24 = vrot.slane %v950_v18, 5  ;;  %v926_v26 = vld [vmem:[%s4914_s30 + $0x10] sm:$0xf]  ;;  %v3986_v27 = vcombine.low %v1080_v13, %v1083_v21  ;;  %v1089_v28 = vrot.slane %v951_v19, 5  ;;  %v927_v29 = vld [vmem:[%s4914_s30 + $0x14] sm:$0x1] }
  0x22   : > { %v3963_v30 = vrot.slane %v925_v25, 9  ;;  %v1030_v31 = vrot.slane %v926_v26, 5  ;;  %v1027_v32 = vsel %vm4916_vm2, %v1025_v23, %v1026_v16  ;;  %v1033_v35 = vrot.slane %v927_v29, 5  ;;  %v377_v36 = vld [vmem:[%s4914_s30 + $0xc] sm:$0xf] }
  0x23   : > { %v1087_v33 = vsel %vm4916_vm2, %v3971_v20, %v1086_v24  ;;  %v1088_v34 = vrot.slane %v1086_v24, 4  ;;  %v378_v37 = vld [vmem:[%s4914_s30 + $0x10] sm:$0xf]  ;;  %1197 = vrot.lane.b32.xlu1 %v3986_v27, %s4825_s5  ;;  %v3978_v38 = vcombine.low %v1024_v22, %v1027_v32  ;;  %v379_v41 = vld [vmem:[%s4914_s30 + $0x14] sm:$0x1]  ;;  %v450_v42 = vshrl.u32 %v377_v36, 16 }
  0x24   : > { %v1031_v39 = vsel %vm4916_vm2, %v3963_v30, %v1030_v31  ;;  %v1032_v40 = vrot.slane %v1030_v31, 4  ;;  %v374_v43 = vld [vmem:[%s4914_s30] sm:$0xf]  ;;  %v453_v45 = vshll.u32 %v377_v36, 16  ;;  %v459_v46 = vshll.u32 %v378_v37, 16 }
  0x25   : > { %v1090_v44 = vsel %vm4916_vm2, %v1088_v34, %v1089_v28  ;;  %v463_v47 = vshrl.u32 %v378_v37, 16  ;;  %v375_v48 = vld [vmem:[%s4914_s30 + $0x4] sm:$0xf]  ;;  %1181 = vrot.lane.b32.xlu0 %v3978_v38, %s4825_s5  ;;  %v452_v51 = vrot.slane %v450_v42, 4  ;;  %v469_v52 = vshll.u32 %v379_v41, 16 }
  0x26   : > { %v3987_v49 = vcombine.low %v1087_v33, %v1090_v44  ;;  %v1034_v50 = vsel %vm4916_vm2, %v1032_v40, %v1033_v35  ;;  %v376_v53 = vld [vmem:[%s4914_s30 + $0x8] sm:$0x1]  ;;  %v455_v55 = vrot.slane %v453_v45, 5  ;;  %v461_v56 = vrot.slane %v459_v46, 5  ;;  %v401_v58 = vld [vmem:[%s4914_s30 + $0x6c] sm:$0xf] }
  0x27   : > { %v3979_v54 = vcombine.low %v1031_v39, %v1034_v50  ;;  %v465_v57 = vrot.slane %v463_v47, 4  ;;  %v471_v59 = vrot.slane %v469_v52, 5  ;;  %v426_v60 = vshrl.u32 %v374_v43, 16  ;;  %v402_v4 = vld [vmem:[%s4914_s30 + $0x70] sm:$0xf] }
  0x28   : > { %1199 = vrot.lane.b32.xlu1 %v3987_v49, %s4825_s5  ;;  %v429_v61 = vshll.u32 %v374_v43, 16  ;;  %v435_v62 = vshll.u32 %v375_v48, 16  ;;  %v456_v63 = vor.u32 %v455_v55, %v452_v51  ;;  %v439_v2 = vshrl.u32 %v375_v48, 16  ;;  %v403_v9 = vld [vmem:[%s4914_s30 + $0x74] sm:$0x1] }
  0x29   : > { %v466_v1 = vor.u32 %v465_v57, %v461_v56  ;;  %v445_v3 = vshll.u32 %v376_v53, 16  ;;  %1183 = vrot.lane.b32.xlu0 %v3979_v54, %s4825_s5  ;;  %v428_v6 = vrot.slane %v426_v60, 4  ;;  %v642_v10 = vshrl.u32 %v401_v58, 16  ;;  %v398_v11 = vld [vmem:[%s4914_s30 + $0x60] sm:$0xf] }
  0x2a   : > { %v431_v7 = vrot.slane %v429_v61, 5  ;;  %v437_v8 = vrot.slane %v435_v62, 5  ;;  %v457_v12 = vrot.slane %v456_v63, 4  ;;  %v441_v14 = vrot.slane %v439_v2, 4  ;;  %v399_v16 = vld [vmem:[%s4914_s30 + $0x64] sm:$0xf] }
  0x2b   : > { %v467_v13 = vrot.slane %v466_v1, 4  ;;  %v447_v15 = vrot.slane %v445_v3, 5  ;;  %v644_v18 = vrot.slane %v642_v10, 4  ;;  %v645_v19 = vshll.u32 %v401_v58, 16  ;;  %v400_v35 = vld [vmem:[%s4914_s30 + $0x68] sm:$0x1] }
  0x2c   : > { %v432_v17 = vor.u32 %v431_v7, %v428_v6  ;;  %v651_v20 = vshll.u32 %v402_v4, 16  ;;  %v462_v21 = vsel %vm4966_vm5, %v457_v12, %v461_v56  ;;  %v442_v23 = vor.u32 %v441_v14, %v437_v8  ;;  %v4066_v38 = vld [vmem:[%s4914_s30 + $0x6c] sm:$0xf]  ;;  %v4067_v43 = vld [vmem:[%s4914_s30 + $0x70] sm:$0xf]  ;;  %v4695_v6 = vld [vmem:[%s4914_s30 + $0x78] sm:$0xff]  }
  0x2d   : > { %v472_v22 = vsel %vm4966_vm5, %v467_v13, %v471_v59  ;;  %v655_v24 = vshrl.u32 %v402_v4, 16  ;;  %v647_v27 = vrot.slane %v645_v19, 5  ;;  %v661_v31 = vshll.u32 %v403_v9, 16  ;;  %v4068_v54 = vld [vmem:[%s4914_s30 + $0x74] sm:$0x1] }
  0x2e   : > { %v3947_v25 = vcombine.low %v462_v21, %v472_v22  ;;  %v433_v26 = vrot.slane %v432_v17, 4  ;;  %v653_v28 = vrot.slane %v651_v20, 5  ;;  %v443_v29 = vrot.slane %v442_v23, 4  ;;  %v4042_v57 = vld [vmem:[%s4914_s30 + $0xc] sm:$0xf] }
  0x2f   : > { %v657_v30 = vrot.slane %v655_v24, 4  ;;  %v618_v32 = vshrl.u32 %v398_v11, 16  ;;  %v648_v34 = vor.u32 %v647_v27, %v644_v18  ;;  %v621_v36 = vshll.u32 %v398_v11, 16  ;;  %v4043_v62 = vld [vmem:[%s4914_s30 + $0x10] sm:$0xf] }
  0x30   : > { %859 = vrot.lane.b32.xlu1 %v3947_v25, %s4826_s6  ;;  %v438_v33 = vsel %vm4966_vm5, %v433_v26, %v437_v8  ;;  %v627_v37 = vshll.u32 %v399_v16, 16  ;;  %v448_v39 = vsel %vm4966_vm5, %v443_v29, %v447_v15  ;;  %v663_v41 = vrot.slane %v661_v31, 5  ;;  %v4044_v12 = vld [vmem:[%s4914_s30 + $0x14] sm:$0x1]  ;;  %v4069_v15 = vld [vmem:[%s4914_s30 + $0x78] sm:$0xf] }
  0x31   : > { %v658_v40 = vor.u32 %v657_v30, %v653_v28  ;;  %v620_v42 = vrot.slane %v618_v32, 4  ;;  %v3946_v44 = vcombine.low %v438_v33, %v448_v39  ;;  %v649_v45 = vrot.slane %v648_v34, 4  ;;  %v4070_v27 = vld [vmem:[%s4914_s30 + $0x7c] sm:$0xf]  ;;  %v4071_v33 = vld [vmem:[%s4914_s30 + $0x80] sm:$0x1] }
  0x32   : > { %v623_v46 = vrot.slane %v621_v36, 5  ;;  %v629_v47 = vrot.slane %v627_v37, 5  ;;  %v631_v49 = vshrl.u32 %v399_v16, 16  ;;  %v637_v50 = vshll.u32 %v400_v35, 16  ;;  %v4045_v34 = vld [vmem:[%s4914_s30 + $0x18] sm:$0xf] }
  0x33   : > { %v659_v48 = vrot.slane %v658_v40, 4  ;;  %v1668_v51 = vshrl.u32 %v4066_v38, 16  ;;  %857 = vrot.lane.b32.xlu0 %v3946_v44, %s4826_s6  ;;  %v654_v52 = vsel %vm4966_vm5, %v649_v45, %v653_v28  ;;  %v1671_v55 = vshll.u32 %v4066_v38, 16  ;;  %v4046_v39 = vld [vmem:[%s4914_s30 + $0x1c] sm:$0xf] }
  0x34   : > { %v624_v53 = vor.u32 %v623_v46, %v620_v42  ;;  %v1677_v56 = vshll.u32 %v4067_v43, 16  ;;  %v633_v59 = vrot.slane %v631_v49, 4  ;;  %v639_v60 = vrot.slane %v637_v50, 5  ;;  %v4696_v40 = vld [vmem:[%s4914_s30 + $0x18] sm:$0xff]   ;;  %v4047_v45 = vld [vmem:[%s4914_s30 + $0x20] sm:$0x1] }
  0x35   : > { %v664_v58 = vsel %vm4966_vm5, %v659_v48, %v663_v41  ;;  %v1670_v61 = vrot.slane %v1668_v51, 4  ;;  %v1673_v2 = vrot.slane %v1671_v55, 5  ;;  %v1681_v7 = vshrl.u32 %v4067_v43, 16  ;;  %v4130_v50 = vld [vmem:[%s4914_s30 + $0x6c] sm:$0xe] }
  0x36   : > { %v3955_v63 = vcombine.low %v654_v52, %v664_v58  ;;  %v625_v1 = vrot.slane %v624_v53, 4  ;;  %v1679_v3 = vrot.slane %v1677_v56, 5  ;;  %v634_v4 = vor.u32 %v633_v59, %v629_v47  ;;  %v4131_v55 = vld [vmem:[%s4914_s30 + $0x70] sm:$0xf] }
  0x37   : > { %v1687_v8 = vshll.u32 %v4068_v54, 16  ;;  %v1476_v9 = vshrl.u32 %v4042_v57, 16  ;;  %v1674_v11 = vor.u32 %v1673_v2, %v1670_v61  ;;  %v1479_v13 = vshll.u32 %v4042_v57, 16  ;;  %v4106_v61 = vld [vmem:[%s4914_s30 + $0xc] sm:$0xe] }
  0x38   : > { %875 = vrot.lane.b32.xlu1 %v3955_v63, %s4826_s6  ;;  %v630_v10 = vsel %vm4966_vm5, %v625_v1, %v629_v47  ;;  %v1485_v14 = vshll.u32 %v4043_v62, 16  ;;  %v635_v16 = vrot.slane %v634_v4, 4  ;;  %v1683_v17 = vrot.slane %v1681_v7, 4 }
  0x39   : > { %v1689_v18 = vrot.slane %v1687_v8, 5  ;;  %v1478_v19 = vrot.slane %v1476_v9, 4  ;;  %v1675_v20 = vrot.slane %v1674_v11, 4  ;;  %v1481_v21 = vrot.slane %v1479_v13, 5  ;;  %v4108_v9 = vld [vmem:[%s4914_s30 + $0x14] sm:$0x1] }
  0x3a   : > { %v1487_v22 = vrot.slane %v1485_v14, 5  ;;  %v1489_v23 = vshrl.u32 %v4043_v62, 16  ;;  %v640_v24 = vsel %vm4966_vm5, %v635_v16, %v639_v60  ;;  %v1684_v25 = vor.u32 %v1683_v17, %v1679_v3  ;;  %v4132_v60 = vld [vmem:[%s4914_s30 + $0x74] sm:$0x1] }
  0x3b   : > { %v1495_v26 = vshll.u32 %v4044_v12, 16  ;;  %v1692_v28 = vshrl.u32 %v4069_v15, 16  ;;  %v3954_v29 = vcombine.low %v630_v10, %v640_v24  ;;  %v1680_v30 = vsel %vm4966_vm5, %v1675_v20, %v1679_v3  ;;  %v4107_v3 = vld [vmem:[%s4914_s30 + $0x10] sm:$0xf] }
  0x3c   : > { %1380 = vrot.lane.b32.xlu1 %v4695_v6, %s4824_s4  ;;  %v1482_v31 = vor.u32 %v1481_v21, %v1478_v19  ;;  %v1491_v32 = vrot.slane %v1489_v23, 4  ;;  %v1685_v35 = vrot.slane %v1684_v25, 4  ;;  %v1695_v38 = vshll.u32 %v4069_v15, 16 }
  0x3d   : > { %v1497_v36 = vrot.slane %v1495_v26, 5  ;;  %v1694_v37 = vrot.slane %v1692_v28, 4  ;;  %873 = vrot.lane.b32.xlu0 %v3954_v29, %s4826_s6  ;;  %v1701_v43 = vshll.u32 %v4070_v27, 16  ;;  %v1705_v44 = vshrl.u32 %v4070_v27, 16  ;;  %v4134_v27 = vld [vmem:[%s4914_s30 + $0x7c] sm:$0xf] }
  0x3e   : > { %v1483_v41 = vrot.slane %v1482_v31, 4  ;;  %v1492_v42 = vor.u32 %v1491_v32, %v1487_v22  ;;  %v1690_v46 = vsel %vm4966_vm5, %v1685_v35, %v1689_v18  ;;  %v1697_v47 = vrot.slane %v1695_v38, 5  ;;  %v4135_v28 = vld [vmem:[%s4914_s30 + $0x80] sm:$0x1]  ;;  %v4110_v38 = vld [vmem:[%s4914_s30 + $0x1c] sm:$0xf] }
  0x3f   : > { %v1711_v48 = vshll.u32 %v4071_v33, 16  ;;  %v1500_v49 = vshrl.u32 %v4045_v34, 16  ;;  %v4098_v51 = vcombine.low %v1680_v30, %v1690_v46  ;;  %v1703_v54 = vrot.slane %v1701_v43, 5  ;;  %v4109_v33 = vld [vmem:[%s4914_s30 + $0x18] sm:$0xe] }
  0x40   : > { %v1488_v52 = vsel %vm4966_vm5, %v1483_v41, %v1487_v22  ;;  %v1493_v53 = vrot.slane %v1492_v42, 4  ;;  %v1698_v56 = vor.u32 %v1697_v47, %v1694_v37  ;;  %v1707_v57 = vrot.slane %v1705_v44, 4  ;;  %v4133_v22 = vld [vmem:[%s4914_s30 + $0x78] sm:$0xe] }
  0x41   : > { %v1713_v58 = vrot.slane %v1711_v48, 5  ;;  %v1502_v59 = vrot.slane %v1500_v49, 4  ;;  %1364 = vrot.lane.b32.xlu0 %v4696_v40, %s4824_s4  ;;  %1923 = vrot.lane.b32.xlu1 %v4098_v51, %s4827_s7  ;;  %v1503_v63 = vshll.u32 %v4045_v34, 16  ;;  %v1509_v1 = vshll.u32 %v4046_v39, 16  ;;  %v4258_v44 = vld [vmem:[%s4914_s30 + $0x78] sm:$0xf] }
  0x42   : > { %v1498_v62 = vsel %vm4966_vm5, %v1493_v53, %v1497_v36  ;;  %v1513_v2 = vshrl.u32 %v4046_v39, 16  ;;  %v1699_v6 = vrot.slane %v1698_v56, 4  ;;  %v1708_v7 = vor.u32 %v1707_v57, %v1703_v54  ;;  %v4111_v39 = vld [vmem:[%s4914_s30 + $0x20] sm:$0x1] }
  0x43   : > { %v4090_v4 = vcombine.low %v1488_v52, %v1498_v62  ;;  %v1519_v8 = vshll.u32 %v4047_v45, 16  ;;  %v1505_v10 = vrot.slane %v1503_v63, 5  ;;  %v1511_v11 = vrot.slane %v1509_v1, 5  ;;  %v4259_v45 = vld [vmem:[%s4914_s30 + $0x7c] sm:$0xf] }
  0x44   : > { %v1515_v12 = vrot.slane %v1513_v2, 4  ;;  %v4162_v13 = vrot.slane %v4130_v50, 9  ;;  %v1704_v14 = vsel %vm4966_vm5, %v1699_v6, %v1703_v54  ;;  %v1709_v15 = vrot.slane %v1708_v7, 4  ;;  %v4260_v54 = vld [vmem:[%s4914_s30 + $0x80] sm:$0x1] }
  0x45   : > { %v1521_v16 = vrot.slane %v1519_v8, 5  ;;  %v2126_v17 = vrot.slane %v4131_v55, 5  ;;  %1907 = vrot.lane.b32.xlu0 %v4090_v4, %s4827_s7  ;;  %v1506_v18 = vor.u32 %v1505_v10, %v1502_v59  ;;  %v2129_v20 = vrot.slane %v4132_v60, 5  ;;  %v4234_v59 = vld [vmem:[%s4914_s30 + $0x18] sm:$0xf] }
  0x46   : > { %v1516_v19 = vor.u32 %v1515_v12, %v1511_v11  ;;  %v4154_v21 = vrot.slane %v4106_v61, 9  ;;  %v1714_v23 = vsel %vm4966_vm5, %v1709_v15, %v1713_v58  ;;  %v2070_v26 = vrot.slane %v4107_v3, 5  ;;  %v4235_v1 = vld [vmem:[%s4914_s30 + $0x1c] sm:$0xf]  ;;  %v4236_v10 = vld [vmem:[%s4914_s30 + $0x20] sm:$0x1] }
  0x47   : > { %v2127_v24 = vsel %vm4916_vm2, %v4162_v13, %v2126_v17  ;;  %v2128_v25 = vrot.slane %v2126_v17, 4  ;;  %v4099_v29 = vcombine.low %v1704_v14, %v1714_v23  ;;  %v1507_v30 = vrot.slane %v1506_v18, 4  ;;  %v4697_v17 = vld [vmem:[%s4914_s30 + $0x78] sm:$0xff]  }
  0x48   : > { %v1517_v31 = vrot.slane %v1516_v19, 4  ;;  %v2073_v32 = vrot.slane %v4108_v9, 5  ;;  %v2071_v35 = vsel %vm4916_vm2, %v4154_v21, %v2070_v26  ;;  %v2072_v36 = vrot.slane %v2070_v26, 4 }
  0x49   : > { %v2130_v34 = vsel %vm4916_vm2, %v2128_v25, %v2129_v20  ;;  %v4163_v37 = vrot.slane %v4133_v22, 9  ;;  %1925 = vrot.lane.b32.xlu1 %v4099_v29, %s4827_s7  ;;  %v1512_v40 = vsel %vm4966_vm5, %v1507_v30, %v1511_v11  ;;  %v2133_v43 = vrot.slane %v4134_v27, 5  ;;  %v4262_v22 = vld [vmem:[%s4914_s30 + $0x88] sm:$0xf]  ;;  %v4698_v27 = vld [vmem:[%s4914_s30 + $0x18] sm:$0xff]  }
  0x4a   : > { %v1522_v41 = vsel %vm4966_vm5, %v1517_v31, %v1521_v16  ;;  %v4178_v42 = vcombine.low %v2127_v24, %v2130_v34  ;;  %v2074_v47 = vsel %vm4916_vm2, %v2072_v36, %v2073_v32  ;;  %v2136_v48 = vrot.slane %v4135_v28, 5  ;;  %v4261_v16 = vld [vmem:[%s4914_s30 + $0x84] sm:$0xf] }
  0x4b   : > { %v4091_v46 = vcombine.low %v1512_v40, %v1522_v41  ;;  %v4155_v49 = vrot.slane %v4109_v33, 9  ;;  %v4170_v50 = vcombine.low %v2071_v35, %v2074_v47  ;;  %v2134_v51 = vsel %vm4916_vm2, %v4163_v37, %v2133_v43  ;;  %v4263_v35 = vld [vmem:[%s4914_s30 + $0x8c] sm:$0x1]  ;;  %v4237_v37 = vld [vmem:[%s4914_s30 + $0x24] sm:$0xf] }
  0x4c   : > { %v2135_v52 = vrot.slane %v2133_v43, 4  ;;  %v2077_v53 = vrot.slane %v4110_v38, 5  ;;  %v2080_v55 = vrot.slane %v4111_v39, 5  ;;  %v2715_v56 = vshrl.u32 %v4258_v44, 16  ;;  %v4699_v38 = vld [vmem:[%s4914_s30 + $0x84] sm:$0xff]  }
  0x4d   : > { %1909 = vrot.lane.b32.xlu0 %v4091_v46, %s4827_s7  ;;  %v2718_v57 = vshll.u32 %v4258_v44, 16  ;;  %v2724_v58 = vshll.u32 %v4259_v45, 16  ;;  %2244 = vrot.lane.b32.xlu1 %v4178_v42, %s4828_s8  ;;  %v2728_v63 = vshrl.u32 %v4259_v45, 16  ;;  %v2734_v9 = vshll.u32 %v4260_v54, 16  ;;  %v4238_v43 = vld [vmem:[%s4914_s30 + $0x28] sm:$0xf] }
  0x4e   : > { %v2137_v60 = vsel %vm4916_vm2, %v2135_v52, %v2136_v48  ;;  %v2078_v61 = vsel %vm4916_vm2, %v4155_v49, %v2077_v53  ;;  %v2079_v62 = vrot.slane %v2077_v53, 4  ;;  %v2717_v3 = vrot.slane %v2715_v56, 4  ;;  %v4239_v48 = vld [vmem:[%s4914_s30 + $0x2c] sm:$0x1]  ;;  %v4322_v53 = vld [vmem:[%s4914_s30 + $0x78] sm:$0xe] }
  0x4f   : > { %v4179_v2 = vcombine.low %v2134_v51, %v2137_v60  ;;  %v2720_v4 = vrot.slane %v2718_v57, 5  ;;  %v2726_v6 = vrot.slane %v2724_v58, 5  ;;  %v2730_v8 = vrot.slane %v2728_v63, 4  ;;  %v4700_v54 = vld [vmem:[%s4914_s30 + $0x24] sm:$0xff]  }
  0x50   : > { %v2081_v7 = vsel %vm4916_vm2, %v2079_v62, %v2080_v55  ;;  %v2523_v11 = vshrl.u32 %v4234_v59, 16  ;;  %v2526_v14 = vshll.u32 %v4234_v59, 16  ;;  %v2532_v15 = vshll.u32 %v4235_v1, 16  ;;  %v4323_v59 = vld [vmem:[%s4914_s30 + $0x7c] sm:$0xf] }
  0x51   : > { %2228 = vrot.lane.b32.xlu0 %v4170_v50, %s4828_s8  ;;  %v4171_v12 = vcombine.low %v2078_v61, %v2081_v7  ;;  %v2721_v13 = vor.u32 %v2720_v4, %v2717_v3  ;;  %2246 = vrot.lane.b32.xlu1 %v4179_v2, %s4828_s8  ;;  %v2731_v18 = vor.u32 %v2730_v8, %v2726_v6  ;;  %v2736_v19 = vrot.slane %v2734_v9, 5  ;;  %v4298_v7 = vld [vmem:[%s4914_s30 + $0x18] sm:$0xe]  ;;  %v4299_v8 = vld [vmem:[%s4914_s30 + $0x1c] sm:$0xf] }
  0x52   : > { %v2525_v20 = vrot.slane %v2523_v11, 4  ;;  %v2536_v21 = vshrl.u32 %v4235_v1, 16  ;;  %v2528_v24 = vrot.slane %v2526_v14, 5  ;;  %v2534_v25 = vrot.slane %v2532_v15, 5  ;;  %v4324_v1 = vld [vmem:[%s4914_s30 + $0x80] sm:$0x1] }
  0x53   : > { %v2722_v23 = vrot.slane %v2721_v13, 4  ;;  %v2542_v26 = vshll.u32 %v4236_v10, 16  ;;  %v2732_v28 = vrot.slane %v2731_v18, 4  ;;  %v2739_v30 = vshrl.u32 %v4261_v16, 16 }
  0x54   : > { %v2538_v29 = vrot.slane %v2536_v21, 4  ;;  %v2742_v31 = vshll.u32 %v4261_v16, 16  ;;  %v2529_v33 = vor.u32 %v2528_v24, %v2525_v20  ;;  %v2748_v36 = vshll.u32 %v4262_v22, 16 }
  0x55   : > { %2230 = vrot.lane.b32.xlu0 %v4171_v12, %s4828_s8  ;;  %v2727_v32 = vsel %vm4966_vm5, %v2722_v23, %v2726_v6  ;;  %v2544_v34 = vrot.slane %v2542_v26, 5  ;;  %2425 = vrot.lane.b32.xlu1 %v4697_v17, %s4829_s9  ;;  %v2737_v39 = vsel %vm4966_vm5, %v2732_v28, %v2736_v19  ;;  %v2741_v41 = vrot.slane %v2739_v30, 4  ;;  %v4300_v17 = vld [vmem:[%s4914_s30 + $0x20] sm:$0x1] }
  0x56   : > { %v2539_v40 = vor.u32 %v2538_v29, %v2534_v25  ;;  %v2744_v42 = vrot.slane %v2742_v31, 5  ;;  %v4290_v44 = vcombine.low %v2727_v32, %v2737_v39  ;;  %v2530_v45 = vrot.slane %v2529_v33, 4  ;;  %v406_v32 = vld [vmem:[%s4914_s30 + $0x80] sm:$0x1] }
  0x57   : > { %v2750_v46 = vrot.slane %v2748_v36, 5  ;;  %v2752_v47 = vshrl.u32 %v4262_v22, 16  ;;  %v2758_v51 = vshll.u32 %v4263_v35, 16  ;;  %v2547_v52 = vshrl.u32 %v4237_v37, 16  ;;  %v404_v22 = vld [vmem:[%s4914_s30 + $0x78] sm:$0xf] }
  0x58   : > { %v2540_v49 = vrot.slane %v2539_v40, 4  ;;  %v2745_v50 = vor.u32 %v2744_v42, %v2741_v41  ;;  %v2535_v55 = vsel %vm4966_vm5, %v2530_v45, %v2534_v25  ;;  %v2550_v57 = vshll.u32 %v4237_v37, 16  ;;  %v380_v37 = vld [vmem:[%s4914_s30 + $0x18] sm:$0xf] }
  0x59   : > { %2409 = vrot.lane.b32.xlu0 %v4698_v27, %s4829_s9  ;;  %v2754_v56 = vrot.slane %v2752_v47, 4  ;;  %v2556_v58 = vshll.u32 %v4238_v43, 16  ;;  %2427 = vrot.lane.b32.xlu1 %v4699_v38, %s4829_s9  ;;  %v2760_v62 = vrot.slane %v2758_v51, 5  ;;  %v2549_v63 = vrot.slane %v2547_v52, 4  ;;  %v405_v27 = vld [vmem:[%s4914_s30 + $0x7c] sm:$0xf] }
  0x5a   : > { %v2545_v60 = vsel %vm4966_vm5, %v2540_v49, %v2544_v34  ;;  %v2746_v61 = vrot.slane %v2745_v50, 4  ;;  %v2552_v4 = vrot.slane %v2550_v57, 5  ;;  %v2560_v10 = vshrl.u32 %v4238_v43, 16  ;;  %v381_v38 = vld [vmem:[%s4914_s30 + $0x1c] sm:$0xf] }
  0x5b   : > { %v4282_v2 = vcombine.low %v2535_v55, %v2545_v60  ;;  %v2755_v3 = vor.u32 %v2754_v56, %v2750_v46  ;;  %v2558_v6 = vrot.slane %v2556_v58, 5  ;;  %v2566_v11 = vshll.u32 %v4239_v48, 16  ;;  %v382_v43 = vld [vmem:[%s4914_s30 + $0x20] sm:$0x1]  ;;  %v4325_v48 = vld [vmem:[%s4914_s30 + $0x84] sm:$0xe] }
  0x5c   : > { %v2751_v9 = vsel %vm4966_vm5, %v2746_v61, %v2750_v46  ;;  %v4354_v12 = vrot.slane %v4322_v53, 9  ;;  %v2553_v14 = vor.u32 %v2552_v4, %v2549_v63  ;;  %v3173_v15 = vrot.slane %v4323_v59, 5  ;;  %v4326_v53 = vld [vmem:[%s4914_s30 + $0x88] sm:$0xf]  ;;  %v4301_v59 = vld [vmem:[%s4914_s30 + $0x24] sm:$0xe] }
  0x5d   : > { %2411 = vrot.lane.b32.xlu0 %v4700_v54, %s4829_s9  ;;  %v2756_v13 = vrot.slane %v2755_v3, 4  ;;  %v3176_v16 = vrot.slane %v4324_v1, 5  ;;  %2970 = vrot.lane.b32.xlu1 %v4290_v44, %s4830_s10  ;;  %v2562_v18 = vrot.slane %v2560_v10, 4  ;;  %v2568_v19 = vrot.slane %v2566_v11, 5  ;;  %v4327_v54 = vld [vmem:[%s4914_s30 + $0x8c] sm:$0x1] }
  0x5e   : > { %v4346_v20 = vrot.slane %v4298_v7, 9  ;;  %v3117_v21 = vrot.slane %v4299_v8, 5  ;;  %v2554_v24 = vrot.slane %v2553_v14, 4  ;;  %v3174_v25 = vsel %vm4916_vm2, %v4354_v12, %v3173_v15  ;;  %v4302_v1 = vld [vmem:[%s4914_s30 + $0x28] sm:$0xf] }
  0x5f   : > { %v2761_v23 = vsel %vm4966_vm5, %v2756_v13, %v2760_v62  ;;  %v3175_v26 = vrot.slane %v3173_v15, 4  ;;  %v2563_v29 = vor.u32 %v2562_v18, %v2558_v6  ;;  %v3120_v35 = vrot.slane %v4300_v17, 5  ;;  %v4303_v7 = vld [vmem:[%s4914_s30 + $0x2c] sm:$0x1]  ;;  %v407_v12 = vld [vmem:[%s4914_s30 + $0x84] sm:$0xf] }
  0x60   : > { %v4291_v28 = vcombine.low %v2751_v9, %v2761_v23  ;;  %v3118_v30 = vsel %vm4916_vm2, %v4346_v20, %v3117_v21  ;;  %v3119_v31 = vrot.slane %v3117_v21, 4  ;;  %v2559_v33 = vsel %vm4966_vm5, %v2554_v24, %v2558_v6  ;;  %v408_v21 = vld [vmem:[%s4914_s30 + $0x88] sm:$0xf] }
  0x61   : > { %2954 = vrot.lane.b32.xlu0 %v4282_v2, %s4830_s10  ;;  %v3177_v34 = vsel %vm4916_vm2, %v3175_v26, %v3176_v16  ;;  %v666_v36 = vshrl.u32 %v404_v22, 16  ;;  %v2564_v39 = vrot.slane %v2563_v29, 4  ;;  %v669_v41 = vshll.u32 %v404_v22, 16 }
  0x62   : > { %2972 = vrot.lane.b32.xlu1 %v4291_v28, %s4830_s10  ;;  %v4370_v40 = vcombine.low %v3174_v25, %v3177_v34  ;;  %v675_v42 = vshll.u32 %v405_v27, 16  ;;  %v3121_v44 = vsel %vm4916_vm2, %v3119_v31, %v3120_v35  ;;  %v679_v46 = vshrl.u32 %v405_v27, 16 }
  0x63   : > { %v668_v45 = vrot.slane %v666_v36, 4  ;;  %v685_v47 = vshll.u32 %v406_v32, 16  ;;  %v2569_v49 = vsel %vm4966_vm5, %v2564_v39, %v2568_v19  ;;  %v4362_v50 = vcombine.low %v3118_v30, %v3121_v44  ;;  %v383_v39 = vld [vmem:[%s4914_s30 + $0x24] sm:$0xf] }
  0x64   : > { %v671_v51 = vrot.slane %v669_v41, 5  ;;  %v677_v52 = vrot.slane %v675_v42, 5  ;;  %v4283_v55 = vcombine.low %v2559_v33, %v2569_v49  ;;  %v681_v56 = vrot.slane %v679_v46, 4  ;;  %v409_v33 = vld [vmem:[%s4914_s30 + $0x8c] sm:$0x1] }
  0x65   : > { %v687_v57 = vrot.slane %v685_v47, 5  ;;  %v474_v58 = vshrl.u32 %v380_v37, 16  ;;  %v477_v61 = vshll.u32 %v380_v37, 16  ;;  %v483_v62 = vshll.u32 %v381_v38, 16  ;;  %v952_v46 = vld [vmem:[%s4914_s30 + $0x78] sm:$0xe] }
  0x66   : > { %3291 = vrot.lane.b32.xlu1 %v4370_v40, %s4831_s11  ;;  %v672_v60 = vor.u32 %v671_v51, %v668_v45  ;;  %v487_v63 = vshrl.u32 %v381_v38, 16  ;;  %2956 = vrot.lane.b32.xlu0 %v4283_v55, %s4830_s10  ;;  %v682_v2 = vor.u32 %v681_v56, %v677_v52  ;;  %v493_v4 = vshll.u32 %v382_v43, 16  ;;  %v384_v40 = vld [vmem:[%s4914_s30 + $0x28] sm:$0xf]  ;;  %v385_v45 = vld [vmem:[%s4914_s30 + $0x2c] sm:$0x1] }
  0x67   : > { %v476_v3 = vrot.slane %v474_v58, 4  ;;  %v4355_v6 = vrot.slane %v4325_v48, 9  ;;  %v479_v9 = vrot.slane %v477_v61, 5  ;;  %v485_v10 = vrot.slane %v483_v62, 5  ;;  %v953_v51 = vld [vmem:[%s4914_s30 + $0x7c] sm:$0xf] }
  0x68   : > { %v673_v8 = vrot.slane %v672_v60, 4  ;;  %v489_v11 = vrot.slane %v487_v63, 4  ;;  %v683_v13 = vrot.slane %v682_v2, 4  ;;  %v495_v14 = vrot.slane %v493_v4, 5  ;;  %v954_v56 = vld [vmem:[%s4914_s30 + $0x80] sm:$0x1] }
  0x69   : > { %v3180_v15 = vrot.slane %v4326_v53, 5  ;;  %v3183_v16 = vrot.slane %v4327_v54, 5  ;;  %v480_v18 = vor.u32 %v479_v9, %v476_v3  ;;  %v4347_v20 = vrot.slane %v4301_v59, 9  ;;  %v928_v61 = vld [vmem:[%s4914_s30 + $0x18] sm:$0xe] }
  0x6a   : > { %v678_v17 = vsel %vm4966_vm5, %v673_v8, %v677_v52  ;;  %v490_v19 = vor.u32 %v489_v11, %v485_v10  ;;  %3275 = vrot.lane.b32.xlu0 %v4362_v50, %s4831_s11  ;;  %v688_v22 = vsel %vm4966_vm5, %v683_v13, %v687_v57  ;;  %v3124_v25 = vrot.slane %v4302_v1, 5  ;;  %v929_v3 = vld [vmem:[%s4914_s30 + $0x1c] sm:$0xf]  ;;  %v930_v9 = vld [vmem:[%s4914_s30 + $0x20] sm:$0x1] }
  0x6b   : > { %v3181_v23 = vsel %vm4916_vm2, %v4355_v6, %v3180_v15  ;;  %v3182_v24 = vrot.slane %v3180_v15, 4  ;;  %v3956_v26 = vcombine.low %v678_v17, %v688_v22  ;;  %v481_v27 = vrot.slane %v480_v18, 4  ;;  %v4723_v15 = vld [vmem:[%s6130_s1] sm:$0xff]  }
  0x6c   : > { %v491_v28 = vrot.slane %v490_v19, 4  ;;  %v3127_v29 = vrot.slane %v4303_v7, 5  ;;  %v3125_v31 = vsel %vm4916_vm2, %v4347_v20, %v3124_v25  ;;  %v3126_v32 = vrot.slane %v3124_v25, 4  ;;  %v956_v20 = vld [vmem:[%s4914_s30 + $0x88] sm:$0xf]  ;;  %4582 = vmatprep.subr.bf16.mxu0 %v4723_v15  ;;  %4620 = vmatprep.subr.bf16.mxu1 %v4723_v15 }
  0x6d   : > { %v3184_v30 = vsel %vm4916_vm2, %v3182_v24, %v3183_v16  ;;  %v690_v34 = vshrl.u32 %v407_v12, 16  ;;  %877 = vrot.lane.b32.xlu1 %v3956_v26, %s4826_s6  ;;  %v486_v35 = vsel %vm4966_vm5, %v481_v27, %v485_v10  ;;  %v693_v38 = vshll.u32 %v407_v12, 16  ;;  %v931_v26 = vld [vmem:[%s4914_s30 + $0x24] sm:$0xe]  ;;  %v4724_v27 = vld [vmem:[%s6130_s1 + $0x8] sm:$0xff]   ;;  %4583 = vmatpush3.bf16.msra.mxu0 %v4723_v15 }
  0x6e   : > { %v496_v36 = vsel %vm4966_vm5, %v491_v28, %v495_v14  ;;  %v4371_v37 = vcombine.low %v3181_v23, %v3184_v30  ;;  %v3128_v42 = vsel %vm4916_vm2, %v3126_v32, %v3127_v29  ;;  %v699_v44 = vshll.u32 %v408_v21, 16  ;;  %v955_v14 = vld [vmem:[%s4914_s30 + $0x84] sm:$0xe]  ;;  %v932_v32 = vld [vmem:[%s4914_s30 + $0x28] sm:$0xf]  ;;  %4623 = vmatpush3.bf16.msra.mxu1 %v4723_v15  ;;  %4584 = vmatprep.subr.bf16.mxu0 %v4724_v27 }
  0x6f   : > { %v3948_v41 = vcombine.low %v486_v35, %v496_v36  ;;  %v692_v43 = vrot.slane %v690_v34, 4  ;;  %v4363_v47 = vcombine.low %v3125_v31, %v3128_v42  ;;  %v695_v48 = vrot.slane %v693_v38, 5  ;;  %v4072_v42 = vld [vmem:[%s4914_s30 + $0x84] sm:$0xf]  ;;  %4621 = vmatprep.subr.bf16.mxu1 %v4724_v27 }
  0x70   : > { %v703_v49 = vshrl.u32 %v408_v21, 16  ;;  %v709_v50 = vshll.u32 %v409_v33, 16  ;;  %v701_v52 = vrot.slane %v699_v44, 5  ;;  %v498_v53 = vshrl.u32 %v383_v39, 16  ;;  %v957_v21 = vld [vmem:[%s4914_s30 + $0x8c] sm:$0x1] }
  0x71   : > { %861 = vrot.lane.b32.xlu0 %v3948_v41, %s4826_s6  ;;  %v501_v54 = vshll.u32 %v383_v39, 16  ;;  %v507_v55 = vshll.u32 %v384_v40, 16  ;;  %3293 = vrot.lane.b32.xlu1 %v4371_v37, %s4831_s11  ;;  %v696_v57 = vor.u32 %v695_v48, %v692_v43  ;;  %v511_v60 = vshrl.u32 %v384_v40, 16  ;;  %v933_v37 = vld [vmem:[%s4914_s30 + $0x2c] sm:$0x1] }
  0x72   : > { %v705_v58 = vrot.slane %v703_v49, 4  ;;  %v711_v59 = vrot.slane %v709_v50, 5  ;;  %v500_v62 = vrot.slane %v498_v53, 4  ;;  %v517_v2 = vshll.u32 %v385_v45, 16  ;;  %v4073_v43 = vld [vmem:[%s4914_s30 + $0x88] sm:$0xf]  ;;  %4585 = vmatpush3.bf16.msra.mxu0 %v4724_v27  ;;  %4624 = vmatpush3.bf16.msra.mxu1 %v4724_v27 }
  0x73   : > { %v503_v63 = vrot.slane %v501_v54, 5  ;;  %v509_v1 = vrot.slane %v507_v55, 5  ;;  %v697_v4 = vrot.slane %v696_v57, 4  ;;  %v513_v7 = vrot.slane %v511_v60, 4  ;;  %v4074_v48 = vld [vmem:[%s4914_s30 + $0x8c] sm:$0x1] }
  0x74   : > { %v706_v6 = vor.u32 %v705_v58, %v701_v52  ;;  %v3972_v8 = vrot.slane %v952_v46, 9  ;;  %v519_v11 = vrot.slane %v517_v2, 5  ;;  %v1093_v12 = vrot.slane %v953_v51, 5  ;;  %v4048_v53 = vld [vmem:[%s4914_s30 + $0x24] sm:$0xf] }
  0x75   : > { %3277 = vrot.lane.b32.xlu0 %v4363_v47, %s4831_s11  ;;  %v504_v10 = vor.u32 %v503_v63, %v500_v62  ;;  %v1096_v13 = vrot.slane %v954_v56, 5  ;;  %v702_v16 = vsel %vm4966_vm5, %v697_v4, %v701_v52  ;;  %v514_v18 = vor.u32 %v513_v7, %v509_v1  ;;  %v4049_v54 = vld [vmem:[%s4914_s30 + $0x28] sm:$0xf] }
  0x76   : > { %v707_v17 = vrot.slane %v706_v6, 4  ;;  %v3964_v19 = vrot.slane %v928_v61, 9  ;;  %v1094_v23 = vsel %vm4916_vm2, %v3972_v8, %v1093_v12  ;;  %v1095_v24 = vrot.slane %v1093_v12, 4 }
  0x77   : > { %v505_v22 = vrot.slane %v504_v10, 4  ;;  %v1037_v25 = vrot.slane %v929_v3, 5  ;;  %v515_v29 = vrot.slane %v514_v18, 4  ;;  %v1040_v30 = vrot.slane %v930_v9, 5 }
  0x78   : > { %v712_v28 = vsel %vm4966_vm5, %v707_v17, %v711_v59  ;;  %v3973_v31 = vrot.slane %v955_v14, 9  ;;  %v1097_v35 = vsel %vm4916_vm2, %v1095_v24, %v1096_v13  ;;  %v1100_v41 = vrot.slane %v956_v20, 5  ;;  %v4050_v59 = vld [vmem:[%s4914_s30 + $0x2c] sm:$0x1]  ;;  %v4701_v20 = vld [vmem:[%s4914_s30 + $0x84] sm:$0xff]  }
  0x79   : > { %v3957_v33 = vcombine.low %v702_v16, %v712_v28  ;;  %v510_v34 = vsel %vm4966_vm5, %v505_v22, %v509_v1  ;;  %v1038_v36 = vsel %vm4916_vm2, %v3964_v19, %v1037_v25  ;;  %v520_v38 = vsel %vm4966_vm5, %v515_v29, %v519_v11  ;;  %v4075_v1 = vld [vmem:[%s4914_s30 + $0x90] sm:$0xf]  ;;  %v4076_v19 = vld [vmem:[%s4914_s30 + $0x94] sm:$0xf]  ;;  %v4077_v29 = vld [vmem:[%s4914_s30 + $0x98] sm:$0x1] }
  0x7a   : > { %v3988_v39 = vcombine.low %v1094_v23, %v1097_v35  ;;  %v1039_v40 = vrot.slane %v1037_v25, 4  ;;  %v3949_v44 = vcombine.low %v510_v34, %v520_v38  ;;  %v1103_v45 = vrot.slane %v957_v21, 5  ;;  %v4051_v35 = vld [vmem:[%s4914_s30 + $0x30] sm:$0xf] }
  0x7b   : > { %879 = vrot.lane.b32.xlu1 %v3957_v33, %s4826_s6  ;;  %v3965_v46 = vrot.slane %v931_v26, 9  ;;  %v1044_v47 = vrot.slane %v932_v32, 5  ;;  %v1101_v50 = vsel %vm4916_vm2, %v3973_v31, %v1100_v41  ;;  %v1102_v51 = vrot.slane %v1100_v41, 4  ;;  %v4703_v41 = vld [vmem:[%s4914_s30 + $0x90] sm:$0xff]  }
  0x7c   : > { %v1041_v49 = vsel %vm4916_vm2, %v1039_v40, %v1040_v30  ;;  %v1047_v52 = vrot.slane %v933_v37, 5  ;;  %863 = vrot.lane.b32.xlu0 %v3949_v44, %s4826_s6  ;;  %v1716_v58 = vshrl.u32 %v4072_v42, 16  ;;  %v1719_v61 = vshll.u32 %v4072_v42, 16  ;;  %v4702_v30 = vld [vmem:[%s4914_s30 + $0x24] sm:$0xff]   ;;  %v4052_v40 = vld [vmem:[%s4914_s30 + $0x34] sm:$0xf] }
  0x7d   : > { %v3980_v55 = vcombine.low %v1038_v36, %v1041_v49  ;;  %v1045_v56 = vsel %vm4916_vm2, %v3965_v46, %v1044_v47  ;;  %v1046_v57 = vrot.slane %v1044_v47, 4  ;;  %v1104_v60 = vsel %vm4916_vm2, %v1102_v51, %v1103_v45  ;;  %v4704_v42 = vld [vmem:[%s4914_s30 + $0x30] sm:$0xff]  }
  0x7e   : > { %v1725_v62 = vshll.u32 %v4073_v43, 16  ;;  %v1729_v63 = vshrl.u32 %v4073_v43, 16  ;;  %v3989_v2 = vcombine.low %v1101_v50, %v1104_v60  ;;  %v1718_v4 = vrot.slane %v1716_v58, 4  ;;  %v4053_v50 = vld [vmem:[%s4914_s30 + $0x38] sm:$0x1] }
  0x7f   : > { %1201 = vrot.lane.b32.xlu1 %v3988_v39, %s4825_s5  ;;  %v1048_v3 = vsel %vm4916_vm2, %v1046_v57, %v1047_v52  ;;  %v1735_v6 = vshll.u32 %v4074_v48, 16  ;;  %v1721_v8 = vrot.slane %v1719_v61, 5  ;;  %v1524_v12 = vshrl.u32 %v4048_v53, 16  ;;  %v4137_v57 = vld [vmem:[%s4914_s30 + $0x88] sm:$0xf] }
  0x80   : > { %v3981_v7 = vcombine.low %v1045_v56, %v1048_v3  ;;  %v1727_v9 = vrot.slane %v1725_v62, 5  ;;  %v1731_v10 = vrot.slane %v1729_v63, 4  ;;  %1185 = vrot.lane.b32.xlu0 %v3980_v55, %s4825_s5  ;;  %v1527_v13 = vshll.u32 %v4048_v53, 16  ;;  %v4136_v56 = vld [vmem:[%s4914_s30 + $0x84] sm:$0xe] }
  0x81   : > { %v1737_v11 = vrot.slane %v1735_v6, 5  ;;  %v1533_v14 = vshll.u32 %v4049_v54, 16  ;;  %v1722_v15 = vor.u32 %v1721_v8, %v1718_v4  ;;  %v1537_v17 = vshrl.u32 %v4049_v54, 16  ;;  %v4138_v62 = vld [vmem:[%s4914_s30 + $0x8c] sm:$0x1] }
  0x82   : > { %v1732_v16 = vor.u32 %v1731_v10, %v1727_v9  ;;  %v1543_v18 = vshll.u32 %v4050_v59, 16  ;;  %v1526_v21 = vrot.slane %v1524_v12, 4  ;;  %v1529_v22 = vrot.slane %v1527_v13, 5  ;;  %v4112_v63 = vld [vmem:[%s4914_s30 + $0x24] sm:$0xe] }
  0x83   : > { %1203 = vrot.lane.b32.xlu1 %v3989_v2, %s4825_s5  ;;  %v1535_v23 = vrot.slane %v1533_v14, 5  ;;  %v1740_v24 = vshrl.u32 %v4075_v1, 16  ;;  %v1723_v25 = vrot.slane %v1722_v15, 4  ;;  %v1539_v27 = vrot.slane %v1537_v17, 4  ;;  %v4113_v6 = vld [vmem:[%s4914_s30 + $0x28] sm:$0xf] }
  0x84   : > { %v1733_v26 = vrot.slane %v1732_v16, 4  ;;  %v1545_v28 = vrot.slane %v1543_v18, 5  ;;  %1187 = vrot.lane.b32.xlu0 %v3981_v7, %s4825_s5  ;;  %v1530_v31 = vor.u32 %v1529_v22, %v1526_v21  ;;  %v1743_v33 = vshll.u32 %v4075_v1, 16  ;;  %v4139_v16 = vld [vmem:[%s4914_s30 + $0x90] sm:$0xe] }
  0x85   : > { %v1742_v32 = vrot.slane %v1740_v24, 4  ;;  %v1749_v34 = vshll.u32 %v4076_v19, 16  ;;  %v1728_v36 = vsel %vm4966_vm5, %v1723_v25, %v1727_v9  ;;  %v1540_v38 = vor.u32 %v1539_v27, %v1535_v23  ;;  %v4140_v17 = vld [vmem:[%s4914_s30 + $0x94] sm:$0xf]  ;;  %v4141_v22 = vld [vmem:[%s4914_s30 + $0x98] sm:$0x1] }
  0x86   : > { %v1738_v37 = vsel %vm4966_vm5, %v1733_v26, %v1737_v11  ;;  %v1753_v39 = vshrl.u32 %v4076_v19, 16  ;;  %v1531_v44 = vrot.slane %v1530_v31, 4  ;;  %v1745_v45 = vrot.slane %v1743_v33, 5  ;;  %v4114_v11 = vld [vmem:[%s4914_s30 + $0x2c] sm:$0x1] }
  0x87   : > { %1382 = vrot.lane.b32.xlu1 %v4701_v20, %s4824_s4  ;;  %v4100_v43 = vcombine.low %v1728_v36, %v1738_v37  ;;  %v1751_v46 = vrot.slane %v1749_v34, 5  ;;  %v1541_v47 = vrot.slane %v1540_v38, 4  ;;  %v1759_v49 = vshll.u32 %v4077_v29, 16  ;;  %v4115_v27 = vld [vmem:[%s4914_s30 + $0x30] sm:$0xe] }
  0x88   : > { %v1755_v48 = vrot.slane %v1753_v39, 4  ;;  %v1548_v51 = vshrl.u32 %v4051_v35, 16  ;;  %1366 = vrot.lane.b32.xlu0 %v4702_v30, %s4824_s4  ;;  %v1536_v52 = vsel %vm4966_vm5, %v1531_v44, %v1535_v23  ;;  %v1746_v53 = vor.u32 %v1745_v45, %v1742_v32  ;;  %v4116_v32 = vld [vmem:[%s4914_s30 + $0x34] sm:$0xf]  ;;  %v4117_v37 = vld [vmem:[%s4914_s30 + $0x38] sm:$0x1] }
  0x89   : > { %v1551_v54 = vshll.u32 %v4051_v35, 16  ;;  %v1557_v55 = vshll.u32 %v4052_v40, 16  ;;  %v1546_v58 = vsel %vm4966_vm5, %v1541_v47, %v1545_v28  ;;  %v1761_v60 = vrot.slane %v1759_v49, 5  ;;  %v4264_v38 = vld [vmem:[%s4914_s30 + $0x90] sm:$0xf] }
  0x8a   : > { %v1756_v59 = vor.u32 %v1755_v48, %v1751_v46  ;;  %v1550_v61 = vrot.slane %v1548_v51, 4  ;;  %v4092_v1 = vcombine.low %v1536_v52, %v1546_v58  ;;  %v1747_v2 = vrot.slane %v1746_v53, 4  ;;  %v4266_v44 = vld [vmem:[%s4914_s30 + $0x98] sm:$0x1]  ;;  %v4240_v45 = vld [vmem:[%s4914_s30 + $0x30] sm:$0xf] }
  0x8b   : > { %1384 = vrot.lane.b32.xlu1 %v4703_v41, %s4824_s4  ;;  %v1553_v3 = vrot.slane %v1551_v54, 5  ;;  %v1559_v4 = vrot.slane %v1557_v55, 5  ;;  %v1561_v8 = vshrl.u32 %v4052_v40, 16  ;;  %v1567_v9 = vshll.u32 %v4053_v50, 16 }
  0x8c   : > { %v1757_v7 = vrot.slane %v1756_v59, 4  ;;  %v4164_v10 = vrot.slane %v4136_v56, 9  ;;  %1368 = vrot.lane.b32.xlu0 %v4704_v42, %s4824_s4  ;;  %v1752_v12 = vsel %vm4966_vm5, %v1747_v2, %v1751_v46  ;;  %v2140_v14 = vrot.slane %v4137_v57, 5  ;;  %v4241_v59 = vld [vmem:[%s4914_s30 + $0x34] sm:$0xf] }
  0x8d   : > { %v1554_v13 = vor.u32 %v1553_v3, %v1550_v61  ;;  %v2143_v15 = vrot.slane %v4138_v62, 5  ;;  %v1563_v19 = vrot.slane %v1561_v8, 4  ;;  %v1569_v20 = vrot.slane %v1567_v9, 5 }
  0x8e   : > { %v1762_v18 = vsel %vm4966_vm5, %v1757_v7, %v1761_v60  ;;  %v4156_v21 = vrot.slane %v4112_v63, 9  ;;  %v2141_v25 = vsel %vm4916_vm2, %v4164_v10, %v2140_v14  ;;  %v2142_v26 = vrot.slane %v2140_v14, 4  ;;  %v5262_v46 = vpop.permute.xlu1 %1378 }
  0x8f   : > { %1927 = vrot.lane.b32.xlu1 %v4100_v43, %s4827_s7  ;;  %v4101_v23 = vcombine.low %v1752_v12, %v1762_v18  ;;  %v1555_v24 = vrot.slane %v1554_v13, 4  ;;  %v1564_v28 = vor.u32 %v1563_v19, %v1559_v4  ;;  %v2084_v29 = vrot.slane %v4113_v6, 5  ;;  %v4265_v43 = vld [vmem:[%s4914_s30 + $0x94] sm:$0xf]  ;;  %v4267_v12 = vld [vmem:[%s4914_s30 + $0x9c] sm:$0xf] }
  0x90   : > { %v2087_v30 = vrot.slane %v4114_v11, 5  ;;  %v4165_v31 = vrot.slane %v4139_v16, 9  ;;  %1911 = vrot.lane.b32.xlu0 %v4092_v1, %s4827_s7  ;;  %v2144_v34 = vsel %vm4916_vm2, %v2142_v26, %v2143_v15  ;;  %v2147_v35 = vrot.slane %v4140_v17, 5  ;;  %v5281_v11 = vpop.permute.xlu0 %1362  ;;  %v4268_v18 = vld [vmem:[%s4914_s30 + $0xa0] sm:$0xf] }
  0x91   : > { %v1560_v33 = vsel %vm4966_vm5, %v1555_v24, %v1559_v4  ;;  %v2150_v36 = vrot.slane %v4141_v22, 5  ;;  %v1565_v39 = vrot.slane %v1564_v28, 4  ;;  %v4180_v40 = vcombine.low %v2141_v25, %v2144_v34  ;;  %v4242_v4 = vld [vmem:[%s4914_s30 + $0x38] sm:$0x1]  ;;  %v4705_v24 = vld [vmem:[%s4914_s30 + $0x90] sm:$0xff]  }
  0x92   : > { %v2085_v41 = vsel %vm4916_vm2, %v4156_v21, %v2084_v29  ;;  %v2086_v42 = vrot.slane %v2084_v29, 4  ;;  %v2148_v47 = vsel %vm4916_vm2, %v4165_v31, %v2147_v35  ;;  %v2149_v48 = vrot.slane %v2147_v35, 4  ;;  %v4243_v29 = vld [vmem:[%s4914_s30 + $0x3c] sm:$0xf] }
  0x93   : > { %1929 = vrot.lane.b32.xlu1 %v4101_v23, %s4827_s7  ;;  %v4157_v49 = vrot.slane %v4115_v27, 9  ;;  %v2091_v50 = vrot.slane %v4116_v32, 5  ;;  %v1570_v51 = vsel %vm4966_vm5, %v1565_v39, %v1569_v20  ;;  %v2094_v53 = vrot.slane %v4117_v37, 5  ;;  %v4269_v23 = vld [vmem:[%s4914_s30 + $0xa4] sm:$0x1] }
  0x94   : > { %v2088_v52 = vsel %vm4916_vm2, %v2086_v42, %v2087_v30  ;;  %v2763_v54 = vshrl.u32 %v4264_v38, 16  ;;  %v4093_v55 = vcombine.low %v1560_v33, %v1570_v51  ;;  %v2151_v57 = vsel %vm4916_vm2, %v2149_v48, %v2150_v36  ;;  %v4244_v51 = vld [vmem:[%s4914_s30 + $0x40] sm:$0xf] }
  0x95   : > { %v4172_v56 = vcombine.low %v2085_v41, %v2088_v52  ;;  %v2092_v58 = vsel %vm4916_vm2, %v4157_v49, %v2091_v50  ;;  %v4181_v60 = vcombine.low %v2148_v47, %v2151_v57  ;;  %v2093_v61 = vrot.slane %v2091_v50, 4  ;;  %v5284_v13 = vpop.permute.xlu1 %1197  ;;  %v4708_v57 = vld [vmem:[%s4914_s30 + $0x3c] sm:$0xff]  }
  0x96   : > { %v2765_v62 = vrot.slane %v2763_v54, 4  ;;  %v2766_v63 = vshll.u32 %v4264_v38, 16  ;;  %1913 = vrot.lane.b32.xlu0 %v4093_v55, %s4827_s7  ;;  %v2772_v1 = vshll.u32 %v4265_v43, 16  ;;  %v2776_v2 = vshrl.u32 %v4265_v43, 16  ;;  %v4706_v38 = vld [vmem:[%s4914_s30 + $0x30] sm:$0xff]  }
  0x97   : > { %2248 = vrot.lane.b32.xlu1 %v4180_v40, %s4828_s8  ;;  %v2782_v3 = vshll.u32 %v4266_v44, 16  ;;  %v2571_v6 = vshrl.u32 %v4240_v45, 16  ;;  %v2095_v7 = vsel %vm4916_vm2, %v2093_v61, %v2094_v53  ;;  %v2574_v9 = vshll.u32 %v4240_v45, 16  ;;  %v5295_v43 = vpop.permute.xlu0 %1181  ;;  %v4707_v45 = vld [vmem:[%s4914_s30 + $0x9c] sm:$0xff]   ;;  %v4245_v55 = vld [vmem:[%s4914_s30 + $0x44] sm:$0x1] }
  0x98   : > { %v2768_v8 = vrot.slane %v2766_v63, 5  ;;  %v2580_v10 = vshll.u32 %v4241_v59, 16  ;;  %v4173_v14 = vcombine.low %v2092_v58, %v2095_v7  ;;  %v2774_v15 = vrot.slane %v2772_v1, 5 }
  0x99   : > { %v2778_v16 = vrot.slane %v2776_v2, 4  ;;  %v2784_v17 = vrot.slane %v2782_v3, 5  ;;  %v2573_v20 = vrot.slane %v2571_v6, 4  ;;  %v2576_v21 = vrot.slane %v2574_v9, 5 }
  0x9a   : > { %v2769_v19 = vor.u32 %v2768_v8, %v2765_v62  ;;  %v2582_v22 = vrot.slane %v2580_v10, 5  ;;  %2232 = vrot.lane.b32.xlu0 %v4172_v56, %s4828_s8  ;;  %v2584_v26 = vshrl.u32 %v4241_v59, 16  ;;  %v2590_v27 = vshll.u32 %v4242_v4, 16  ;;  %v5297_v44 = vpop.permute.xlu1 %1199  ;;  %v4328_v62 = vld [vmem:[%s4914_s30 + $0x90] sm:$0xe] }
  0x9b   : > { %2250 = vrot.lane.b32.xlu1 %v4181_v60, %s4828_s8  ;;  %v2779_v25 = vor.u32 %v2778_v16, %v2774_v15  ;;  %v2787_v28 = vshrl.u32 %v4267_v12, 16  ;;  %v2577_v31 = vor.u32 %v2576_v21, %v2573_v20  ;;  %v2790_v32 = vshll.u32 %v4267_v12, 16  ;;  %v4329_v4 = vld [vmem:[%s4914_s30 + $0x94] sm:$0xf]  ;;  %v4330_v10 = vld [vmem:[%s4914_s30 + $0x98] sm:$0x1]  ;;  %v5321_v20 = vpop.permute.xlu0 %1183 }
  0x9c   : > { %v2770_v30 = vrot.slane %v2769_v19, 4  ;;  %v2796_v33 = vshll.u32 %v4268_v18, 16  ;;  %v2586_v35 = vrot.slane %v2584_v26, 4  ;;  %v2592_v36 = vrot.slane %v2590_v27, 5  ;;  %v4304_v12 = vld [vmem:[%s4914_s30 + $0x30] sm:$0xe] }
  0x9d   : > { %v2780_v34 = vrot.slane %v2779_v25, 4  ;;  %v2789_v37 = vrot.slane %v2787_v28, 4  ;;  %v2578_v40 = vrot.slane %v2577_v31, 4  ;;  %v2792_v41 = vrot.slane %v2790_v32, 5  ;;  %v4306_v19 = vld [vmem:[%s4914_s30 + $0x38] sm:$0x1] }
  0x9e   : > { %v2775_v39 = vsel %vm4966_vm5, %v2770_v30, %v2774_v15  ;;  %v2798_v42 = vrot.slane %v2796_v33, 5  ;;  %2234 = vrot.lane.b32.xlu0 %v4173_v14, %s4828_s8  ;;  %v2587_v48 = vor.u32 %v2586_v35, %v2582_v22  ;;  %v2800_v49 = vshrl.u32 %v4268_v18, 16  ;;  %v4305_v18 = vld [vmem:[%s4914_s30 + $0x34] sm:$0xf]  ;;  %v410_v30 = vld [vmem:[%s4914_s30 + $0x90] sm:$0xf] }
  0x9f   : > { %2429 = vrot.lane.b32.xlu1 %v4705_v24, %s4829_s9  ;;  %v2785_v47 = vsel %vm4966_vm5, %v2780_v34, %v2784_v17  ;;  %v2806_v50 = vshll.u32 %v4269_v23, 16  ;;  %v2583_v53 = vsel %vm4966_vm5, %v2578_v40, %v2582_v22  ;;  %v2793_v54 = vor.u32 %v2792_v41, %v2789_v37  ;;  %v411_v35 = vld [vmem:[%s4914_s30 + $0x94] sm:$0xf]  ;;  %v412_v40 = vld [vmem:[%s4914_s30 + $0x98] sm:$0x1] }
  0xa0   : > { %v4292_v52 = vcombine.low %v2775_v39, %v2785_v47  ;;  %v2595_v56 = vshrl.u32 %v4243_v29, 16  ;;  %v2588_v58 = vrot.slane %v2587_v48, 4  ;;  %v2802_v59 = vrot.slane %v2800_v49, 4  ;;  %v386_v41 = vld [vmem:[%s4914_s30 + $0x30] sm:$0xf] }
  0xa1   : > { %v2808_v60 = vrot.slane %v2806_v50, 5  ;;  %v2598_v61 = vshll.u32 %v4243_v29, 16  ;;  %v2794_v63 = vrot.slane %v2793_v54, 4  ;;  %v2604_v2 = vshll.u32 %v4244_v51, 16  ;;  %v387_v49 = vld [vmem:[%s4914_s30 + $0x34] sm:$0xf] }
  0xa2   : > { %v2597_v1 = vrot.slane %v2595_v56, 4  ;;  %v2608_v3 = vshrl.u32 %v4244_v51, 16  ;;  %2413 = vrot.lane.b32.xlu0 %v4706_v38, %s4829_s9  ;;  %v2593_v6 = vsel %vm4966_vm5, %v2588_v58, %v2592_v36  ;;  %v2803_v7 = vor.u32 %v2802_v59, %v2798_v42  ;;  %v5323_v21 = vpop.permute.xlu1 %859  ;;  %v388_v50 = vld [vmem:[%s4914_s30 + $0x38] sm:$0x1] }
  0xa3   : > { %2431 = vrot.lane.b32.xlu1 %v4707_v45, %s4829_s9  ;;  %v2600_v8 = vrot.slane %v2598_v61, 5  ;;  %v2614_v9 = vshll.u32 %v4245_v55, 16  ;;  %v4284_v14 = vcombine.low %v2583_v53, %v2593_v6  ;;  %v2799_v15 = vsel %vm4966_vm5, %v2794_v63, %v2798_v42  ;;  %v4712_v6 = vld [vmem:[%s4914_s30 + $0x60] sm:$0xff]  }
  0xa4   : > { %v2606_v16 = vrot.slane %v2604_v2, 5  ;;  %v2610_v17 = vrot.slane %v2608_v3, 4  ;;  %v2804_v22 = vrot.slane %v2803_v7, 4  ;;  %v4356_v25 = vrot.slane %v4328_v62, 9  ;;  %v4709_v2 = vld [vmem:[%s4914_s30 + $0xc] sm:$0xff]   ;;  %v4710_v3 = vld [vmem:[%s4914_s30] sm:$0xff]  }
  0xa5   : > { %v2601_v23 = vor.u32 %v2600_v8, %v2597_v1  ;;  %v2616_v24 = vrot.slane %v2614_v9, 5  ;;  %v3187_v27 = vrot.slane %v4329_v4, 5  ;;  %v3190_v28 = vrot.slane %v4330_v10, 5  ;;  %v5347_v55 = vpop.permute.xlu0 %857  ;;  %v4711_v4 = vld [vmem:[%s4914_s30 + $0x6c] sm:$0xff]   ;;  %v4721_v7 = vld [vmem:[%s4914_s30 + $0x78] sm:$0xff]   ;;  %v4725_v9 = vld [vmem:[%s4914_s30 + $0x84] sm:$0xff]  }
  0xa6   : > { %v2611_v26 = vor.u32 %v2610_v17, %v2606_v16  ;;  %v4348_v29 = vrot.slane %v4304_v12, 9  ;;  %2415 = vrot.lane.b32.xlu0 %v4708_v57, %s4829_s9  ;;  %v2809_v31 = vsel %vm4966_vm5, %v2804_v22, %v2808_v60  ;;  %v3131_v33 = vrot.slane %v4305_v18, 5  ;;  %v4722_v8 = vld [vmem:[%s4914_s30 + $0x18] sm:$0xff]   ;;  %359 = vst.msk [vmem:[#allocation2 + $0x8] sm:$0xff] %vm357_vm6, %v4709_v2  ;;  %358 = vst.msk [vmem:[#allocation2] sm:$0xff] %vm357_vm6, %v4710_v3 }
  0xa7   : > { %2974 = vrot.lane.b32.xlu1 %v4292_v52, %s4830_s10  ;;  %v2602_v32 = vrot.slane %v2601_v23, 4  ;;  %v3134_v34 = vrot.slane %v4306_v19, 5  ;;  %v4293_v36 = vcombine.low %v2799_v15, %v2809_v31  ;;  %v3188_v38 = vsel %vm4916_vm2, %v4356_v25, %v3187_v27  ;;  %v4332_v23 = vld [vmem:[%s4914_s30 + $0xa0] sm:$0xf]  ;;  %v4307_v25 = vld [vmem:[%s4914_s30 + $0x3c] sm:$0xe] }
  0xa8   : > { %v2612_v37 = vrot.slane %v2611_v26, 4  ;;  %v3189_v39 = vrot.slane %v3187_v27, 4  ;;  %v5339_v45 = vsel %vm4916_vm2, %v4348_v29, %v3131_v33  ;;  %v3133_v47 = vrot.slane %v3131_v33, 4  ;;  %v4726_v26 = vld [vmem:[%s4914_s30 + $0x24] sm:$0xff]   ;;  %367 = vst.msk [vmem:[#allocation2 + $0x48] sm:$0xff] %vm357_vm6, %v4711_v4  ;;  %366 = vst.msk [vmem:[#allocation2 + $0x40] sm:$0xff] %vm357_vm6, %v4712_v6 }
  0xa9   : > { %v2607_v42 = vsel %vm4966_vm5, %v2602_v32, %v2606_v16  ;;  %v714_v48 = vshrl.u32 %v410_v30, 16  ;;  %v717_v53 = vshll.u32 %v410_v30, 16  ;;  %v723_v54 = vshll.u32 %v411_v35, 16  ;;  %v5366_v16 = vld [vmem:[%s4914_s30 + $0x9c] sm:$0xe]  ;;  %368 = vst.msk [vmem:[#allocation2 + $0x50] sm:$0xff] %vm357_vm6, %v4721_v7 }
  0xaa   : > { %v2617_v51 = vsel %vm4966_vm5, %v2612_v37, %v2616_v24  ;;  %v3191_v52 = vsel %vm4916_vm2, %v3189_v39, %v3190_v28  ;;  %v5349_v56 = vpop.permute.xlu1 %875  ;;  %2958 = vrot.lane.b32.xlu0 %v4284_v14, %s4830_s10  ;;  %v3135_v59 = vsel %vm4916_vm2, %v3133_v47, %v3134_v34  ;;  %v727_v1 = vshrl.u32 %v411_v35, 16  ;;  %v5370_v24 = vld [vmem:[%s4914_s30 + $0xa4] sm:$0x1]  ;;  %v4308_v35 = vld [vmem:[%s4914_s30 + $0x40] sm:$0xf]  ;;  %360 = vst.msk [vmem:[#allocation2 + $0x10] sm:$0xff] %vm357_vm6, %v4722_v8 }
  0xab   : > { %2976 = vrot.lane.b32.xlu1 %v4293_v36, %s4830_s10  ;;  %v4285_v57 = vcombine.low %v2607_v42, %v2617_v51  ;;  %v4372_v58 = vcombine.low %v3188_v38, %v3191_v52  ;;  %v716_v60 = vrot.slane %v714_v48, 4  ;;  %v4364_v61 = vcombine.low %v5339_v45, %v3135_v59  ;;  %v4309_v39 = vld [vmem:[%s4914_s30 + $0x44] sm:$0x1]  ;;  %369 = vst.msk [vmem:[#allocation2 + $0x58] sm:$0xff] %vm357_vm6, %v4725_v9  ;;  %v413_v51 = vld [vmem:[%s4914_s30 + $0x9c] sm:$0xf] }
  0xac   : > { %v719_v62 = vrot.slane %v717_v53, 5  ;;  %v5356_v63 = vrot.slane %v723_v54, 5  ;;  %v733_v10 = vshll.u32 %v412_v40, 16  ;;  %v522_v12 = vshrl.u32 %v386_v41, 16  ;;  %361 = vst.msk [vmem:[#allocation2 + $0x18] sm:$0xff] %vm357_vm6, %v4726_v26 }
  0xad   : > { %v525_v14 = vshll.u32 %v386_v41, 16  ;;  %v531_v15 = vshll.u32 %v387_v49, 16  ;;  %v729_v18 = vrot.slane %v727_v1, 4  ;;  %v535_v19 = vshrl.u32 %v387_v49, 16  ;;  %907 = vst.msk [vmem:[#allocation2 + $0x8] sm:$0xff] %vm905_vm7, %v5323_v21  ;;  %906 = vst.msk [vmem:[#allocation2] sm:$0xff] %vm905_vm7, %v5347_v55 }
  0xae   : > { %v720_v17 = vor.u32 %v719_v62, %v716_v60  ;;  %v541_v22 = vshll.u32 %v388_v50, 16  ;;  %2960 = vrot.lane.b32.xlu0 %v4285_v57, %s4830_s10  ;;  %v735_v27 = vrot.slane %v733_v10, 5  ;;  %v524_v28 = vrot.slane %v522_v12, 4  ;;  %v5378_v37 = vpop.permute.xlu1 %1380  ;;  %915 = vst.msk [vmem:[#allocation2 + $0x48] sm:$0xff] %vm905_vm7, %v5349_v56  ;;  %v414_v55 = vld [vmem:[%s4914_s30 + $0xa0] sm:$0xf] }
  0xaf   : > { %3295 = vrot.lane.b32.xlu1 %v4372_v58, %s4831_s11  ;;  %v527_v29 = vrot.slane %v525_v14, 5  ;;  %v533_v30 = vrot.slane %v531_v15, 5  ;;  %v730_v32 = vor.u32 %v729_v18, %v5356_v63  ;;  %v537_v33 = vrot.slane %v535_v19, 4  ;;  %v874_v36 = vpop.permute.xlu0 %873  ;;  %1230 = vst.msk [vmem:[#allocation2] sm:$0xff] %vm1229_vm8, %v5295_v43  ;;  %1231 = vst.msk [vmem:[#allocation2 + $0x8] sm:$0xff] %vm1229_vm8, %v5321_v20 }
  0xb0   : > { %v721_v31 = vrot.slane %v720_v17, 4  ;;  %v543_v34 = vrot.slane %v541_v22, 5  ;;  %v4357_v45 = vrot.slane %v5366_v16, 9  ;;  %v3194_v48 = vrot.slane %v4332_v23, 5  ;;  %914 = vst.msk [vmem:[#allocation2 + $0x40] sm:$0xff] %vm905_vm7, %v874_v36 }
  0xb1   : > { %v528_v38 = vor.u32 %v527_v29, %v524_v28  ;;  %v731_v41 = vrot.slane %v730_v32, 4  ;;  %v538_v42 = vor.u32 %v537_v33, %v533_v30  ;;  %v3197_v49 = vrot.slane %v5370_v24, 5  ;;  %1239 = vst.msk [vmem:[#allocation2 + $0x48] sm:$0xff] %vm1229_vm8, %v5297_v44  ;;  %1238 = vst.msk [vmem:[#allocation2 + $0x40] sm:$0xff] %vm1229_vm8, %v5284_v13  ;;  %v415_v60 = vld [vmem:[%s4914_s30 + $0xa4] sm:$0x1] }
  0xb2   : > { %v726_v40 = vsel %vm4966_vm5, %v721_v31, %v5356_v63  ;;  %3279 = vrot.lane.b32.xlu0 %v4364_v61, %s4831_s11  ;;  %v4349_v50 = vrot.slane %v4307_v25, 9  ;;  %v3138_v21 = vrot.slane %v4308_v35, 5  ;;  %v3141_v54 = vrot.slane %v4309_v39, 5  ;;  %v389_v4 = vld [vmem:[%s4914_s30 + $0x3c] sm:$0xf]  ;;  %1420 = vst.msk [vmem:[#allocation2 + $0x48] sm:$0xff] %vm1410_vm9, %v5378_v37 }
  0xb3   : > { %v529_v47 = vrot.slane %v528_v38, 4  ;;  %v736_v52 = vsel %vm4966_vm5, %v731_v41, %v735_v27  ;;  %v539_v53 = vrot.slane %v538_v42, 4  ;;  %v1365_v56 = vpop.permute.xlu0 %1364  ;;  %v3195_v43 = vsel %vm4916_vm2, %v4357_v45, %v3194_v48  ;;  %v5423_v62 = vpop.permute.xlu1 %1923  ;;  %v390_v6 = vld [vmem:[%s4914_s30 + $0x40] sm:$0xf]  ;;  %v391_v12 = vld [vmem:[%s4914_s30 + $0x44] sm:$0x1] }
  0xb4   : > { %v3958_v57 = vcombine.low %v726_v40, %v736_v52  ;;  %v3196_v20 = vrot.slane %v3194_v48, 4  ;;  %v3139_v44 = vsel %vm4916_vm2, %v4349_v50, %v3138_v21  ;;  %v3140_v13 = vrot.slane %v3138_v21, 4  ;;  %v958_v18 = vld [vmem:[%s4914_s30 + $0x90] sm:$0xe]  ;;  %v959_v19 = vld [vmem:[%s4914_s30 + $0x94] sm:$0xf] }
  0xb5   : > { %v534_v58 = vsel %vm4966_vm5, %v529_v47, %v533_v30  ;;  %v544_v59 = vsel %vm4966_vm5, %v539_v53, %v543_v34  ;;  %v738_v61 = vshrl.u32 %v413_v51, 16  ;;  %v741_v2 = vshll.u32 %v413_v51, 16  ;;  %v960_v27 = vld [vmem:[%s4914_s30 + $0x98] sm:$0x1]  ;;  %v934_v32 = vld [vmem:[%s4914_s30 + $0x30] sm:$0xe] }
  0xb6   : > { %881 = vrot.lane.b32.xlu1 %v3958_v57, %s4826_s6  ;;  %v3950_v63 = vcombine.low %v534_v58, %v544_v59  ;;  %v3198_v1 = vsel %vm4916_vm2, %v3196_v20, %v3197_v49  ;;  %v747_v3 = vshll.u32 %v414_v55, 16  ;;  %v3142_v8 = vsel %vm4916_vm2, %v3140_v13, %v3141_v54  ;;  %v935_v38 = vld [vmem:[%s4914_s30 + $0x34] sm:$0xf]  ;;  %v936_v47 = vld [vmem:[%s4914_s30 + $0x38] sm:$0x1]  ;;  %1411 = vst.msk [vmem:[#allocation2] sm:$0xff] %vm1410_vm9, %v5281_v11 }
  0xb7   : > { %v4373_v7 = vcombine.low %v3195_v43, %v3198_v1  ;;  %v740_v9 = vrot.slane %v738_v61, 4  ;;  %v751_v10 = vshrl.u32 %v414_v55, 16  ;;  %v4365_v14 = vcombine.low %v3139_v44, %v3142_v8  ;;  %v5436_v22 = vpop.permute.xlu0 %1907  ;;  %v4736_v40 = vld [vmem:[%s4914_s30 + $0x90] sm:$0xff]   ;;  %1419 = vst.msk [vmem:[#allocation2 + $0x40] sm:$0xff] %vm1410_vm9, %v5262_v46  ;;  %1412 = vst.msk [vmem:[#allocation2 + $0x8] sm:$0xff] %vm1410_vm9, %v1365_v56 }
  0xb8   : > { %865 = vrot.lane.b32.xlu0 %v3950_v63, %s4826_s6  ;;  %v743_v15 = vrot.slane %v741_v2, 5  ;;  %v749_v16 = vrot.slane %v747_v3, 5  ;;  %v757_v17 = vshll.u32 %v415_v60, 16  ;;  %v546_v24 = vshrl.u32 %v389_v4, 16  ;;  %v961_v52 = vld [vmem:[%s4914_s30 + $0x9c] sm:$0xe] }
  0xb9   : > { %v753_v23 = vrot.slane %v751_v10, 4  ;;  %v549_v25 = vshll.u32 %v389_v4, 16  ;;  %v555_v26 = vshll.u32 %v390_v6, 16  ;;  %v559_v30 = vshrl.u32 %v390_v6, 16  ;;  %370 = vst.msk [vmem:[#allocation2 + $0x60] sm:$0xff] %vm357_vm6, %v4736_v40  ;;  %v4737_v53 = vld [vmem:[%s4914_s30 + $0x30] sm:$0xff]  }
  0xba   : > { %3297 = vrot.lane.b32.xlu1 %v4373_v7, %s4831_s11  ;;  %v744_v28 = vor.u32 %v743_v15, %v740_v9  ;;  %v759_v29 = vrot.slane %v757_v17, 5  ;;  %v565_v31 = vshll.u32 %v391_v12, 16  ;;  %v548_v34 = vrot.slane %v546_v24, 4  ;;  %v962_v11 = vld [vmem:[%s4914_s30 + $0xa0] sm:$0xf]  ;;  %362 = vst.msk [vmem:[#allocation2 + $0x20] sm:$0xff] %vm357_vm6, %v4737_v53 }
  0xbb   : > { %v754_v33 = vor.u32 %v753_v23, %v749_v16  ;;  %v551_v35 = vrot.slane %v549_v25, 5  ;;  %v557_v36 = vrot.slane %v555_v26, 5  ;;  %v1926_v39 = vpop.permute.xlu1 %1925  ;;  %v561_v42 = vrot.slane %v559_v30, 4  ;;  %v5459_v57 = vld [vmem:[%s4914_s30 + $0xa4] sm:$0x1]  ;;  %1964 = vst.msk [vmem:[#allocation2 + $0x40] sm:$0xff] %vm1955_vm10, %v5423_v62 }
  0xbc   : > { %3281 = vrot.lane.b32.xlu0 %v4365_v14, %s4831_s11  ;;  %v745_v41 = vrot.slane %v744_v28, 4  ;;  %v567_v45 = vrot.slane %v565_v31, 5  ;;  %v3974_v50 = vrot.slane %v958_v18, 9  ;;  %v1107_v51 = vrot.slane %v959_v19, 5  ;;  %v937_v46 = vld [vmem:[%s4914_s30 + $0x3c] sm:$0xe] }
  0xbd   : > { %v755_v48 = vrot.slane %v754_v33, 4  ;;  %v552_v49 = vor.u32 %v551_v35, %v548_v34  ;;  %v562_v37 = vor.u32 %v561_v42, %v557_v36  ;;  %v1110_v54 = vrot.slane %v960_v27, 5  ;;  %v938_v44 = vld [vmem:[%s4914_s30 + $0x40] sm:$0xf]  ;;  %v939_v13 = vld [vmem:[%s4914_s30 + $0x44] sm:$0x1] }
  0xbe   : > { %v750_v21 = vsel %vm4966_vm5, %v745_v41, %v749_v16  ;;  %v3966_v55 = vrot.slane %v934_v32, 9  ;;  %v1108_v20 = vsel %vm4916_vm2, %v3974_v50, %v1107_v51  ;;  %v1109_v59 = vrot.slane %v1107_v51, 4  ;;  %v4078_v3 = vld [vmem:[%s4914_s30 + $0x9c] sm:$0xf]  ;;  %v4079_v8 = vld [vmem:[%s4914_s30 + $0xa0] sm:$0xf] }
  0xbf   : > { %v1910_v56 = vpop.permute.xlu0 %1909  ;;  %v760_v58 = vsel %vm4966_vm5, %v755_v48, %v759_v29  ;;  %v553_v43 = vrot.slane %v552_v49, 4  ;;  %v2245_v60 = vpop.permute.xlu1 %2244  ;;  %v563_v63 = vrot.slane %v562_v37, 4  ;;  %v1051_v1 = vrot.slane %v935_v38, 5  ;;  %1956 = vst.msk [vmem:[#allocation2] sm:$0xff] %vm1955_vm10, %v5436_v22  ;;  %1965 = vst.msk [vmem:[#allocation2 + $0x48] sm:$0xff] %vm1955_vm10, %v1926_v39  ;;  %v4738_v17 = vld [vmem:[%s4914_s30 + $0x9c] sm:$0xff]  }
  0xc0   : > { %v3959_v61 = vcombine.low %v750_v21, %v760_v58  ;;  %v1054_v2 = vrot.slane %v936_v47, 5  ;;  %v1111_v6 = vsel %vm4916_vm2, %v1109_v59, %v1110_v54  ;;  %v3975_v7 = vrot.slane %v961_v52, 9  ;;  %1957 = vst.msk [vmem:[#allocation2 + $0x8] sm:$0xff] %vm1955_vm10, %v1910_v56  ;;  %v4080_v16 = vld [vmem:[%s4914_s30 + $0xa4] sm:$0x1]  ;;  %v4739_v26 = vld [vmem:[%s4914_s30 + $0x3c] sm:$0xff]  }
  0xc1   : > { %v558_v4 = vsel %vm4966_vm5, %v553_v43, %v557_v36  ;;  %v568_v9 = vsel %vm4966_vm5, %v563_v63, %v567_v45  ;;  %v3990_v10 = vcombine.low %v1108_v20, %v1111_v6  ;;  %v1052_v12 = vsel %vm4916_vm2, %v3966_v55, %v1051_v1  ;;  %v4054_v28 = vld [vmem:[%s4914_s30 + $0x3c] sm:$0xf]  ;;  %371 = vst.msk [vmem:[#allocation2 + $0x68] sm:$0xff] %vm357_vm6, %v4738_v17  ;;  %v4055_v33 = vld [vmem:[%s4914_s30 + $0x40] sm:$0xf] }
  0xc2   : > { %883 = vrot.lane.b32.xlu1 %v3959_v61, %s4826_s6  ;;  %v1053_v14 = vrot.slane %v1051_v1, 4  ;;  %v3951_v18 = vcombine.low %v558_v4, %v568_v9  ;;  %v1114_v19 = vrot.slane %v962_v11, 5  ;;  %v1117_v23 = vrot.slane %v5459_v57, 5  ;;  %2285 = vst.msk [vmem:[#allocation2 + $0x40] sm:$0xff] %vm2276_vm11, %v2245_v60  ;;  %v4056_v52 = vld [vmem:[%s4914_s30 + $0x44] sm:$0x1] }
  0xc3   : > { %v2229_v15 = vpop.permute.xlu0 %2228  ;;  %v3967_v24 = vrot.slane %v937_v46, 9  ;;  %v2247_v25 = vpop.permute.xlu1 %2246  ;;  %v1058_v22 = vrot.slane %v938_v44, 5  ;;  %v1061_v27 = vrot.slane %v939_v13, 5  ;;  %v1764_v32 = vshrl.u32 %v4078_v3, 16  ;;  %363 = vst.msk [vmem:[#allocation2 + $0x28] sm:$0xff] %vm357_vm6, %v4739_v26  ;;  %v4713_v55 = vld [vmem:[%s4914_s30 + $0x9c] sm:$0xff]  }
  0xc4   : > { %v1055_v62 = vsel %vm4916_vm2, %v1053_v14, %v1054_v2  ;;  %867 = vrot.lane.b32.xlu0 %v3951_v18, %s4826_s6  ;;  %v1115_v30 = vsel %vm4916_vm2, %v3975_v7, %v1114_v19  ;;  %v1116_v31 = vrot.slane %v1114_v19, 4  ;;  %2277 = vst.msk [vmem:[#allocation2] sm:$0xff] %vm2276_vm11, %v2229_v15  ;;  %2286 = vst.msk [vmem:[#allocation2 + $0x48] sm:$0xff] %vm2276_vm11, %v2247_v25  ;;  %v1767_v38 = vshll.u32 %v4078_v3, 16  ;;  %v4081_v43 = vld [vmem:[%s4914_s30 + $0xa8] sm:$0xf] }
  0xc5   : > { %v3982_v29 = vcombine.low %v1052_v12, %v1055_v62  ;;  %v1059_v34 = vsel %vm4916_vm2, %v3967_v24, %v1058_v22  ;;  %v1060_v35 = vrot.slane %v1058_v22, 4  ;;  %v1773_v39 = vshll.u32 %v4079_v8, 16  ;;  %v4082_v13 = vld [vmem:[%s4914_s30 + $0xac] sm:$0xf]  ;;  %v4714_v3 = vld [vmem:[%s4914_s30 + $0x3c] sm:$0xff]  }
  0xc6   : > { %1205 = vrot.lane.b32.xlu1 %v3990_v10, %s4825_s5  ;;  %v1118_v40 = vsel %vm4916_vm2, %v1116_v31, %v1117_v23  ;;  %v1766_v41 = vrot.slane %v1764_v32, 4  ;;  %v1777_v42 = vshrl.u32 %v4079_v8, 16  ;;  %v1783_v45 = vshll.u32 %v4080_v16, 16  ;;  %v4715_v9 = vld [vmem:[%s4914_s30 + $0xa8] sm:$0xff]   ;;  %v4083_v15 = vld [vmem:[%s4914_s30 + $0xb0] sm:$0x1] }
  0xc7   : > { %v2231_v36 = vpop.permute.xlu0 %2230  ;;  %v2426_v47 = vpop.permute.xlu1 %2425  ;;  %v3991_v48 = vcombine.low %v1115_v30, %v1118_v40  ;;  %v1062_v49 = vsel %vm4916_vm2, %v1060_v35, %v1061_v27  ;;  %v1769_v50 = vrot.slane %v1767_v38, 5  ;;  %v1775_v51 = vrot.slane %v1773_v39, 5  ;;  %v4057_v17 = vld [vmem:[%s4914_s30 + $0x48] sm:$0xf]  ;;  %v4058_v26 = vld [vmem:[%s4914_s30 + $0x4c] sm:$0xf] }
  0xc8   : > { %2278 = vst.msk [vmem:[#allocation2 + $0x8] sm:$0xff] %vm2276_vm11, %v2231_v36  ;;  %1189 = vrot.lane.b32.xlu0 %v3982_v29, %s4825_s5  ;;  %v3983_v53 = vcombine.low %v1059_v34, %v1062_v49  ;;  %v1779_v21 = vrot.slane %v1777_v42, 4  ;;  %v1785_v37 = vrot.slane %v1783_v45, 5  ;;  %v1572_v54 = vshrl.u32 %v4054_v28, 16  ;;  %v4059_v30 = vld [vmem:[%s4914_s30 + $0x50] sm:$0x1] }
  0xc9   : > { %v1770_v11 = vor.u32 %v1769_v50, %v1766_v41  ;;  %v1575_v57 = vshll.u32 %v4054_v28, 16  ;;  %v1581_v46 = vshll.u32 %v4055_v33, 16  ;;  %v1585_v56 = vshrl.u32 %v4055_v33, 16  ;;  %2466 = vst.msk [vmem:[#allocation2 + $0x40] sm:$0xff] %vm2457_vm12, %v2426_v47  ;;  %v4142_v31 = vld [vmem:[%s4914_s30 + $0x9c] sm:$0xe] }
  0xca   : > { %1207 = vrot.lane.b32.xlu1 %v3991_v48, %s4825_s5  ;;  %v1780_v20 = vor.u32 %v1779_v21, %v1775_v51  ;;  %v1574_v59 = vrot.slane %v1572_v54, 4  ;;  %v1591_v44 = vshll.u32 %v4056_v52, 16  ;;  %v1788_v7 = vshrl.u32 %v4081_v43, 16  ;;  %v4716_v32 = vld [vmem:[%s4914_s30 + $0x48] sm:$0xff]   ;;  %v4143_v38 = vld [vmem:[%s4914_s30 + $0xa0] sm:$0xf] }
  0xcb   : > { %v2410_v58 = vpop.permute.xlu0 %2409  ;;  %v2428_v60 = vpop.permute.xlu1 %2427  ;;  %v1771_v61 = vrot.slane %v1770_v11, 4  ;;  %v1577_v63 = vrot.slane %v1575_v57, 5  ;;  %v1583_v1 = vrot.slane %v1581_v46, 5  ;;  %v1587_v2 = vrot.slane %v1585_v56, 4  ;;  %v4144_v39 = vld [vmem:[%s4914_s30 + $0xa4] sm:$0x1] }
  0xcc   : > { %2458 = vst.msk [vmem:[#allocation2] sm:$0xff] %vm2457_vm12, %v2410_v58  ;;  %2467 = vst.msk [vmem:[#allocation2 + $0x48] sm:$0xff] %vm2457_vm12, %v2428_v60  ;;  %1191 = vrot.lane.b32.xlu0 %v3983_v53, %s4825_s5  ;;  %v1781_v4 = vrot.slane %v1780_v20, 4  ;;  %v1593_v6 = vrot.slane %v1591_v44, 5  ;;  %v1791_v8 = vshll.u32 %v4081_v43, 16  ;;  %v1797_v16 = vshll.u32 %v4082_v13, 16 }
  0xcd   : > { %v1776_v10 = vsel %vm4966_vm5, %v1771_v61, %v1775_v51  ;;  %v1578_v12 = vor.u32 %v1577_v63, %v1574_v59  ;;  %v1588_v14 = vor.u32 %v1587_v2, %v1583_v1  ;;  %v1790_v23 = vrot.slane %v1788_v7, 4  ;;  %v4118_v47 = vld [vmem:[%s4914_s30 + $0x3c] sm:$0xe]  ;;  %v4119_v48 = vld [vmem:[%s4914_s30 + $0x40] sm:$0xf] }
  0xce   : > { %1386 = vrot.lane.b32.xlu1 %v4713_v55, %s4824_s4  ;;  %v1786_v19 = vsel %vm4966_vm5, %v1781_v4, %v1785_v37  ;;  %v1793_v24 = vrot.slane %v1791_v8, 5  ;;  %v1801_v25 = vshrl.u32 %v4082_v13, 16  ;;  %v1799_v29 = vrot.slane %v1797_v16, 5  ;;  %v4120_v13 = vld [vmem:[%s4914_s30 + $0x44] sm:$0x1] }
  0xcf   : > { %v2412_v18 = vpop.permute.xlu0 %2411  ;;  %v5531_v62 = vpop.permute.xlu1 %2970  ;;  %v4102_v22 = vcombine.low %v1776_v10, %v1786_v19  ;;  %v1579_v27 = vrot.slane %v1578_v12, 4  ;;  %v1589_v28 = vrot.slane %v1588_v14, 4  ;;  %v1807_v35 = vshll.u32 %v4083_v15, 16  ;;  %v4145_v2 = vld [vmem:[%s4914_s30 + $0xa8] sm:$0xe] }
  0xd0   : > { %2459 = vst.msk [vmem:[#allocation2 + $0x8] sm:$0xff] %vm2457_vm12, %v2412_v18  ;;  %1370 = vrot.lane.b32.xlu0 %v4714_v3, %s4824_s4  ;;  %v1794_v33 = vor.u32 %v1793_v24, %v1790_v23  ;;  %v1803_v34 = vrot.slane %v1801_v25, 4  ;;  %v1596_v36 = vshrl.u32 %v4057_v17, 16  ;;  %v1599_v42 = vshll.u32 %v4057_v17, 16  ;;  %v4146_v8 = vld [vmem:[%s4914_s30 + $0xac] sm:$0xf] }
  0xd1   : > { %v1584_v40 = vsel %vm4966_vm5, %v1579_v27, %v1583_v1  ;;  %v1594_v41 = vsel %vm4966_vm5, %v1589_v28, %v1593_v6  ;;  %v1605_v45 = vshll.u32 %v4058_v26, 16  ;;  %v1809_v53 = vrot.slane %v1807_v35, 5  ;;  %v4121_v17 = vld [vmem:[%s4914_s30 + $0x48] sm:$0xe]  ;;  %v4122_v25 = vld [vmem:[%s4914_s30 + $0x4c] sm:$0xf] }
  0xd2   : > { %1388 = vrot.lane.b32.xlu1 %v4715_v9, %s4824_s4  ;;  %v4094_v50 = vcombine.low %v1584_v40, %v1594_v41  ;;  %v1795_v51 = vrot.slane %v1794_v33, 4  ;;  %v1804_v52 = vor.u32 %v1803_v34, %v1799_v29  ;;  %v1598_v37 = vrot.slane %v1596_v36, 4  ;;  %v4147_v9 = vld [vmem:[%s4914_s30 + $0xb0] sm:$0x1]  ;;  %3011 = vst.msk [vmem:[#allocation2 + $0x40] sm:$0xff] %vm3002_vm13, %v5531_v62 }
  0xd3   : > { %v2955_v49 = vpop.permute.xlu0 %2954  ;;  %v1601_v54 = vrot.slane %v1599_v42, 5  ;;  %v1607_v55 = vrot.slane %v1605_v45, 5  ;;  %v1609_v11 = vshrl.u32 %v4058_v26, 16  ;;  %v1615_v56 = vshll.u32 %v4059_v30, 16  ;;  %v4270_v30 = vld [vmem:[%s4914_s30 + $0xa8] sm:$0xf] }
  0xd4   : > { %v2973_v21 = vpop.permute.xlu1 %2972  ;;  %1372 = vrot.lane.b32.xlu0 %v4716_v32, %s4824_s4  ;;  %v1800_v57 = vsel %vm4966_vm5, %v1795_v51, %v1799_v29  ;;  %v1805_v46 = vrot.slane %v1804_v52, 4  ;;  %v4166_v58 = vrot.slane %v4142_v31, 9  ;;  %v2154_v59 = vrot.slane %v4143_v38, 5  ;;  %3003 = vst.msk [vmem:[#allocation2] sm:$0xff] %vm3002_vm13, %v2955_v49  ;;  %v4123_v29 = vld [vmem:[%s4914_s30 + $0x50] sm:$0x1] }
  0xd5   : > { %v1602_v43 = vor.u32 %v1601_v54, %v1598_v37  ;;  %v1611_v20 = vrot.slane %v1609_v11, 4  ;;  %v2157_v44 = vrot.slane %v4144_v39, 5  ;;  %v1617_v61 = vrot.slane %v1615_v56, 5  ;;  %3012 = vst.msk [vmem:[#allocation2 + $0x48] sm:$0xff] %vm3002_vm13, %v2973_v21  ;;  %v4271_v35 = vld [vmem:[%s4914_s30 + $0xac] sm:$0xf] }
  0xd6   : > { %1931 = vrot.lane.b32.xlu1 %v4102_v22, %s4827_s7  ;;  %v1810_v60 = vsel %vm4966_vm5, %v1805_v46, %v1809_v53  ;;  %v4158_v63 = vrot.slane %v4118_v47, 9  ;;  %v2098_v1 = vrot.slane %v4119_v48, 5  ;;  %v2155_v7 = vsel %vm4916_vm2, %v4166_v58, %v2154_v59  ;;  %v4272_v41 = vld [vmem:[%s4914_s30 + $0xb0] sm:$0x1]  ;;  %v4246_v48 = vld [vmem:[%s4914_s30 + $0x48] sm:$0xf] }
  0xd7   : > { %v4103_v3 = vcombine.low %v1800_v57, %v1810_v60  ;;  %v1603_v4 = vrot.slane %v1602_v43, 4  ;;  %v1612_v6 = vor.u32 %v1611_v20, %v1607_v55  ;;  %v2156_v12 = vrot.slane %v2154_v59, 4  ;;  %v4247_v11 = vld [vmem:[%s4914_s30 + $0x4c] sm:$0xf]  ;;  %v4248_v58 = vld [vmem:[%s4914_s30 + $0x50] sm:$0x1] }
  0xd8   : > { %v2957_v10 = vpop.permute.xlu0 %2956  ;;  %1915 = vrot.lane.b32.xlu0 %v4094_v50, %s4827_s7  ;;  %v5561_v14 = vsel %vm4916_vm2, %v4158_v63, %v2098_v1  ;;  %v2100_v15 = vrot.slane %v2098_v1, 4  ;;  %v2101_v16 = vrot.slane %v4120_v13, 5  ;;  %v3292_v18 = vpop.permute.xlu1 %3291  ;;  %v4167_v24 = vrot.slane %v4145_v2, 9  ;;  %v4717_v59 = vld [vmem:[%s4914_s30 + $0xa8] sm:$0xff]   ;;  %v4273_v63 = vld [vmem:[%s4914_s30 + $0xb4] sm:$0xf] }
  0xd9   : > { %v1608_v19 = vsel %vm4966_vm5, %v1603_v4, %v1607_v55  ;;  %v1613_v23 = vrot.slane %v1612_v6, 4  ;;  %v2158_v26 = vsel %vm4916_vm2, %v2156_v12, %v2157_v44  ;;  %v2161_v27 = vrot.slane %v4146_v8, 5  ;;  %3004 = vst.msk [vmem:[#allocation2 + $0x8] sm:$0xff] %vm3002_vm13, %v2957_v10  ;;  %v4274_v12 = vld [vmem:[%s4914_s30 + $0xb8] sm:$0xf] }
  0xda   : > { %1933 = vrot.lane.b32.xlu1 %v4103_v3, %s4827_s7  ;;  %v2102_v22 = vsel %vm4916_vm2, %v2100_v15, %v2101_v16  ;;  %v2164_v28 = vrot.slane %v4147_v9, 5  ;;  %v4182_v32 = vcombine.low %v2155_v7, %v2158_v26  ;;  %v4159_v34 = vrot.slane %v4121_v17, 9  ;;  %3332 = vst.msk [vmem:[#allocation2 + $0x40] sm:$0xff] %vm3323_vm14, %v3292_v18  ;;  %v4275_v16 = vld [vmem:[%s4914_s30 + $0xbc] sm:$0x1]  ;;  %v4719_v18 = vld [vmem:[%s4914_s30 + $0xb4] sm:$0xff]  }
  0xdb   : > { %v1618_v31 = vsel %vm4966_vm5, %v1613_v23, %v1617_v61  ;;  %v4174_v33 = vcombine.low %v5561_v14, %v2102_v22  ;;  %v2162_v38 = vsel %vm4916_vm2, %v4167_v24, %v2161_v27  ;;  %v2163_v39 = vrot.slane %v2161_v27, 4 }
  0xdc   : > { %v3276_v62 = vpop.permute.xlu0 %3275  ;;  %v4095_v36 = vcombine.low %v1608_v19, %v1618_v31  ;;  %v2105_v40 = vrot.slane %v4122_v25, 5  ;;  %v2108_v42 = vrot.slane %v4123_v29, 5  ;;  %v2811_v45 = vshrl.u32 %v4270_v30, 16 }
  0xdd   : > { %v2814_v47 = vshll.u32 %v4270_v30, 16  ;;  %v2165_v49 = vsel %vm4916_vm2, %v2163_v39, %v2164_v28  ;;  %3324 = vst.msk [vmem:[#allocation2] sm:$0xff] %vm3323_vm14, %v3276_v62  ;;  %v2820_v53 = vshll.u32 %v4271_v35, 16  ;;  %v2824_v55 = vshrl.u32 %v4271_v35, 16  ;;  %v4718_v28 = vld [vmem:[%s4914_s30 + $0x48] sm:$0xff]  }
  0xde   : > { %2252 = vrot.lane.b32.xlu1 %v4182_v32, %s4828_s8  ;;  %1917 = vrot.lane.b32.xlu0 %v4095_v36, %s4827_s7  ;;  %v2106_v50 = vsel %vm4916_vm2, %v4159_v34, %v2105_v40  ;;  %v2107_v51 = vrot.slane %v2105_v40, 4  ;;  %v4183_v21 = vcombine.low %v2162_v38, %v2165_v49  ;;  %v2813_v37 = vrot.slane %v2811_v45, 4  ;;  %v4250_v38 = vld [vmem:[%s4914_s30 + $0x58] sm:$0xf]  ;;  %v4251_v45 = vld [vmem:[%s4914_s30 + $0x5c] sm:$0x1] }
  0xdf   : > { %v878_v52 = vpop.permute.xlu1 %877  ;;  %v2816_v54 = vrot.slane %v2814_v47, 5  ;;  %v2822_v46 = vrot.slane %v2820_v53, 5  ;;  %v2830_v56 = vshll.u32 %v4272_v41, 16  ;;  %v2619_v43 = vshrl.u32 %v4246_v48, 16 }
  0xe0   : > { %916 = vst.msk [vmem:[#allocation2 + $0x50] sm:$0xff] %vm905_vm7, %v878_v52  ;;  %v2109_v57 = vsel %vm4916_vm2, %v2107_v51, %v2108_v42  ;;  %v2826_v60 = vrot.slane %v2824_v55, 4  ;;  %v2622_v61 = vshll.u32 %v4246_v48, 16  ;;  %v2628_v3 = vshll.u32 %v4247_v11, 16  ;;  %v4720_v52 = vld [vmem:[%s4914_s30 + $0x54] sm:$0xff]  }
  0xe1   : > { %v4175_v20 = vcombine.low %v2106_v50, %v2109_v57  ;;  %v2817_v13 = vor.u32 %v2816_v54, %v2813_v37  ;;  %v2832_v1 = vrot.slane %v2830_v56, 5  ;;  %v2621_v2 = vrot.slane %v2619_v43, 4  ;;  %v3348_v27 = vld [vmem:[#allocation2 + $0x40] sm:$0xff]  ;;  %v4334_v55 = vld [vmem:[%s4914_s30 + $0xa8] sm:$0xe] }
  0xe2   : > { %2254 = vrot.lane.b32.xlu1 %v4183_v21, %s4828_s8  ;;  %2236 = vrot.lane.b32.xlu0 %v4174_v33, %s4828_s8  ;;  %v2632_v4 = vshrl.u32 %v4247_v11, 16  ;;  %v2827_v8 = vor.u32 %v2826_v60, %v2822_v46  ;;  %v2624_v9 = vrot.slane %v2622_v61, 5  ;;  %v2638_v10 = vshll.u32 %v4248_v58, 16  ;;  %v4249_v33 = vld [vmem:[%s4914_s30 + $0x54] sm:$0xf] }
  0xe3   : > { %v862_v44 = vpop.permute.xlu0 %861  ;;  %v3294_v6 = vpop.permute.xlu1 %3293  ;;  %v2818_v7 = vrot.slane %v2817_v13, 4  ;;  %v2630_v14 = vrot.slane %v2628_v3, 5  ;;  %v2835_v17 = vshrl.u32 %v4273_v63, 16  ;;  %v2838_v31 = vshll.u32 %v4273_v63, 16  ;;  %4604 = vmatprep.mubr.msk.bf16.mxu1 %vm3383_vm15, %v3348_v27  ;;  %v4335_v43 = vld [vmem:[%s4914_s30 + $0xac] sm:$0xf] }
  0xe4   : > { %908 = vst.msk [vmem:[#allocation2 + $0x10] sm:$0xff] %vm905_vm7, %v862_v44  ;;  %v2634_v15 = vrot.slane %v2632_v4, 4  ;;  %v2828_v23 = vrot.slane %v2827_v8, 4  ;;  %v2625_v24 = vor.u32 %v2624_v9, %v2621_v2  ;;  %v2640_v25 = vrot.slane %v2638_v10, 5  ;;  %v3340_v22 = vld [vmem:[#allocation2] sm:$0xff] }
  0xe5   : > { %3333 = vst.msk [vmem:[#allocation2 + $0x48] sm:$0xff] %vm3323_vm14, %v3294_v6  ;;  %v2823_v19 = vsel %vm4966_vm5, %v2818_v7, %v2822_v46  ;;  %4588 = vmatprep.mubr.msk.bf16.mxu0 %vm3383_vm15, %v3340_v22  ;;  %v2837_v30 = vrot.slane %v2835_v17, 4  ;;  %v2844_v32 = vshll.u32 %v4274_v12, 16  ;;  %v2848_v35 = vshrl.u32 %v4274_v12, 16  ;;  %v4310_v61 = vld [vmem:[%s4914_s30 + $0x48] sm:$0xe] }
  0xe6   : > { %2433 = vrot.lane.b32.xlu1 %v4717_v59, %s4829_s9  ;;  %2238 = vrot.lane.b32.xlu0 %v4175_v20, %s4828_s8  ;;  %v2635_v29 = vor.u32 %v2634_v15, %v2630_v14  ;;  %v2833_v34 = vsel %vm4966_vm5, %v2828_v23, %v2832_v1  ;;  %v2626_v62 = vrot.slane %v2625_v24, 4  ;;  %v2854_v36 = vshll.u32 %v4275_v16, 16  ;;  %v4727_v51 = vld [vmem:[%s6130_s1 + $0x10] ss:$0 sps:$4 sm:$0x33]  }
  0xe7   : > { %v3278_v26 = vpop.permute.xlu0 %3277  ;;  %v4294_v39 = vcombine.low %v2823_v19, %v2833_v34  ;;  %v2840_v41 = vrot.slane %v2838_v31, 5  ;;  %v2846_v42 = vrot.slane %v2844_v32, 5  ;;  %v2850_v48 = vrot.slane %v2848_v35, 4  ;;  %v4336_v20 = vld [vmem:[%s4914_s30 + $0xb0] sm:$0x1]  ;;  %4626 = vmatprep.subr.msk.bf16.mxu0 %vm3432_vm0, %v4727_v51  ;;  %4627 = vmatprep.subr.msk.bf16.mxu1 %vm3432_vm0, %v4727_v51 }
  0xe8   : > { %3325 = vst.msk [vmem:[#allocation2 + $0x8] sm:$0xff] %vm3323_vm14, %v3278_v26  ;;  %v2636_v40 = vrot.slane %v2635_v29, 4  ;;  %v2631_v47 = vsel %vm4966_vm5, %v2626_v62, %v2630_v14  ;;  %v2856_v49 = vrot.slane %v2854_v36, 5  ;;  %v2643_v50 = vshrl.u32 %v4249_v33, 16  ;;  %v4311_v4 = vld [vmem:[%s4914_s30 + $0x4c] sm:$0xf] }
  0xe9   : > { %v2841_v21 = vor.u32 %v2840_v41, %v2837_v30  ;;  %v2646_v37 = vshll.u32 %v4249_v33, 16  ;;  %v2652_v54 = vshll.u32 %v4250_v38, 16  ;;  %v2851_v57 = vor.u32 %v2850_v48, %v2846_v42  ;;  %v4312_v10 = vld [vmem:[%s4914_s30 + $0x50] sm:$0x1]  ;;  %v417_v19 = vld [vmem:[%s4914_s30 + $0xac] sm:$0xf] }
  0xea   : > { %2435 = vrot.lane.b32.xlu1 %v4719_v18, %s4829_s9  ;;  %2417 = vrot.lane.b32.xlu0 %v4718_v28, %s4829_s9  ;;  %v2641_v53 = vsel %vm4966_vm5, %v2636_v40, %v2640_v25  ;;  %v2645_v46 = vrot.slane %v2643_v50, 4  ;;  %v2656_v56 = vshrl.u32 %v4250_v38, 16  ;;  %v2662_v60 = vshll.u32 %v4251_v45, 16  ;;  %v416_v18 = vld [vmem:[%s4914_s30 + $0xa8] sm:$0xf] }
  0xeb   : > { %v4286_v11 = vcombine.low %v2631_v47, %v2641_v53  ;;  %v2842_v59 = vrot.slane %v2841_v21, 4  ;;  %v2648_v44 = vrot.slane %v2646_v37, 5  ;;  %v2654_v13 = vrot.slane %v2652_v54, 5  ;;  %v418_v33 = vld [vmem:[%s4914_s30 + $0xb0] sm:$0x1]  ;;  %v4740_v53 = vld [vmem:[%s4914_s30 + $0xa8] sm:$0xff]  }
  0xec   : > { %v2852_v63 = vrot.slane %v2851_v57, 4  ;;  %v2658_v1 = vrot.slane %v2656_v56, 4  ;;  %v4358_v3 = vrot.slane %v4334_v55, 9  ;;  %v2664_v8 = vrot.slane %v2662_v60, 5  ;;  %v3349_v27 = vld [vmem:[#allocation2 + $0x48] sm:$0xff]  ;;  %v4741_v56 = vld [vmem:[%s4914_s30 + $0x48] sm:$0xff]  }
  0xed   : > { %v880_v58 = vpop.permute.xlu1 %879  ;;  %v2847_v6 = vsel %vm4966_vm5, %v2842_v59, %v2846_v42  ;;  %v2649_v7 = vor.u32 %v2648_v44, %v2645_v46  ;;  %v3434_v9 = vsel %vm3432_vm0, %v4727_v51, 0  ;;  %v3201_v15 = vrot.slane %v4335_v43, 5  ;;  %v392_v34 = vld [vmem:[%s4914_s30 + $0x48] sm:$0xf]  ;;  %v393_v62 = vld [vmem:[%s4914_s30 + $0x4c] sm:$0xf] }
  0xee   : > { %917 = vst.msk [vmem:[#allocation2 + $0x58] sm:$0xff] %vm905_vm7, %v880_v58  ;;  %2978 = vrot.lane.b32.xlu1 %v4294_v39, %s4830_s10  ;;  %v864_v2 = vpop.permute.xlu0 %863  ;;  %2419 = vrot.lane.b32.xlu0 %v4720_v52, %s4829_s9  ;;  %v2857_v12 = vsel %vm4966_vm5, %v2852_v63, %v2856_v49  ;;  %v2659_v14 = vor.u32 %v2658_v1, %v2654_v13  ;;  %v3204_v16 = vrot.slane %v4336_v20, 5  ;;  %v4350_v25 = vrot.slane %v4310_v61, 9  ;;  %v394_v40 = vld [vmem:[%s4914_s30 + $0x50] sm:$0x1] }
  0xef   : > { %909 = vst.msk [vmem:[#allocation2 + $0x18] sm:$0xff] %vm905_vm7, %v864_v2  ;;  %4587 = vmatpush3.bf16.msra.mxu0 %v3434_v9  ;;  %v4295_v23 = vcombine.low %v2847_v6, %v2857_v12  ;;  %v2650_v24 = vrot.slane %v2649_v7, 4  ;;  %4625 = vmatpush3.bf16.msra.mxu1 %v3434_v9  ;;  %v3145_v26 = vrot.slane %v4311_v4, 5  ;;  %v3341_v22 = vld [vmem:[#allocation2 + $0x8] sm:$0xff]  ;;  %v3202_v29 = vsel %vm4916_vm2, %v4358_v3, %v3201_v15  ;;  %v4337_v57 = vld [vmem:[%s4914_s30 + $0xb4] sm:$0xe] }
  0xf0   : > { %v2660_v28 = vrot.slane %v2659_v14, 4  ;;  %v3203_v30 = vrot.slane %v3201_v15, 4  ;;  %v3148_v31 = vrot.slane %v4312_v10, 5  ;;  %v762_v39 = vshrl.u32 %v416_v18, 16  ;;  %v4338_v46 = vld [vmem:[%s4914_s30 + $0xb8] sm:$0xf] }
  0xf1   : > { %v1202_v17 = vpop.permute.xlu1 %1201  ;;  %v2655_v35 = vsel %vm4966_vm5, %v2650_v24, %v2654_v13  ;;  %v3146_v36 = vsel %vm4916_vm2, %v4350_v25, %v3145_v26  ;;  %v3147_v38 = vrot.slane %v3145_v26, 4  ;;  %v765_v45 = vshll.u32 %v416_v18, 16  ;;  %v4339_v44 = vld [vmem:[%s4914_s30 + $0xbc] sm:$0x1]  ;;  %372 = vst.msk [vmem:[#allocation2 + $0x70] sm:$0xff] %vm357_vm6, %v4740_v53  ;;  %364 = vst.msk [vmem:[#allocation2 + $0x30] sm:$0xff] %vm357_vm6, %v4741_v56 }
  0xf2   : > { %1240 = vst.msk [vmem:[#allocation2 + $0x50] sm:$0xff] %vm1229_vm8, %v1202_v17  ;;  %v1186_v32 = vpop.permute.xlu0 %1185  ;;  %2962 = vrot.lane.b32.xlu0 %v4286_v11, %s4830_s10  ;;  %2980 = vrot.lane.b32.xlu1 %v4295_v23, %s4830_s10  ;;  %v2665_v41 = vsel %vm4966_vm5, %v2660_v28, %v2664_v8  ;;  %v3205_v42 = vsel %vm4916_vm2, %v3203_v30, %v3204_v16  ;;  %v771_v47 = vshll.u32 %v417_v19, 16  ;;  %v764_v52 = vrot.slane %v762_v39, 4  ;;  %v4313_v1 = vld [vmem:[%s4914_s30 + $0x54] sm:$0xe] }
  0xf3   : > { %1232 = vst.msk [vmem:[#allocation2 + $0x10] sm:$0xff] %vm1229_vm8, %v1186_v32  ;;  %4589 = vmatmul.mubr.msk.bf16.vlgmr.msra.gmra.mrb[0].mxu0 %vm3383_vm15, %v3341_v22  ;;  %4605 = vmatmul.mubr.msk.bf16.vlgmr.msra.gmra.mrb[0].mxu1 %vm3383_vm15, %v3349_v27  ;;  %v4287_v49 = vcombine.low %v2655_v35, %v2665_v41  ;;  %v4374_v50 = vcombine.low %v3202_v29, %v3205_v42  ;;  %v767_v37 = vrot.slane %v765_v45, 5  ;;  %v775_v55 = vshrl.u32 %v417_v19, 16  ;;  %v4314_v8 = vld [vmem:[%s4914_s30 + $0x58] sm:$0xf] }
  0xf4   : > { %v3149_v51 = vsel %vm4916_vm2, %v3147_v38, %v3148_v31  ;;  %v773_v54 = vrot.slane %v771_v47, 5  ;;  %v781_v58 = vshll.u32 %v418_v33, 16  ;;  %v570_v43 = vshrl.u32 %v392_v34, 16  ;;  %v4315_v15 = vld [vmem:[%s4914_s30 + $0x5c] sm:$0x1]  ;;  %v4742_v39 = vld [vmem:[%s4914_s30 + $0xb4] sm:$0xff]  }
  0xf5   : > { %v1204_v48 = vpop.permute.xlu1 %1203  ;;  %v4366_v21 = vcombine.low %v3146_v36, %v3149_v51  ;;  %v573_v20 = vshll.u32 %v392_v34, 16  ;;  %v579_v59 = vshll.u32 %v393_v62, 16  ;;  %v768_v13 = vor.u32 %v767_v37, %v764_v52  ;;  %v419_v24 = vld [vmem:[%s4914_s30 + $0xb4] sm:$0xf]  ;;  %v420_v35 = vld [vmem:[%s4914_s30 + $0xb8] sm:$0xf] }
  0xf6   : > { %1241 = vst.msk [vmem:[#allocation2 + $0x58] sm:$0xff] %vm1229_vm8, %v1204_v48  ;;  %v1188_v11 = vpop.permute.xlu0 %1187  ;;  %2964 = vrot.lane.b32.xlu0 %v4287_v49, %s4830_s10  ;;  %3299 = vrot.lane.b32.xlu1 %v4374_v50, %s4831_s11  ;;  %v777_v60 = vrot.slane %v775_v55, 4  ;;  %v583_v61 = vshrl.u32 %v393_v62, 16  ;;  %v589_v63 = vshll.u32 %v394_v40, 16  ;;  %v783_v3 = vrot.slane %v781_v58, 5 }
  0xf7   : > { %1233 = vst.msk [vmem:[#allocation2 + $0x18] sm:$0xff] %vm1229_vm8, %v1188_v11  ;;  %v572_v4 = vrot.slane %v570_v43, 4  ;;  %v575_v6 = vrot.slane %v573_v20, 5  ;;  %v581_v7 = vrot.slane %v579_v59, 5  ;;  %v769_v9 = vrot.slane %v768_v13, 4 }
  0xf8   : > { %v778_v10 = vor.u32 %v777_v60, %v773_v54  ;;  %v585_v12 = vrot.slane %v583_v61, 4  ;;  %v591_v14 = vrot.slane %v589_v63, 5  ;;  %v4359_v18 = vrot.slane %v4337_v57, 9  ;;  %v421_v47 = vld [vmem:[%s4914_s30 + $0xbc] sm:$0x1]  ;;  %373 = vst.msk [vmem:[#allocation2 + $0x78] sm:$0xff] %vm357_vm6, %v4742_v39 }
  0xf9   : > { %v1383_v2 = vpop.permute.xlu1 %1382  ;;  %v576_v17 = vor.u32 %v575_v6, %v572_v4  ;;  %v3208_v19 = vrot.slane %v4338_v46, 5  ;;  %v3211_v23 = vrot.slane %v4339_v44, 5  ;;  %v774_v25 = vsel %vm4966_vm5, %v769_v9, %v773_v54  ;;  %v395_v48 = vld [vmem:[%s4914_s30 + $0x54] sm:$0xf]  ;;  %v396_v53 = vld [vmem:[%s4914_s30 + $0x58] sm:$0xf] }
  0xfa   : > { %1421 = vst.msk [vmem:[#allocation2 + $0x50] sm:$0xff] %vm1410_vm9, %v1383_v2  ;;  %v1367_v16 = vpop.permute.xlu0 %1366  ;;  %3283 = vrot.lane.b32.xlu0 %v4366_v21, %s4831_s11  ;;  %v779_v26 = vrot.slane %v778_v10, 4  ;;  %v586_v22 = vor.u32 %v585_v12, %v581_v7  ;;  %v4351_v27 = vrot.slane %v4313_v1, 9  ;;  %v3152_v32 = vrot.slane %v4314_v8, 5  ;;  %v397_v57 = vld [vmem:[%s4914_s30 + $0x5c] sm:$0x1] }
  0xfb   : > { %1413 = vst.msk [vmem:[#allocation2 + $0x10] sm:$0xff] %vm1410_vm9, %v1367_v16  ;;  %v577_v29 = vrot.slane %v576_v17, 4  ;;  %v3209_v30 = vsel %vm4916_vm2, %v4359_v18, %v3208_v19  ;;  %v3210_v31 = vrot.slane %v3208_v19, 4  ;;  %v3155_v62 = vrot.slane %v4315_v15, 5  ;;  %v4743_v46 = vld [vmem:[%s4914_s30 + $0x54] sm:$0xff]  }
  0xfc   : > { %v784_v33 = vsel %vm4966_vm5, %v779_v26, %v783_v3  ;;  %v587_v34 = vrot.slane %v586_v22, 4  ;;  %v786_v36 = vshrl.u32 %v419_v24, 16  ;;  %v3153_v45 = vsel %vm4916_vm2, %v4351_v27, %v3152_v32  ;;  %v964_v59 = vld [vmem:[%s4914_s30 + $0xa8] sm:$0xe]  ;;  %v965_v1 = vld [vmem:[%s4914_s30 + $0xac] sm:$0xf] }
  0xfd   : > { %v1385_v28 = vpop.permute.xlu1 %1384  ;;  %v3960_v40 = vcombine.low %v774_v25, %v784_v33  ;;  %v582_v41 = vsel %vm4966_vm5, %v577_v29, %v581_v7  ;;  %v3212_v42 = vsel %vm4916_vm2, %v3210_v31, %v3211_v23  ;;  %v3154_v51 = vrot.slane %v3152_v32, 4  ;;  %365 = vst.msk [vmem:[#allocation2 + $0x38] sm:$0xff] %vm357_vm6, %v4743_v46  ;;  %v966_v7 = vld [vmem:[%s4914_s30 + $0xb0] sm:$0x1]  ;;  %v940_v15 = vld [vmem:[%s4914_s30 + $0x48] sm:$0xe] }
  0xfe   : > { %1422 = vst.msk [vmem:[#allocation2 + $0x58] sm:$0xff] %vm1410_vm9, %v1385_v28  ;;  %v1369_v38 = vpop.permute.xlu0 %1368  ;;  %v592_v49 = vsel %vm4966_vm5, %v587_v34, %v591_v14  ;;  %v4375_v50 = vcombine.low %v3209_v30, %v3212_v42  ;;  %v788_v52 = vrot.slane %v786_v36, 4  ;;  %v789_v54 = vshll.u32 %v419_v24, 16  ;;  %v941_v16 = vld [vmem:[%s4914_s30 + $0x4c] sm:$0xf] }
  0xff   : > { %1414 = vst.msk [vmem:[#allocation2 + $0x18] sm:$0xff] %vm1410_vm9, %v1369_v38  ;;  %885 = vrot.lane.b32.xlu1 %v3960_v40, %s4826_s6  ;;  %v3952_v37 = vcombine.low %v582_v41, %v592_v49  ;;  %v795_v55 = vshll.u32 %v420_v35, 16  ;;  %v799_v11 = vshrl.u32 %v420_v35, 16  ;;  %v3156_v56 = vsel %vm4916_vm2, %v3154_v51, %v3155_v62  ;;  %v942_v24 = vld [vmem:[%s4914_s30 + $0x50] sm:$0x1] }
 0x100   : > { %v805_v58 = vshll.u32 %v421_v47, 16  ;;  %v594_v43 = vshrl.u32 %v395_v48, 16  ;;  %v597_v20 = vshll.u32 %v395_v48, 16  ;;  %v4367_v13 = vcombine.low %v3153_v45, %v3156_v56  ;;  %v967_v25 = vld [vmem:[%s4914_s30 + $0xb4] sm:$0xe] }
 0x101   : > { %v1928_v21 = vpop.permute.xlu1 %1927  ;;  %869 = vrot.lane.b32.xlu0 %v3952_v37, %s4826_s6  ;;  %v791_v60 = vrot.slane %v789_v54, 5  ;;  %v797_v61 = vrot.slane %v795_v55, 5  ;;  %v801_v63 = vrot.slane %v799_v11, 4  ;;  %v603_v6 = vshll.u32 %v396_v53, 16  ;;  %v968_v29 = vld [vmem:[%s4914_s30 + $0xb8] sm:$0xf] }
 0x102   : > { %1966 = vst.msk [vmem:[#allocation2 + $0x50] sm:$0xff] %vm1955_vm10, %v1928_v21  ;;  %v1912_v44 = vpop.permute.xlu0 %1911  ;;  %v807_v2 = vrot.slane %v805_v58, 5  ;;  %v596_v3 = vrot.slane %v594_v43, 4  ;;  %v599_v4 = vrot.slane %v597_v20, 5  ;;  %v607_v12 = vshrl.u32 %v396_v53, 16 }
 0x103   : > { %1958 = vst.msk [vmem:[#allocation2 + $0x10] sm:$0xff] %vm1955_vm10, %v1912_v44  ;;  %3301 = vrot.lane.b32.xlu1 %v4375_v50, %s4831_s11  ;;  %v792_v9 = vor.u32 %v791_v60, %v788_v52  ;;  %v802_v10 = vor.u32 %v801_v63, %v797_v61  ;;  %v613_v14 = vshll.u32 %v397_v57, 16  ;;  %v605_v18 = vrot.slane %v603_v6, 5  ;;  %v969_v30 = vld [vmem:[%s4914_s30 + $0xbc] sm:$0x1] }
 0x104   : > { %v600_v17 = vor.u32 %v599_v4, %v596_v3  ;;  %v3976_v19 = vrot.slane %v964_v59, 9  ;;  %v1121_v23 = vrot.slane %v965_v1, 5  ;;  %v609_v27 = vrot.slane %v607_v12, 4  ;;  %v943_v62 = vld [vmem:[%s4914_s30 + $0x54] sm:$0xe] }
 0x105   : > { %v1930_v8 = vpop.permute.xlu1 %1929  ;;  %3285 = vrot.lane.b32.xlu0 %v4367_v13, %s4831_s11  ;;  %v793_v26 = vrot.slane %v792_v9, 4  ;;  %v803_v22 = vrot.slane %v802_v10, 4  ;;  %v615_v28 = vrot.slane %v613_v14, 5  ;;  %v1124_v34 = vrot.slane %v966_v7, 5  ;;  %v944_v35 = vld [vmem:[%s4914_s30 + $0x58] sm:$0xf] }
 0x106   : > { %1967 = vst.msk [vmem:[#allocation2 + $0x58] sm:$0xff] %vm1955_vm10, %v1930_v8  ;;  %v601_v31 = vrot.slane %v600_v17, 4  ;;  %v1122_v32 = vsel %vm4916_vm2, %v3976_v19, %v1121_v23  ;;  %v1123_v33 = vrot.slane %v1121_v23, 4  ;;  %v610_v41 = vor.u32 %v609_v27, %v605_v18  ;;  %v945_v45 = vld [vmem:[%s4914_s30 + $0x5c] sm:$0x1] }
 0x107   : > { %v798_v39 = vsel %vm4966_vm5, %v793_v26, %v797_v61  ;;  %v808_v40 = vsel %vm4966_vm5, %v803_v22, %v807_v2  ;;  %v3968_v42 = vrot.slane %v940_v15, 9  ;;  %v1065_v50 = vrot.slane %v941_v16, 5  ;;  %v4084_v51 = vld [vmem:[%s4914_s30 + $0xb4] sm:$0xf]  ;;  %v4085_v54 = vld [vmem:[%s4914_s30 + $0xb8] sm:$0xf] }
 0x108   : > { %v1914_v36 = vpop.permute.xlu0 %1913  ;;  %v3961_v47 = vcombine.low %v798_v39, %v808_v40  ;;  %v606_v48 = vsel %vm4966_vm5, %v601_v31, %v605_v18  ;;  %v1125_v49 = vsel %vm4916_vm2, %v1123_v33, %v1124_v34  ;;  %v611_v52 = vrot.slane %v610_v41, 4  ;;  %v4086_v43 = vld [vmem:[%s4914_s30 + $0xbc] sm:$0x1]  ;;  %v4060_v2 = vld [vmem:[%s4914_s30 + $0x54] sm:$0xf] }
 0x109   : > { %v2249_v38 = vpop.permute.xlu1 %2248  ;;  %1959 = vst.msk [vmem:[#allocation2 + $0x18] sm:$0xff] %vm1955_vm10, %v1914_v36  ;;  %v3992_v53 = vcombine.low %v1122_v32, %v1125_v49  ;;  %v1068_v21 = vrot.slane %v942_v24, 5  ;;  %v3977_v37 = vrot.slane %v967_v25, 9  ;;  %v1066_v55 = vsel %vm4916_vm2, %v3968_v42, %v1065_v50  ;;  %v4061_v3 = vld [vmem:[%s4914_s30 + $0x58] sm:$0xf] }
 0x10a   : > { %2287 = vst.msk [vmem:[#allocation2 + $0x50] sm:$0xff] %vm2276_vm11, %v2249_v38  ;;  %887 = vrot.lane.b32.xlu1 %v3961_v47, %s4826_s6  ;;  %v1067_v11 = vrot.slane %v1065_v50, 4  ;;  %v1128_v57 = vrot.slane %v968_v29, 5  ;;  %v1131_v46 = vrot.slane %v969_v30, 5  ;;  %v616_v20 = vsel %vm4966_vm5, %v611_v52, %v615_v28  ;;  %v4062_v24 = vld [vmem:[%s4914_s30 + $0x5c] sm:$0x1] }
 0x10b   : > { %v3969_v59 = vrot.slane %v943_v62, 9  ;;  %v1072_v44 = vrot.slane %v944_v35, 5  ;;  %v1075_v13 = vrot.slane %v945_v45, 5  ;;  %v3953_v60 = vcombine.low %v606_v48, %v616_v20  ;;  %v4087_v28 = vld [vmem:[%s4914_s30 + $0xc0] sm:$0xf]  ;;  %v4728_v33 = vld [vmem:[%s4914_s30 + $0xb4] sm:$0xff]  }
 0x10c   : > { %v2233_v56 = vpop.permute.xlu0 %2232  ;;  %v1069_v61 = vsel %vm4916_vm2, %v1067_v11, %v1068_v21  ;;  %v1129_v63 = vsel %vm4916_vm2, %v3977_v37, %v1128_v57  ;;  %v1130_v1 = vrot.slane %v1128_v57, 4  ;;  %v1812_v8 = vshrl.u32 %v4084_v51, 16  ;;  %v4088_v39 = vld [vmem:[%s4914_s30 + $0xc4] sm:$0xf]  ;;  %v4089_v52 = vld [vmem:[%s4914_s30 + $0xc8] sm:$0x1] }
 0x10d   : > { %v2251_v58 = vpop.permute.xlu1 %2250  ;;  %2279 = vst.msk [vmem:[#allocation2 + $0x10] sm:$0xff] %vm2276_vm11, %v2233_v56  ;;  %v3984_v4 = vcombine.low %v1066_v55, %v1069_v61  ;;  %v1073_v6 = vsel %vm4916_vm2, %v3969_v59, %v1072_v44  ;;  %v1074_v7 = vrot.slane %v1072_v44, 4  ;;  %871 = vrot.lane.b32.xlu0 %v3953_v60, %s4826_s6  ;;  %v1815_v12 = vshll.u32 %v4084_v51, 16  ;;  %v4063_v11 = vld [vmem:[%s4914_s30 + $0x60] sm:$0xf] }
 0x10e   : > { %2288 = vst.msk [vmem:[#allocation2 + $0x58] sm:$0xff] %vm2276_vm11, %v2251_v58  ;;  %1209 = vrot.lane.b32.xlu1 %v3992_v53, %s4825_s5  ;;  %v1132_v9 = vsel %vm4916_vm2, %v1130_v1, %v1131_v46  ;;  %v1821_v14 = vshll.u32 %v4085_v54, 16  ;;  %v1825_v15 = vshrl.u32 %v4085_v54, 16  ;;  %v1814_v19 = vrot.slane %v1812_v8, 4  ;;  %v4729_v53 = vld [vmem:[%s4914_s30 + $0x54] sm:$0xff]   ;;  %v4730_v57 = vld [vmem:[%s4914_s30 + $0xc0] sm:$0xff]  }
 0x10f   : > { %v3993_v17 = vcombine.low %v1129_v63, %v1132_v9  ;;  %v1076_v18 = vsel %vm4916_vm2, %v1074_v7, %v1075_v13  ;;  %v1831_v23 = vshll.u32 %v4086_v43, 16  ;;  %v1817_v26 = vrot.slane %v1815_v12, 5  ;;  %v4064_v20 = vld [vmem:[%s4914_s30 + $0x64] sm:$0xf]  ;;  %v4065_v1 = vld [vmem:[%s4914_s30 + $0x68] sm:$0x1] }
 0x110   : > { %v2235_v10 = vpop.permute.xlu0 %2234  ;;  %v3985_v25 = vcombine.low %v1073_v6, %v1076_v18  ;;  %v1823_v22 = vrot.slane %v1821_v14, 5  ;;  %v1827_v27 = vrot.slane %v1825_v15, 4  ;;  %v1620_v30 = vshrl.u32 %v4060_v2, 16  ;;  %v4149_v9 = vld [vmem:[%s4914_s30 + $0xb8] sm:$0xf] }
 0x111   : > { %v2430_v16 = vpop.permute.xlu1 %2429  ;;  %2280 = vst.msk [vmem:[#allocation2 + $0x18] sm:$0xff] %vm2276_vm11, %v2235_v10  ;;  %v1833_v29 = vrot.slane %v1831_v23, 5  ;;  %v1623_v31 = vshll.u32 %v4060_v2, 16  ;;  %v1629_v32 = vshll.u32 %v4061_v3, 16  ;;  %1193 = vrot.lane.b32.xlu0 %v3984_v4, %s4825_s5  ;;  %v1818_v34 = vor.u32 %v1817_v26, %v1814_v19  ;;  %v4148_v2 = vld [vmem:[%s4914_s30 + $0xb4] sm:$0xe] }
 0x112   : > { %2468 = vst.msk [vmem:[#allocation2 + $0x50] sm:$0xff] %vm2457_vm12, %v2430_v16  ;;  %1211 = vrot.lane.b32.xlu1 %v3993_v17, %s4825_s5  ;;  %v1828_v62 = vor.u32 %v1827_v27, %v1823_v22  ;;  %v1633_v35 = vshrl.u32 %v4061_v3, 16  ;;  %v1639_v36 = vshll.u32 %v4062_v24, 16  ;;  %v1622_v41 = vrot.slane %v1620_v30, 4  ;;  %v4731_v3 = vld [vmem:[%s4914_s30 + $0x60] sm:$0xff]  }
 0x113   : > { %v1625_v42 = vrot.slane %v1623_v31, 5  ;;  %v1631_v45 = vrot.slane %v1629_v32, 5  ;;  %v1836_v47 = vshrl.u32 %v4087_v28, 16  ;;  %v1819_v48 = vrot.slane %v1818_v34, 4  ;;  %v4150_v10 = vld [vmem:[%s4914_s30 + $0xbc] sm:$0x1] }
 0x114   : > { %v2414_v38 = vpop.permute.xlu0 %2413  ;;  %v1829_v49 = vrot.slane %v1828_v62, 4  ;;  %v1635_v50 = vrot.slane %v1633_v35, 4  ;;  %v1641_v51 = vrot.slane %v1639_v36, 5  ;;  %v1839_v54 = vshll.u32 %v4087_v28, 16  ;;  %v4124_v17 = vld [vmem:[%s4914_s30 + $0x54] sm:$0xe] }
 0x115   : > { %v2432_v40 = vpop.permute.xlu1 %2431  ;;  %2460 = vst.msk [vmem:[#allocation2 + $0x10] sm:$0xff] %vm2457_vm12, %v2414_v38  ;;  %v1626_v21 = vor.u32 %v1625_v42, %v1622_v41  ;;  %v1838_v37 = vrot.slane %v1836_v47, 4  ;;  %v1845_v55 = vshll.u32 %v4088_v39, 16  ;;  %1195 = vrot.lane.b32.xlu0 %v3985_v25, %s4825_s5  ;;  %v1824_v46 = vsel %vm4966_vm5, %v1819_v48, %v1823_v22  ;;  %v4125_v30 = vld [vmem:[%s4914_s30 + $0x58] sm:$0xf] }
 0x116   : > { %2469 = vst.msk [vmem:[#allocation2 + $0x58] sm:$0xff] %vm2457_vm12, %v2432_v40  ;;  %1390 = vrot.lane.b32.xlu1 %v4728_v33, %s4824_s4  ;;  %v1834_v56 = vsel %vm4966_vm5, %v1829_v49, %v1833_v29  ;;  %v1636_v58 = vor.u32 %v1635_v50, %v1631_v45  ;;  %v1849_v43 = vshrl.u32 %v4088_v39, 16  ;;  %v1841_v61 = vrot.slane %v1839_v54, 5  ;;  %v4126_v62 = vld [vmem:[%s4914_s30 + $0x5c] sm:$0x1] }
 0x117   : > { %v4104_v13 = vcombine.low %v1824_v46, %v1834_v56  ;;  %v1627_v60 = vrot.slane %v1626_v21, 4  ;;  %v1847_v63 = vrot.slane %v1845_v55, 5  ;;  %v1855_v7 = vshll.u32 %v4089_v52, 16  ;;  %v4151_v40 = vld [vmem:[%s4914_s30 + $0xc0] sm:$0xe] }
 0x118   : > { %v2416_v59 = vpop.permute.xlu0 %2415  ;;  %v1637_v4 = vrot.slane %v1636_v58, 4  ;;  %v1851_v6 = vrot.slane %v1849_v43, 4  ;;  %v1644_v8 = vshrl.u32 %v4063_v11, 16  ;;  %v1842_v14 = vor.u32 %v1841_v61, %v1838_v37  ;;  %v4152_v41 = vld [vmem:[%s4914_s30 + $0xc4] sm:$0xf] }
 0x119   : > { %v2975_v44 = vpop.permute.xlu1 %2974  ;;  %2461 = vst.msk [vmem:[#allocation2 + $0x18] sm:$0xff] %vm2457_vm12, %v2416_v59  ;;  %v1632_v12 = vsel %vm4966_vm5, %v1627_v60, %v1631_v45  ;;  %v1647_v15 = vshll.u32 %v4063_v11, 16  ;;  %v1653_v16 = vshll.u32 %v4064_v20, 16  ;;  %1374 = vrot.lane.b32.xlu0 %v4729_v53, %s4824_s4  ;;  %v1857_v23 = vrot.slane %v1855_v7, 5  ;;  %v4153_v49 = vld [vmem:[%s4914_s30 + $0xc8] sm:$0x1] }
 0x11a   : > { %3013 = vst.msk [vmem:[#allocation2 + $0x50] sm:$0xff] %vm3002_vm13, %v2975_v44  ;;  %1392 = vrot.lane.b32.xlu1 %v4730_v57, %s4824_s4  ;;  %v1642_v18 = vsel %vm4966_vm5, %v1637_v4, %v1641_v51  ;;  %v1852_v19 = vor.u32 %v1851_v6, %v1847_v63  ;;  %v1646_v24 = vrot.slane %v1644_v8, 4  ;;  %v1843_v27 = vrot.slane %v1842_v14, 4  ;;  %v4127_v54 = vld [vmem:[%s4914_s30 + $0x60] sm:$0xe] }
 0x11b   : > { %v4096_v22 = vcombine.low %v1632_v12, %v1642_v18  ;;  %v1649_v28 = vrot.slane %v1647_v15, 5  ;;  %v5805_v29 = vrot.slane %v1653_v16, 5  ;;  %v1657_v32 = vshrl.u32 %v4064_v20, 16  ;;  %v4128_v56 = vld [vmem:[%s4914_s30 + $0x64] sm:$0xf] }
 0x11c   : > { %v2959_v25 = vpop.permute.xlu0 %2958  ;;  %v1853_v31 = vrot.slane %v1852_v19, 4  ;;  %v1663_v33 = vshll.u32 %v4065_v1, 16  ;;  %v4168_v34 = vrot.slane %v4148_v2, 9  ;;  %v1848_v35 = vsel %vm4966_vm5, %v1843_v27, %v1847_v63  ;;  %v4129_v44 = vld [vmem:[%s4914_s30 + $0x68] sm:$0x1] }
 0x11d   : > { %v2977_v26 = vpop.permute.xlu1 %2976  ;;  %3005 = vst.msk [vmem:[#allocation2 + $0x10] sm:$0xff] %vm3002_vm13, %v2959_v25  ;;  %v1650_v36 = vor.u32 %v1649_v28, %v1646_v24  ;;  %v2168_v38 = vrot.slane %v4149_v9, 5  ;;  %v2171_v39 = vrot.slane %v4150_v10, 5  ;;  %1376 = vrot.lane.b32.xlu0 %v4731_v3, %s4824_s4  ;;  %v1659_v45 = vrot.slane %v1657_v32, 4  ;;  %v4277_v3 = vld [vmem:[%s4914_s30 + $0xc4] sm:$0xf] }
 0x11e   : > { %3014 = vst.msk [vmem:[#allocation2 + $0x58] sm:$0xff] %vm3002_vm13, %v2977_v26  ;;  %1935 = vrot.lane.b32.xlu1 %v4104_v13, %s4827_s7  ;;  %v1858_v42 = vsel %vm4966_vm5, %v1853_v31, %v1857_v23  ;;  %v1665_v47 = vrot.slane %v1663_v33, 5  ;;  %v4160_v48 = vrot.slane %v4124_v17, 9  ;;  %v2112_v11 = vrot.slane %v4125_v30, 5  ;;  %v4276_v13 = vld [vmem:[%s4914_s30 + $0xc0] sm:$0xf] }
 0x11f   : > { %v4105_v52 = vcombine.low %v1848_v35, %v1858_v42  ;;  %v1651_v53 = vrot.slane %v1650_v36, 4  ;;  %v2169_v21 = vsel %vm4916_vm2, %v4168_v34, %v2168_v38  ;;  %v2170_v37 = vrot.slane %v2168_v38, 4  ;;  %v4278_v4 = vld [vmem:[%s4914_s30 + $0xc8] sm:$0x1]  ;;  %v4252_v6 = vld [vmem:[%s4914_s30 + $0x60] sm:$0xf] }
 0x120   : > { %v2961_v50 = vpop.permute.xlu0 %2960  ;;  %v1660_v55 = vor.u32 %v1659_v45, %v5805_v29  ;;  %v2115_v57 = vrot.slane %v4126_v62, 5  ;;  %v4169_v46 = vrot.slane %v4151_v40, 9  ;;  %v2175_v20 = vrot.slane %v4152_v41, 5  ;;  %v4253_v12 = vld [vmem:[%s4914_s30 + $0x64] sm:$0xf] }
 0x121   : > { %v3296_v51 = vpop.permute.xlu1 %3295  ;;  %3006 = vst.msk [vmem:[#allocation2 + $0x18] sm:$0xff] %vm3002_vm13, %v2961_v50  ;;  %v1656_v58 = vsel %vm4966_vm5, %v1651_v53, %v5805_v29  ;;  %v2172_v43 = vsel %vm4916_vm2, %v2170_v37, %v2171_v39  ;;  %v2178_v59 = vrot.slane %v4153_v49, 5  ;;  %1919 = vrot.lane.b32.xlu0 %v4096_v22, %s4827_s7  ;;  %v2113_v63 = vsel %vm4916_vm2, %v4160_v48, %v2112_v11  ;;  %v4254_v29 = vld [vmem:[%s4914_s30 + $0x68] sm:$0x1]  ;;  %v4279_v40 = vld [vmem:[%s4914_s30 + $0xcc] sm:$0xf] }
 0x122   : > { %3334 = vst.msk [vmem:[#allocation2 + $0x50] sm:$0xff] %vm3323_vm14, %v3296_v51  ;;  %1937 = vrot.lane.b32.xlu1 %v4105_v52, %s4827_s7  ;;  %v1661_v60 = vrot.slane %v1660_v55, 4  ;;  %v4184_v61 = vcombine.low %v2169_v21, %v2172_v43  ;;  %v2114_v1 = vrot.slane %v2112_v11, 4  ;;  %v2176_v7 = vsel %vm4916_vm2, %v4169_v46, %v2175_v20  ;;  %v4280_v48 = vld [vmem:[%s4914_s30 + $0xd0] sm:$0xf]  ;;  %v4732_v49 = vld [vmem:[%s4914_s30 + $0xc0] sm:$0xff]  }
 0x123   : > { %v2177_v8 = vrot.slane %v2175_v20, 4  ;;  %v4161_v9 = vrot.slane %v4127_v54, 9  ;;  %v2119_v10 = vrot.slane %v4128_v56, 5  ;;  %v2122_v16 = vrot.slane %v4129_v44, 5  ;;  %v4281_v43 = vld [vmem:[%s4914_s30 + $0xd4] sm:$0x1] }
 0x124   : > { %v3280_v2 = vpop.permute.xlu0 %3279  ;;  %v1666_v14 = vsel %vm4966_vm5, %v1661_v60, %v1665_v47  ;;  %v2116_v15 = vsel %vm4916_vm2, %v2114_v1, %v2115_v57  ;;  %v2859_v17 = vshrl.u32 %v4276_v13, 16  ;;  %v2862_v28 = vshll.u32 %v4276_v13, 16  ;;  %v4734_v1 = vld [vmem:[%s4914_s30 + $0xcc] sm:$0xff]  }
 0x125   : > { %3326 = vst.msk [vmem:[#allocation2 + $0x10] sm:$0xff] %vm3323_vm14, %v3280_v2  ;;  %v4097_v18 = vcombine.low %v1656_v58, %v1666_v14  ;;  %v4176_v19 = vcombine.low %v2113_v63, %v2116_v15  ;;  %v2179_v23 = vsel %vm4916_vm2, %v2177_v8, %v2178_v59  ;;  %v2120_v24 = vsel %vm4916_vm2, %v4161_v9, %v2119_v10  ;;  %v4255_v63 = vld [vmem:[%s4914_s30 + $0x6c] sm:$0xf]  ;;  %v4256_v14 = vld [vmem:[%s4914_s30 + $0x70] sm:$0xf] }
 0x126   : > { %2256 = vrot.lane.b32.xlu1 %v4184_v61, %s4828_s8  ;;  %v4185_v25 = vcombine.low %v2176_v7, %v2179_v23  ;;  %v2121_v26 = vrot.slane %v2119_v10, 4  ;;  %v2861_v27 = vrot.slane %v2859_v17, 4  ;;  %v2868_v31 = vshll.u32 %v4277_v3, 16  ;;  %v4733_v7 = vld [vmem:[%s4914_s30 + $0x60] sm:$0xff]  }
 0x127   : > { %1921 = vrot.lane.b32.xlu0 %v4097_v18, %s4827_s7  ;;  %v2872_v32 = vshrl.u32 %v4277_v3, 16  ;;  %v2878_v33 = vshll.u32 %v4278_v4, 16  ;;  %v2667_v34 = vshrl.u32 %v4252_v6, 16  ;;  %v2864_v36 = vrot.slane %v2862_v28, 5  ;;  %v4257_v18 = vld [vmem:[%s4914_s30 + $0x74] sm:$0x1] }
 0x128   : > { %v882_v22 = vpop.permute.xlu1 %881  ;;  %v2123_v62 = vsel %vm4916_vm2, %v2121_v26, %v2122_v16  ;;  %v2670_v38 = vshll.u32 %v4252_v6, 16  ;;  %v2676_v39 = vshll.u32 %v4253_v12, 16  ;;  %v2870_v42 = vrot.slane %v2868_v31, 5  ;;  %v4340_v23 = vld [vmem:[%s4914_s30 + $0xc0] sm:$0xe]  ;;  %s4467_s7 = sshll.u32 %s4814_s15, 11 }
 0x129   : > { %v3350_v30 = vld [vmem:[#allocation2 + $0x50] sm:$0xff]  ;;  %918 = vst.msk [vmem:[#allocation2 + $0x60] sm:$0xff] %vm905_vm7, %v882_v22  ;;  %v4177_v41 = vcombine.low %v2120_v24, %v2123_v62  ;;  %v2874_v45 = vrot.slane %v2872_v32, 4  ;;  %v2880_v47 = vrot.slane %v2878_v33, 5  ;;  %v2865_v50 = vor.u32 %v2864_v36, %v2861_v27  ;;  %v4342_v28 = vld [vmem:[%s4914_s30 + $0xc8] sm:$0x1] }
 0x12a   : > { %4608 = vmatprep.mubr.msk.bf16.mxu1 %vm3383_vm15, %v3350_v30  ;;  %v866_v35 = vpop.permute.xlu0 %865  ;;  %2258 = vrot.lane.b32.xlu1 %v4185_v25, %s4828_s8  ;;  %v2669_v51 = vrot.slane %v2667_v34, 4  ;;  %v2672_v52 = vrot.slane %v2670_v38, 5  ;;  %v5865_v53 = vrot.slane %v2676_v39, 5  ;;  %v2680_v55 = vshrl.u32 %v4253_v12, 16  ;;  %v4341_v27 = vld [vmem:[%s4914_s30 + $0xc4] sm:$0xf] }
 0x12b   : > { %910 = vst.msk [vmem:[#allocation2 + $0x20] sm:$0xff] %vm905_vm7, %v866_v35  ;;  %2240 = vrot.lane.b32.xlu0 %v4176_v19, %s4828_s8  ;;  %v2875_v54 = vor.u32 %v2874_v45, %v2870_v42  ;;  %v2686_v11 = vshll.u32 %v4254_v29, 16  ;;  %v2883_v57 = vshrl.u32 %v4279_v40, 16  ;;  %v2866_v46 = vrot.slane %v2865_v50, 4  ;;  %v4735_v29 = vld [vmem:[%s4914_s30 + $0x6c] sm:$0xff]  }
 0x12c   : > { %v3298_v21 = vpop.permute.xlu1 %3297  ;;  %v3342_v37 = vld [vmem:[#allocation2 + $0x10] sm:$0xff]  ;;  %v2673_v56 = vor.u32 %v2672_v52, %v2669_v51  ;;  %v2886_v20 = vshll.u32 %v4279_v40, 16  ;;  %v2892_v59 = vshll.u32 %v4280_v48, 16  ;;  %v2682_v13 = vrot.slane %v2680_v55, 4 }
 0x12d   : > { %3335 = vst.msk [vmem:[#allocation2 + $0x58] sm:$0xff] %vm3323_vm14, %v3298_v21  ;;  %4592 = vmatprep.mubr.msk.bf16.mxu0 %vm3383_vm15, %v3342_v37  ;;  %v2876_v44 = vrot.slane %v2875_v54, 4  ;;  %v2688_v60 = vrot.slane %v2686_v11, 5  ;;  %v2885_v61 = vrot.slane %v2883_v57, 4  ;;  %v2871_v2 = vsel %vm4966_vm5, %v2866_v46, %v2870_v42  ;;  %v4316_v40 = vld [vmem:[%s4914_s30 + $0x60] sm:$0xe] }
 0x12e   : > { %v3282_v58 = vpop.permute.xlu0 %3281  ;;  %2437 = vrot.lane.b32.xlu1 %v4732_v49, %s4829_s9  ;;  %v2674_v3 = vrot.slane %v2673_v56, 4  ;;  %v2888_v4 = vrot.slane %v2886_v20, 5  ;;  %v5877_v6 = vrot.slane %v2892_v59, 5  ;;  %v2683_v9 = vor.u32 %v2682_v13, %v5865_v53  ;;  %v4318_v49 = vld [vmem:[%s4914_s30 + $0x68] sm:$0x1] }
 0x12f   : > { %3327 = vst.msk [vmem:[#allocation2 + $0x18] sm:$0xff] %vm3323_vm14, %v3282_v58  ;;  %2242 = vrot.lane.b32.xlu0 %v4177_v41, %s4828_s8  ;;  %v2881_v8 = vsel %vm4966_vm5, %v2876_v44, %v2880_v47  ;;  %v2896_v10 = vshrl.u32 %v4280_v48, 16  ;;  %v2902_v12 = vshll.u32 %v4281_v43, 16  ;;  %v2691_v19 = vshrl.u32 %v4255_v63, 16  ;;  %v4317_v41 = vld [vmem:[%s4914_s30 + $0x64] sm:$0xf] }
 0x130   : > { %v4296_v15 = vcombine.low %v2871_v2, %v2881_v8  ;;  %v2679_v16 = vsel %vm4966_vm5, %v2674_v3, %v5865_v53  ;;  %v2889_v17 = vor.u32 %v2888_v4, %v2885_v61  ;;  %v2684_v24 = vrot.slane %v2683_v9, 4  ;;  %v4343_v54 = vld [vmem:[%s4914_s30 + $0xcc] sm:$0xe]  ;;  %v4344_v58 = vld [vmem:[%s4914_s30 + $0xd0] sm:$0xf] }
 0x131   : > { %v2898_v25 = vrot.slane %v2896_v10, 4  ;;  %v2904_v26 = vrot.slane %v2902_v12, 5  ;;  %v2694_v22 = vshll.u32 %v4255_v63, 16  ;;  %v2693_v31 = vrot.slane %v2691_v19, 4  ;;  %v4345_v13 = vld [vmem:[%s4914_s30 + $0xd4] sm:$0x1] }
 0x132   : > { %2439 = vrot.lane.b32.xlu1 %v4734_v1, %s4829_s9  ;;  %v2890_v30 = vrot.slane %v2889_v17, 4  ;;  %v2700_v32 = vshll.u32 %v4256_v14, 16  ;;  %v2704_v33 = vshrl.u32 %v4256_v14, 16  ;;  %v2689_v35 = vsel %vm4966_vm5, %v2684_v24, %v2688_v60  ;;  %v4320_v8 = vld [vmem:[%s4914_s30 + $0x70] sm:$0xf] }
 0x133   : > { %2421 = vrot.lane.b32.xlu0 %v4733_v7, %s4829_s9  ;;  %v2899_v36 = vor.u32 %v2898_v25, %v5877_v6  ;;  %v2696_v38 = vrot.slane %v2694_v22, 5  ;;  %v2710_v39 = vshll.u32 %v4257_v18, 16  ;;  %v4288_v42 = vcombine.low %v2679_v16, %v2689_v35  ;;  %v4319_v7 = vld [vmem:[%s4914_s30 + $0x6c] sm:$0xe] }
 0x134   : > { %v884_v34 = vpop.permute.xlu1 %883  ;;  %v3351_v62 = vld [vmem:[#allocation2 + $0x58] sm:$0xff]  ;;  %v2895_v45 = vsel %vm4966_vm5, %v2890_v30, %v5877_v6  ;;  %v2702_v47 = vrot.slane %v2700_v32, 5  ;;  %v2706_v48 = vrot.slane %v2704_v33, 4  ;;  %v4360_v37 = vrot.slane %v4340_v23, 9 }
 0x135   : > { %919 = vst.msk [vmem:[#allocation2 + $0x68] sm:$0xff] %vm905_vm7, %v884_v34  ;;  %4609 = vmatmul.mubr.msk.bf16.gmra.mrb[4].mxu1 %vm3383_vm15, %v3351_v62  ;;  %v2900_v51 = vrot.slane %v2899_v36, 4  ;;  %v2697_v52 = vor.u32 %v2696_v38, %v2693_v31  ;;  %v2712_v53 = vrot.slane %v2710_v39, 5  ;;  %v3215_v11 = vrot.slane %v4341_v27, 5 }
 0x136   : > { %v3343_v50 = vld [vmem:[#allocation2 + $0x18] sm:$0xff]  ;;  %v868_v21 = vpop.permute.xlu0 %867  ;;  %2982 = vrot.lane.b32.xlu1 %v4296_v15, %s4830_s10  ;;  %v2707_v55 = vor.u32 %v2706_v48, %v2702_v47  ;;  %v3218_v57 = vrot.slane %v4342_v28, 5  ;;  %v4352_v46 = vrot.slane %v4316_v40, 9  ;;  %v3159_v59 = vrot.slane %v4317_v41, 5  ;;  %v4321_v15 = vld [vmem:[%s4914_s30 + $0x74] sm:$0x1] }
 0x137   : > { %4593 = vmatmul.mubr.msk.bf16.gmra.mrb[4].mxu0 %vm3383_vm15, %v3343_v50  ;;  %911 = vst.msk [vmem:[#allocation2 + $0x28] sm:$0xff] %vm905_vm7, %v868_v21  ;;  %2423 = vrot.lane.b32.xlu0 %v4735_v29, %s4829_s9  ;;  %v2905_v43 = vsel %vm4966_vm5, %v2900_v51, %v2904_v26  ;;  %v2698_v20 = vrot.slane %v2697_v52, 4  ;;  %v3162_v44 = vrot.slane %v4318_v49, 5  ;;  %v3216_v63 = vsel %vm4916_vm2, %v4360_v37, %v3215_v11  ;;  %s208_s30 = sand.u32 1, %s4806_s13  }
 0x138   : > { %v1206_v56 = vpop.permute.xlu1 %1205  ;;  %v4297_v60 = vcombine.low %v2895_v45, %v2905_v43  ;;  %v2708_v61 = vrot.slane %v2707_v55, 4  ;;  %v3217_v1 = vrot.slane %v3215_v11, 4  ;;  %v3161_v3 = vrot.slane %v3159_v59, 4  ;;  %s3928_s4 = sshll.u32 %s208_s30, 7  ;;  %s6082_s15 = scalar_lea.sflag [#allocation4], %s208_s30 }
 0x139   : > { %1242 = vst.msk [vmem:[#allocation2 + $0x60] sm:$0xff] %vm1229_vm8, %v1206_v56  ;;  %v2703_v2 = vsel %vm4966_vm5, %v2698_v20, %v2702_v47  ;;  %v4361_v6 = vrot.slane %v4343_v54, 9  ;;  %v3222_v12 = vrot.slane %v4344_v58, 5  ;;  %v3225_v14 = vrot.slane %v4345_v13, 5  ;;  %s6029_s5 = scalar_lea.vmem [#allocation3], %s3928_s4 }
 0x13a   : > { %v1190_v4 = vpop.permute.xlu0 %1189  ;;  %2984 = vrot.lane.b32.xlu1 %v4297_v60, %s4830_s10  ;;  %v2713_v9 = vsel %vm4966_vm5, %v2708_v61, %v2712_v53  ;;  %v3219_v10 = vsel %vm4916_vm2, %v3217_v1, %v3218_v57  ;;  %v3160_v19 = vsel %vm4916_vm2, %v4352_v46, %v3159_v59  ;;  %v3163_v5 = vsel %vm4916_vm2, %v3161_v3, %v3162_v44  ;;  %s3807_s8 = sshll.u32 %s6029_s5, 4  ;;  %s6076_s8 = int_to_ptr.vmem [resolvable:$true] %s3807_s8 }
 0x13b   : > { %1234 = vst.msk [vmem:[#allocation2 + $0x20] sm:$0xff] %vm1229_vm8, %v1190_v4  ;;  %2966 = vrot.lane.b32.xlu0 %v4288_v42, %s4830_s10  ;;  %v4289_v17 = vcombine.low %v2703_v2, %v2713_v9  ;;  %v4376_v18 = vcombine.low %v3216_v63, %v3219_v10  ;;  %v3223_v23 = vsel %vm4916_vm2, %v4361_v6, %v3222_v12  ;;  %v3224_v24 = vrot.slane %v3222_v12, 4  ;;  %s4744_s18 = scalar_lea.vmem %s6076_s8, 2048  ;;  %p4751_p1 = scmp.lt.s32.totalorder %s6076_s8, %s4749_s21 }
 0x13c   : > { %v1208_v16 = vpop.permute.xlu1 %1207  ;;  %v4353_v25 = vrot.slane %v4319_v7, 9  ;;  %v3166_v26 = vrot.slane %v4320_v8, 5  ;;  %v3169_v22 = vrot.slane %v4321_v15, 5  ;;  %v4368_v31 = vcombine.low %v3160_v19, %v3163_v5  ;;  %p4745_p12 = scmp.ne.s32.totalorder %s6076_s8, %s4744_s18  ;;  %p4752_p2 = scmp.lt.s32.totalorder %s4750_s23, %s4744_s18 }
 0x13d   : > { %1243 = vst.msk [vmem:[#allocation2 + $0x68] sm:$0xff] %vm1229_vm8, %v1208_v16  ;;  %v3226_v28 = vsel %vm4916_vm2, %v3224_v24, %v3225_v14 }
 0x13e   : > { %v1192_v27 = vpop.permute.xlu0 %1191  ;;  %3303 = vrot.lane.b32.xlu1 %v4376_v18, %s4831_s11  ;;  %v3168_v29 = vrot.slane %v3166_v26, 4  ;;  %v4377_v32 = vcombine.low %v3223_v23, %v3226_v28  ;;  %v3167_v33 = vsel %vm4916_vm2, %v4353_v25, %v3166_v26  ;;  %p4746_p13 = pnand %p4745_p12, %p4894_p4  ;;  %p4753_p3 = por %p4752_p2, %p4751_p1 }
 0x13f   : > { %1235 = vst.msk [vmem:[#allocation2 + $0x28] sm:$0xff] %vm1229_vm8, %v1192_v27  ;;  %2968 = vrot.lane.b32.xlu0 %v4289_v17, %s4830_s10 }
 0x140   : > { %v1387_v30 = vpop.permute.xlu1 %1386  ;;  %v3170_v34 = vsel %vm4916_vm2, %v3168_v29, %v3169_v22  ;;  %p4747_p0 = pneg %p4746_p13 }
 0x141   : > { %1423 = vst.msk [vmem:[#allocation2 + $0x60] sm:$0xff] %vm1410_vm9, %v1387_v30  ;;  %v4369_v36 = vcombine.low %v3167_v33, %v3170_v34 }
 0x142   : > { %v1371_v62 = vpop.permute.xlu0 %1370  ;;  %3305 = vrot.lane.b32.xlu1 %v4377_v32, %s4831_s11  ;;  %p4754_p5 = pnand %p4753_p3, %p4747_p0 }
 0x143   : > { %1415 = vst.msk [vmem:[#allocation2 + $0x20] sm:$0xff] %vm1410_vm9, %v1371_v62  ;;  %3287 = vrot.lane.b32.xlu0 %v4368_v31, %s4831_s11  ;;  %v6016_v62 = vld [vmem:[%s6131_s2] ss:$0 sm:$0xff] }
 0x144   : > { %v1389_v35 = vpop.permute.xlu1 %1388 }
 0x145   : > { %1424 = vst.msk [vmem:[#allocation2 + $0x68] sm:$0xff] %vm1410_vm9, %v1389_v35 }
 0x146   : > { %v1373_v38 = vpop.permute.xlu0 %1372 }
 0x147   : > { %1416 = vst.msk [vmem:[#allocation2 + $0x28] sm:$0xff] %vm1410_vm9, %v1373_v38  ;;  %3289 = vrot.lane.b32.xlu0 %v4369_v36, %s4831_s11  ;;  %s6074_s11 = scalar_lea.hbm %s6132_s3, %s4467_s7 }
 0x148   : > { %v1932_v39 = vpop.permute.xlu1 %1931 }
 0x149   : > { %1968 = vst.msk [vmem:[#allocation2 + $0x60] sm:$0xff] %vm1955_vm10, %v1932_v39 }
 0x14a   : > { %v1916_v0 = vpop.permute.xlu0 %1915 }
 0x14b   : > { %1960 = vst.msk [vmem:[#allocation2 + $0x20] sm:$0xff] %vm1955_vm10, %v1916_v0 }
 0x14c   : > { %v1934_v40 = vpop.permute.xlu1 %1933 }
 0x14d   : > { %1969 = vst.msk [vmem:[#allocation2 + $0x68] sm:$0xff] %vm1955_vm10, %v1934_v40 }
 0x150   : > { %v2253_v41 = vpop.permute.xlu1 %2252  ;;  %v1918_v42 = vpop.permute.xlu0 %1917 }
 0x151   : > { %2289 = vst.msk [vmem:[#allocation2 + $0x60] sm:$0xff] %vm2276_vm11, %v2253_v41 }
 0x152   : > { %1961 = vst.msk [vmem:[#allocation2 + $0x28] sm:$0xff] %vm1955_vm10, %v1918_v42 }
 0x154   : > { %v2255_v45 = vpop.permute.xlu1 %2254  ;;  %v2237_v47 = vpop.permute.xlu0 %2236 }
 0x155   : > { %2290 = vst.msk [vmem:[#allocation2 + $0x68] sm:$0xff] %vm2276_vm11, %v2255_v45  ;;  %2281 = vst.msk [vmem:[#allocation2 + $0x20] sm:$0xff] %vm2276_vm11, %v2237_v47 }
 0x158   : > { %v2434_v48 = vpop.permute.xlu1 %2433  ;;  %v2239_v49 = vpop.permute.xlu0 %2238 }
 0x159   : > { %2470 = vst.msk [vmem:[#allocation2 + $0x60] sm:$0xff] %vm2457_vm12, %v2434_v48 }
 0x15a   : > { %2282 = vst.msk [vmem:[#allocation2 + $0x28] sm:$0xff] %vm2276_vm11, %v2239_v49 }
 0x15c   : > { %v2436_v50 = vpop.permute.xlu1 %2435  ;;  %v2418_v51 = vpop.permute.xlu0 %2417 }
 0x15d   : > { %2471 = vst.msk [vmem:[#allocation2 + $0x68] sm:$0xff] %vm2457_vm12, %v2436_v50  ;;  %2462 = vst.msk [vmem:[#allocation2 + $0x20] sm:$0xff] %vm2457_vm12, %v2418_v51 }
 0x160   : > { %v2979_v52 = vpop.permute.xlu1 %2978  ;;  %v2420_v53 = vpop.permute.xlu0 %2419 }
 0x161   : > { %3015 = vst.msk [vmem:[#allocation2 + $0x60] sm:$0xff] %vm3002_vm13, %v2979_v52 }
 0x162   : > { %2463 = vst.msk [vmem:[#allocation2 + $0x28] sm:$0xff] %vm2457_vm12, %v2420_v53 }
 0x164   : > { %v2963_v21 = vpop.permute.xlu0 %2962  ;;  %v2981_v37 = vpop.permute.xlu1 %2980 }
 0x165   : > { %3007 = vst.msk [vmem:[#allocation2 + $0x20] sm:$0xff] %vm3002_vm13, %v2963_v21  ;;  %3016 = vst.msk [vmem:[#allocation2 + $0x68] sm:$0xff] %vm3002_vm13, %v2981_v37 }
 0x168   : > { %v2965_v54 = vpop.permute.xlu0 %2964  ;;  %v3300_v55 = vpop.permute.xlu1 %3299 }
 0x169   : > { %3008 = vst.msk [vmem:[#allocation2 + $0x28] sm:$0xff] %vm3002_vm13, %v2965_v54 }
 0x16a   : > { %3336 = vst.msk [vmem:[#allocation2 + $0x60] sm:$0xff] %vm3323_vm14, %v3300_v55 }
 0x16c   : > { %v3284_v11 = vpop.permute.xlu0 %3283 }
 0x16d   : > { %3328 = vst.msk [vmem:[#allocation2 + $0x20] sm:$0xff] %vm3323_vm14, %v3284_v11 }
 0x171   : > { %v3352_v57 = vld [vmem:[#allocation2 + $0x60] sm:$0xff]  ;;  %v886_v46 = vpop.permute.xlu1 %885 }
 0x172   : > { %4612 = vmatprep.mubr.msk.bf16.mxu1 %vm3383_vm15, %v3352_v57  ;;  %920 = vst.msk [vmem:[#allocation2 + $0x70] sm:$0xff] %vm905_vm7, %v886_v46 }
 0x173   : > { %v870_v56 = vpop.permute.xlu0 %869 }
 0x174   : > { %v3344_v58 = vld [vmem:[#allocation2 + $0x20] sm:$0xff]  ;;  %912 = vst.msk [vmem:[#allocation2 + $0x30] sm:$0xff] %vm905_vm7, %v870_v56 }
 0x175   : > { %4596 = vmatprep.mubr.msk.bf16.mxu0 %vm3383_vm15, %v3344_v58  ;;  %v3302_v43 = vpop.permute.xlu1 %3301 }
 0x176   : > { %3337 = vst.msk [vmem:[#allocation2 + $0x68] sm:$0xff] %vm3323_vm14, %v3302_v43 }
 0x177   : > { %v3286_v20 = vpop.permute.xlu0 %3285 }
 0x178   : > { %3329 = vst.msk [vmem:[#allocation2 + $0x28] sm:$0xff] %vm3323_vm14, %v3286_v20 }
 0x17c   : > { %v888_v59 = vpop.permute.xlu1 %887 }
 0x17d   : > { %921 = vst.msk [vmem:[#allocation2 + $0x78] sm:$0xff] %vm905_vm7, %v888_v59  ;;  %v3353_v44 = vld [vmem:[#allocation2 + $0x68] sm:$0xff] }
 0x17e   : > { %4613 = vmatmul.mubr.msk.bf16.gmra.mrb[8].mxu1 %vm3383_vm15, %v3353_v44 }
 0x17f   : > { %v3345_v13 = vld [vmem:[#allocation2 + $0x28] sm:$0xff]  ;;  %v872_v60 = vpop.permute.xlu0 %871 }
 0x180   : > { %v1210_v61 = vpop.permute.xlu1 %1209  ;;  %4597 = vmatmul.mubr.msk.bf16.gmra.mrb[8].mxu0 %vm3383_vm15, %v3345_v13  ;;  %913 = vst.msk [vmem:[#allocation2 + $0x38] sm:$0xff] %vm905_vm7, %v872_v60 }
 0x181   : > { %1244 = vst.msk [vmem:[#allocation2 + $0x70] sm:$0xff] %vm1229_vm8, %v1210_v61 }
 0x183   : > { %v1194_v63 = vpop.permute.xlu0 %1193 }
 0x184   : > { %v1212_v1 = vpop.permute.xlu1 %1211  ;;  %1236 = vst.msk [vmem:[#allocation2 + $0x30] sm:$0xff] %vm1229_vm8, %v1194_v63 }
 0x185   : > { %1245 = vst.msk [vmem:[#allocation2 + $0x78] sm:$0xff] %vm1229_vm8, %v1212_v1 }
 0x187   : > { %v1196_v2 = vpop.permute.xlu0 %1195 }
 0x188   : > { %v1391_v3 = vpop.permute.xlu1 %1390  ;;  %1237 = vst.msk [vmem:[#allocation2 + $0x38] sm:$0xff] %vm1229_vm8, %v1196_v2 }
 0x189   : > { %1425 = vst.msk [vmem:[#allocation2 + $0x70] sm:$0xff] %vm1410_vm9, %v1391_v3 }
 0x18b   : > { %v1375_v4 = vpop.permute.xlu0 %1374 }
 0x18c   : > { %v1393_v6 = vpop.permute.xlu1 %1392  ;;  %1417 = vst.msk [vmem:[#allocation2 + $0x30] sm:$0xff] %vm1410_vm9, %v1375_v4 }
 0x18d   : > { %1426 = vst.msk [vmem:[#allocation2 + $0x78] sm:$0xff] %vm1410_vm9, %v1393_v6 }
 0x18f   : > { %v1377_v7 = vpop.permute.xlu0 %1376 }
 0x190   : > { %v1936_v8 = vpop.permute.xlu1 %1935  ;;  %1418 = vst.msk [vmem:[#allocation2 + $0x38] sm:$0xff] %vm1410_vm9, %v1377_v7 }
 0x191   : > { %1970 = vst.msk [vmem:[#allocation2 + $0x70] sm:$0xff] %vm1955_vm10, %v1936_v8 }
 0x193   : > { %v1920_v9 = vpop.permute.xlu0 %1919 }
 0x194   : > { %v1938_v10 = vpop.permute.xlu1 %1937  ;;  %1962 = vst.msk [vmem:[#allocation2 + $0x30] sm:$0xff] %vm1955_vm10, %v1920_v9 }
 0x195   : > { %1971 = vst.msk [vmem:[#allocation2 + $0x78] sm:$0xff] %vm1955_vm10, %v1938_v10 }
 0x198   : > { %v2257_v12 = vpop.permute.xlu1 %2256 }
 0x199   : > { %v1922_v14 = vpop.permute.xlu0 %1921  ;;  %2291 = vst.msk [vmem:[#allocation2 + $0x70] sm:$0xff] %vm2276_vm11, %v2257_v12 }
 0x19a   : > { %1963 = vst.msk [vmem:[#allocation2 + $0x38] sm:$0xff] %vm1955_vm10, %v1922_v14 }
 0x19c   : > { %v2259_v15 = vpop.permute.xlu1 %2258 }
 0x19d   : > { %v2241_v16 = vpop.permute.xlu0 %2240  ;;  %2292 = vst.msk [vmem:[#allocation2 + $0x78] sm:$0xff] %vm2276_vm11, %v2259_v15 }
 0x19e   : > { %2283 = vst.msk [vmem:[#allocation2 + $0x30] sm:$0xff] %vm2276_vm11, %v2241_v16 }
 0x1a0   : > { %v2438_v17 = vpop.permute.xlu1 %2437 }
 0x1a1   : > { %v2243_v18 = vpop.permute.xlu0 %2242  ;;  %2472 = vst.msk [vmem:[#allocation2 + $0x70] sm:$0xff] %vm2457_vm12, %v2438_v17 }
 0x1a2   : > { %2284 = vst.msk [vmem:[#allocation2 + $0x38] sm:$0xff] %vm2276_vm11, %v2243_v18 }
 0x1a4   : > { %v2440_v19 = vpop.permute.xlu1 %2439 }
 0x1a5   : > { %v2422_v5 = vpop.permute.xlu0 %2421  ;;  %2473 = vst.msk [vmem:[#allocation2 + $0x78] sm:$0xff] %vm2457_vm12, %v2440_v19 }
 0x1a6   : > { %2464 = vst.msk [vmem:[#allocation2 + $0x30] sm:$0xff] %vm2457_vm12, %v2422_v5 }
 0x1a8   : > { %v2983_v23 = vpop.permute.xlu1 %2982 }
 0x1a9   : > { %v2424_v24 = vpop.permute.xlu0 %2423  ;;  %3017 = vst.msk [vmem:[#allocation2 + $0x70] sm:$0xff] %vm3002_vm13, %v2983_v23 }
 0x1aa   : > { %2465 = vst.msk [vmem:[#allocation2 + $0x38] sm:$0xff] %vm2457_vm12, %v2424_v24 }
 0x1ac   : > { %v2985_v25 = vpop.permute.xlu1 %2984 }
 0x1ad   : > { %v2967_v26 = vpop.permute.xlu0 %2966  ;;  %3018 = vst.msk [vmem:[#allocation2 + $0x78] sm:$0xff] %vm3002_vm13, %v2985_v25 }
 0x1ae   : > { %3009 = vst.msk [vmem:[#allocation2 + $0x30] sm:$0xff] %vm3002_vm13, %v2967_v26 }
 0x1b0   : > { %v3304_v22 = vpop.permute.xlu1 %3303 }
 0x1b1   : > { %v2969_v27 = vpop.permute.xlu0 %2968  ;;  %3338 = vst.msk [vmem:[#allocation2 + $0x70] sm:$0xff] %vm3323_vm14, %v3304_v22 }
 0x1b2   : > { %3010 = vst.msk [vmem:[#allocation2 + $0x38] sm:$0xff] %vm3002_vm13, %v2969_v27 }
 0x1b4   : > { %v3306_v28 = vpop.permute.xlu1 %3305 }
 0x1b5   : > { %v3288_v29 = vpop.permute.xlu0 %3287  ;;  %3339 = vst.msk [vmem:[#allocation2 + $0x78] sm:$0xff] %vm3323_vm14, %v3306_v28 }
 0x1b6   : > { %3330 = vst.msk [vmem:[#allocation2 + $0x30] sm:$0xff] %vm3323_vm14, %v3288_v29 }
 0x1b8   : > { %v3354_v30 = vld [vmem:[#allocation2 + $0x70] sm:$0xff] }
 0x1b9   : > { %v3290_v31 = vpop.permute.xlu0 %3289  ;;  %4616 = vmatprep.mubr.msk.bf16.mxu1 %vm3383_vm15, %v3354_v30 }
 0x1ba   : > { %3331 = vst.msk [vmem:[#allocation2 + $0x38] sm:$0xff] %vm3323_vm14, %v3290_v31 }
 0x1bc   : > { %v3355_v32 = vld [vmem:[#allocation2 + $0x78] sm:$0xff] }
 0x1bd   : > { %v3346_v33 = vld [vmem:[#allocation2 + $0x30] sm:$0xff]  ;;  %4617 = vmatmul.mubr.msk.bf16.gmra.mrb[12].mxu1 %vm3383_vm15, %v3355_v32 }
 0x1be   : > { %4600 = vmatprep.mubr.msk.bf16.mxu0 %vm3383_vm15, %v3346_v33 }
 0x1c1   : > { %v3347_v34 = vld [vmem:[#allocation2 + $0x38] sm:$0xff] }
 0x1c2   : > { %4601 = vmatmul.mubr.msk.bf16.gmra.mrb[12].mxu0 %vm3383_vm15, %v3347_v34 }
 0x1c6   : > { %v4590_v35 = vpop.f32.mrb[0].mxu0  ;;  %v4606_v36 = vpop.f32.mrb[0].mxu1 }
 0x1c7   : > { %v3479_v38 = vadd.f32 %v4590_v35, %v6016_v62  ;;  %v3543_v39 = vadd.f32 %v4606_v36, %v6016_v62  ;;  %v3470_v0 = vpop.f32.mrb[1].mxu0  ;;  %v3534_v40 = vpop.f32.mrb[1].mxu1 }
 0x1c8   : > { %v3471_v41 = vadd.f32 %v6016_v62, %v3470_v0  ;;  %v3535_v42 = vadd.f32 %v6016_v62, %v3534_v40  ;;  %v4591_v45 = vpop.f32.mrb[2].mxu0  ;;  %v4607_v47 = vpop.f32.mrb[2].mxu1 }
 0x1c9   : > { %v3482_v48 = vadd.f32 %v4591_v45, %v6016_v62  ;;  %v3546_v49 = vadd.f32 %v4607_v47, %v6016_v62  ;;  %v3473_v50 = vpop.f32.mrb[3].mxu0  ;;  %v3537_v51 = vpop.f32.mrb[3].mxu1  ;;  %v3599_v21 = vmax.f32 %v3479_v38, 0.0  ;;  %v3615_v37 = vmax.f32 %v3543_v39, 0.0 }
 0x1ca   : > { %v3474_v52 = vadd.f32 %v6016_v62, %v3473_v50  ;;  %v3538_v53 = vadd.f32 %v6016_v62, %v3537_v51  ;;  %v3597_v11 = vmax.f32 %v3471_v41, 0.0  ;;  %v3613_v57 = vmax.f32 %v3535_v42, 0.0 }
 0x1cb   : > { %v3600_v54 = vmax.f32 %v3482_v48, 0.0  ;;  %v3616_v55 = vmax.f32 %v3546_v49, 0.0 }
 0x1cc   : > { %v3598_v46 = vmax.f32 %v3474_v52, 0.0  ;;  %v3614_v56 = vmax.f32 %v3538_v53, 0.0 }
 0x1cd   : > { %v4476_v58 = vpack.c.bf16 %v3600_v54, %v3599_v21  ;;  %v4516_v43 = vpack.c.bf16 %v3616_v55, %v3615_v37 }
 0x1ce   : > { %v4471_v20 = vpack.c.bf16 %v3598_v46, %v3597_v11  ;;  %v4511_v59 = vpack.c.bf16 %v3614_v56, %v3613_v57 }
 0x1cf   : > { %4548 = vst [vmem:[%s6029_s5 + $0x8] sm:$0xff] %v4476_v58   ;;  %4556 = vst [vmem:[%s6029_s5 + $0x48] sm:$0xff] %v4516_v43  }
 0x1d0   : > { %4472 = vst [vmem:[%s6029_s5] sm:$0xff] %v4471_v20   ;;  %4555 = vst [vmem:[%s6029_s5 + $0x40] sm:$0xff] %v4511_v59  }
 0x208   : > { %v4610_v44 = vpop.f32.mrb[4].mxu1 }
 0x209   : > { %v3559_v13 = vadd.f32 %v4610_v44, %v6016_v62  ;;  %v3550_v60 = vpop.f32.mrb[5].mxu1 }
 0x20a   : > { %v4594_v61 = vpop.f32.mrb[4].mxu0  ;;  %v3551_v63 = vadd.f32 %v6016_v62, %v3550_v60  ;;  %v4611_v1 = vpop.f32.mrb[6].mxu1 }
 0x20b   : > { %v3495_v2 = vadd.f32 %v4594_v61, %v6016_v62  ;;  %v3486_v3 = vpop.f32.mrb[5].mxu0  ;;  %v3562_v4 = vadd.f32 %v4611_v1, %v6016_v62  ;;  %v3553_v6 = vpop.f32.mrb[7].mxu1  ;;  %v3619_v10 = vmax.f32 %v3559_v13, 0.0 }
 0x20c   : > { %v3487_v7 = vadd.f32 %v6016_v62, %v3486_v3  ;;  %v4595_v8 = vpop.f32.mrb[6].mxu0  ;;  %v3554_v9 = vadd.f32 %v6016_v62, %v3553_v6  ;;  %v3617_v16 = vmax.f32 %v3551_v63, 0.0 }
 0x20d   : > { %v3498_v12 = vadd.f32 %v4595_v8, %v6016_v62  ;;  %v3620_v14 = vmax.f32 %v3562_v4, 0.0  ;;  %v3489_v15 = vpop.f32.mrb[7].mxu0  ;;  %v3603_v19 = vmax.f32 %v3495_v2, 0.0 }
 0x20e   : > { %v3490_v17 = vadd.f32 %v6016_v62, %v3489_v15  ;;  %v3618_v18 = vmax.f32 %v3554_v9, 0.0  ;;  %v3601_v24 = vmax.f32 %v3487_v7, 0.0 }
 0x20f   : > { %v3604_v5 = vmax.f32 %v3498_v12, 0.0  ;;  %v4526_v23 = vpack.c.bf16 %v3620_v14, %v3619_v10 }
 0x210   : > { %v3602_v25 = vmax.f32 %v3490_v17, 0.0  ;;  %v4521_v26 = vpack.c.bf16 %v3618_v18, %v3617_v16 }
 0x211   : > { %v4486_v22 = vpack.c.bf16 %v3604_v5, %v3603_v19  ;;  %4558 = vst [vmem:[%s6029_s5 + $0x58] sm:$0xff] %v4526_v23  }
 0x212   : > { %v4481_v27 = vpack.c.bf16 %v3602_v25, %v3601_v24  ;;  %4557 = vst [vmem:[%s6029_s5 + $0x50] sm:$0xff] %v4521_v26  }
 0x213   : > { %4550 = vst [vmem:[%s6029_s5 + $0x18] sm:$0xff] %v4486_v22  }
 0x214   : > { %4549 = vst [vmem:[%s6029_s5 + $0x10] sm:$0xff] %v4481_v27  }
 0x251   : > { %v4614_v28 = vpop.f32.mrb[8].mxu1 }
 0x252   : > { %v3575_v29 = vadd.f32 %v4614_v28, %v6016_v62  ;;  %v3566_v30 = vpop.f32.mrb[9].mxu1 }
 0x253   : > { %v4598_v31 = vpop.f32.mrb[8].mxu0  ;;  %v3567_v32 = vadd.f32 %v6016_v62, %v3566_v30  ;;  %v4615_v33 = vpop.f32.mrb[10].mxu1 }
 0x254   : > { %v3511_v34 = vadd.f32 %v4598_v31, %v6016_v62  ;;  %v3502_v35 = vpop.f32.mrb[9].mxu0  ;;  %v3578_v36 = vadd.f32 %v4615_v33, %v6016_v62  ;;  %v3569_v38 = vpop.f32.mrb[11].mxu1  ;;  %v3623_v41 = vmax.f32 %v3575_v29, 0.0 }
 0x255   : > { %v3503_v39 = vadd.f32 %v6016_v62, %v3502_v35  ;;  %v4599_v0 = vpop.f32.mrb[10].mxu0  ;;  %v3570_v40 = vadd.f32 %v6016_v62, %v3569_v38  ;;  %v3621_v48 = vmax.f32 %v3567_v32, 0.0 }
 0x256   : > { %v3514_v42 = vadd.f32 %v4599_v0, %v6016_v62  ;;  %v3624_v45 = vmax.f32 %v3578_v36, 0.0  ;;  %v3505_v47 = vpop.f32.mrb[11].mxu0  ;;  %v3607_v51 = vmax.f32 %v3511_v34, 0.0 }
 0x257   : > { %v3506_v49 = vadd.f32 %v6016_v62, %v3505_v47  ;;  %v3622_v50 = vmax.f32 %v3570_v40, 0.0  ;;  %v3605_v21 = vmax.f32 %v3503_v39, 0.0 }
 0x258   : > { %v3608_v52 = vmax.f32 %v3514_v42, 0.0  ;;  %v4536_v53 = vpack.c.bf16 %v3624_v45, %v3623_v41 }
 0x259   : > { %v3606_v37 = vmax.f32 %v3506_v49, 0.0  ;;  %v4531_v54 = vpack.c.bf16 %v3622_v50, %v3621_v48 }
 0x25a   : > { %v4496_v55 = vpack.c.bf16 %v3608_v52, %v3607_v51  ;;  %4560 = vst [vmem:[%s6029_s5 + $0x68] sm:$0xff] %v4536_v53  }
 0x25b   : > { %v4491_v11 = vpack.c.bf16 %v3606_v37, %v3605_v21  ;;  %4559 = vst [vmem:[%s6029_s5 + $0x60] sm:$0xff] %v4531_v54  }
 0x25c   : > { %4552 = vst [vmem:[%s6029_s5 + $0x28] sm:$0xff] %v4496_v55  }
 0x25d   : > { %4551 = vst [vmem:[%s6029_s5 + $0x20] sm:$0xff] %v4491_v11  }
 0x290   : > { %v4618_v57 = vpop.f32.mrb[12].mxu1 }
 0x291   : > { %v3591_v46 = vadd.f32 %v4618_v57, %v6016_v62  ;;  %v3582_v56 = vpop.f32.mrb[13].mxu1 }
 0x292   : > { %v3583_v58 = vadd.f32 %v6016_v62, %v3582_v56  ;;  %v4619_v43 = vpop.f32.mrb[14].mxu1 }
 0x293   : > { %v3594_v20 = vadd.f32 %v4619_v43, %v6016_v62  ;;  %v3585_v59 = vpop.f32.mrb[15].mxu1  ;;  %v3627_v60 = vmax.f32 %v3591_v46, 0.0 }
 0x294   : > { %v3586_v44 = vadd.f32 %v6016_v62, %v3585_v59  ;;  %v3625_v2 = vmax.f32 %v3583_v58, 0.0 }
 0x295   : > { %v4602_v13 = vpop.f32.mrb[12].mxu0  ;;  %v3628_v61 = vmax.f32 %v3594_v20, 0.0 }
 0x296   : > { %v3527_v63 = vadd.f32 %v4602_v13, %v6016_v62  ;;  %v3518_v1 = vpop.f32.mrb[13].mxu0  ;;  %v3626_v3 = vmax.f32 %v3586_v44, 0.0 }
 0x297   : > { %v3519_v4 = vadd.f32 %v6016_v62, %v3518_v1  ;;  %v4603_v6 = vpop.f32.mrb[14].mxu0  ;;  %v4546_v7 = vpack.c.bf16 %v3628_v61, %v3627_v60 }
 0x298   : > { %v3530_v8 = vadd.f32 %v4603_v6, %v6016_v62  ;;  %v3521_v9 = vpop.f32.mrb[15].mxu0  ;;  %v4541_v10 = vpack.c.bf16 %v3626_v3, %v3625_v2  ;;  %v3611_v14 = vmax.f32 %v3527_v63, 0.0 }
 0x299   : > { %4562 = vst [vmem:[%s6029_s5 + $0x78] sm:$0xff] %v4546_v7   ;;  %v3522_v12 = vadd.f32 %v6016_v62, %v3521_v9  ;;  %v3609_v16 = vmax.f32 %v3519_v4, 0.0 }
 0x29a   : > { %v3612_v15 = vmax.f32 %v3530_v8, 0.0  ;;  %4561 = vst [vmem:[%s6029_s5 + $0x70] sm:$0xff] %v4541_v10  }
 0x29b   : > { %v3610_v17 = vmax.f32 %v3522_v12, 0.0 }
 0x29c   : > { %v4506_v18 = vpack.c.bf16 %v3612_v15, %v3611_v14 }
 0x29d   : > { %v4501_v19 = vpack.c.bf16 %v3610_v17, %v3609_v16 }
 0x29e   : > { %4554 = vst [vmem:[%s6029_s5 + $0x38] sm:$0xff] %v4506_v18  }
 0x29f   : > { %4553 = vst [vmem:[%s6029_s5 + $0x30] sm:$0xff] %v4501_v19  }
 0x2a0   : > { %4757 = shalt.err (!%p4754_p5)
}
 0x2a1   : > { %s4758_s26 = scalar_lea.hbm %s6074_s11, 2048  ;;  %s4762_s29 = scalar_lea.hbm %s6132_s3, 4096 }
 0x2a2   : > { %p4759_p6 = scmp.ne.s32.totalorder %s6074_s11, %s4758_s26  ;;  %p4763_p10 = scmp.lt.u32.totalorder %s6074_s11, %s6132_s3 }
 0x2a3   : > { %p4764_p11 = scmp.lt.u32.totalorder %s4762_s29, %s4758_s26  ;;  %p4766_p13 = scmp.lt.u32.totalorder %s4758_s26, %s6074_s11 }
 0x2a4   : > { %p4760_p7 = pnand %p4759_p6, %p4894_p4 }
 0x2a5   : > { %p4765_p12 = por %p4764_p11, %p4763_p10 }
 0x2a6   : > { %p4761_p9 = pneg %p4760_p7 }
 0x2a7   : > { %p4767_p0 = por %p4766_p13, %p4765_p12 }
 0x2a9   : > { %p4768_p1 = pnand %p4767_p0, %p4761_p9 }
 0x2ab   : > { %4771 = shalt.err (!%p4768_p1)
}
 0x2ac   : > { %s4833_s5 = smov 64  }
 0x2ad   : > { %4629 = dma.vmem_to_hbm [thread:$0]  (%p4894_p4), %s6076_s8, 2048, %s6074_s11, %s6082_s15, %s4833_s5, %s4833_s5, %s4826_s6  }
 0x2ae PF: > { %p4635_p2 = scmp.ge.s32.totalorder %s4822_s17, 2  ;;  %s3822_s7 = sand.u32 1, %s4802_s12  }
 0x2af   : > { %s3823_s9 = scalar_lea.sflag [#allocation4], %s3822_s7 }
 0x2b0   : > { %p4632_p3 = pnand %p4635_p2, %p4901_p8 }
 0x2b2   : > { %4797 = dma.done.wait (!%p4632_p3), %s3823_s9, 2048  }
 0x2b3   : > { %4799 = vsyncadd (!%p4632_p3), %s3823_s9, 4294965248  ;;  %s16_s17 = sadd.s32 1, %s4822_s17   ;;  %s6139_s12 = smov %s4806_s13 }
 0x2b4   : > { %p13_p5 = scmp.ge.s32.totalorder %s16_s17, 4   ;;  %s6140_s13 = smov %s4810_s14 }
 0x2b5   : > { %s6141_s14 = smov %s4907_s25  ;;  %s6142_s15 = smov %s4818_s16 }
 0x2b6   : > { %s6143_s16 = smov %s6145_s20  ;;  %15 = sbr.rel (!%p13_p5) target bundleno = 4 (0x4), region = 76 }
 0x2bd   :  { %3828 = vsyncpa [#allocation4], 1 }
 0x2be   :  { %3830 = vsyncpa [#allocation4 + $0x1], 1 }

</bundles_post_ra>
